<compile_context>
chip_gen: v7x
topology: tpu7x:2x2x1
jax: 0.10.0
libtpu: 0.0.40
codegen_flags: <defaults>
</compile_context>

<pallas_src>
import functools

import jax
import jax.numpy as jnp
from jax import lax
from jax.experimental import pallas as pl
from jax.experimental.pallas import tpu as pltpu

_LANE = 128                      # hidden dim padded to a multiple of this
_SUBLANE = 8                     # batch padded to a multiple of this
_TB_MAX = 16                     # time-chunk size (inner unrolled loop length)
_VMEM_LIMIT = 32 * 1024 * 1024   # safe explicit scoped-VMEM request on v5e/v6e/v7x


def _round_up(x, m):
    return ((x + m - 1) // m) * m


# ----------------------------------------------------------------------------
# In-kernel LSTM cell (PyTorch gate order [i, f, g, o]; Hp lane-aligned so the
# gate slices are free; bf16 MXU operands, f32 accumulation, f32 elementwise).
# ----------------------------------------------------------------------------
def _cell(g_t, h, c, whh_bf16, Hp):
    gates = g_t + jnp.dot(h.astype(jnp.bfloat16), whh_bf16,
                          preferred_element_type=jnp.float32)      # (Bp, 4Hp) f32
    i_g = jax.nn.sigmoid(gates[:, 0 * Hp:1 * Hp])
    f_g = jax.nn.sigmoid(gates[:, 1 * Hp:2 * Hp])
    g_g = jnp.tanh(gates[:, 2 * Hp:3 * Hp])
    o_g = jax.nn.sigmoid(gates[:, 3 * Hp:4 * Hp])
    c_new = f_g * c + i_g * g_g
    h_new = o_g * jnp.tanh(c_new)
    return h_new, c_new


# ----------------------------------------------------------------------------
# Fused kernels: in-projection + recurrence for one time chunk.
# ----------------------------------------------------------------------------
def _lstm_chunk_kernel(x_ref, wih_ref, whh_ref, b_ref, hseq_ref,
                       gx_ref, h_ref, c_ref, *, t_real):
    """One time-chunk of a (non-final) LSTM layer.

    x_ref   : (Tb, Bp, Din)  input chunk (time-major)
    wih_ref : (Din, 4Hp) bf16, whh_ref : (Hp, 4Hp) bf16, b_ref : (1, 4Hp) f32
    hseq_ref: (Tb, Bp, Hp) bf16 output chunk (next layer's input)
    gx_ref  : (Tb, Bp, 4Hp) f32 scratch ; h_ref/c_ref : (Bp, Hp) f32 carries
    """
    chunk = pl.program_id(0)
    tb, bp, din = x_ref.shape
    G = gx_ref.shape[-1]
    Hp = G // 4

    @pl.when(chunk == 0)
    def _():
        h_ref[...] = jnp.zeros_like(h_ref)
        c_ref[...] = jnp.zeros_like(c_ref)

    # Chunk input projection: ONE MXU matmul for all Tb timesteps (bias folded).
    x2d = x_ref[...].astype(jnp.bfloat16).reshape(tb * bp, din)
    gx = jnp.dot(x2d, wih_ref[...], preferred_element_type=jnp.float32) + b_ref[...]
    gx_ref[...] = gx.reshape(tb, bp, G)

    whh = whh_ref[...]
    mask_tail = (t_real % tb) != 0          # static: only traced if T % Tb != 0

    def step(t, carry):
        h, c = carry
        h_new, c_new = _cell(gx_ref[t], h, c, whh, Hp)
        hseq_ref[t] = h_new.astype(hseq_ref.dtype)
        if mask_tail:
            valid = (chunk * tb + t) < t_real
            h_new = jnp.where(valid, h_new, h)
            c_new = jnp.where(valid, c_new, c)
        return (h_new, c_new)

    # Short fixed trip count -> full unroll for LLO scheduler visibility.
    h, c = lax.fori_loop(0, tb, step, (h_ref[...], c_ref[...]), unroll=True)
    h_ref[...] = h
    c_ref[...] = c


def _lstm_chunk_last_kernel(x_ref, wih_ref, whh_ref, b_ref, wout_ref, bout_ref,
                            out_ref, gx_ref, h_ref, c_ref, *, t_real):
    """Final LSTM layer fused with the output Linear; only h_T is consumed.

    wout_ref : (Hp, O) bf16 ; bout_ref : (1, O) f32 ; out_ref : (Bp, O) f32
    (out_ref has a constant block index -> resident in VMEM across all chunks,
     written back to HBM once after the last chunk.)
    """
    chunk = pl.program_id(0)
    tb, bp, din = x_ref.shape
    G = gx_ref.shape[-1]
    Hp = G // 4

    @pl.when(chunk == 0)
    def _():
        h_ref[...] = jnp.zeros_like(h_ref)
        c_ref[...] = jnp.zeros_like(c_ref)

    x2d = x_ref[...].astype(jnp.bfloat16).reshape(tb * bp, din)
    gx = jnp.dot(x2d, wih_ref[...], preferred_element_type=jnp.float32) + b_ref[...]
    gx_ref[...] = gx.reshape(tb, bp, G)

    whh = whh_ref[...]
    mask_tail = (t_real % tb) != 0

    def step(t, carry):
        h, c = carry
        h_new, c_new = _cell(gx_ref[t], h, c, whh, Hp)
        if mask_tail:
            valid = (chunk * tb + t) < t_real
            h_new = jnp.where(valid, h_new, h)
            c_new = jnp.where(valid, c_new, c)
        return (h_new, c_new)

    h, c = lax.fori_loop(0, tb, step, (h_ref[...], c_ref[...]), unroll=True)
    h_ref[...] = h
    c_ref[...] = c

    @pl.when(chunk == pl.num_programs(0) - 1)
    def _():
        out_ref[...] = (
            jnp.dot(h.astype(jnp.bfloat16), wout_ref[...],
                    preferred_element_type=jnp.float32) + bout_ref[...]
        ).astype(out_ref.dtype)


# ----------------------------------------------------------------------------
# pallas_call wrappers (time-chunked grid, carries in persistent scratch).
# ----------------------------------------------------------------------------
def _compiler_params():
    return pltpu.CompilerParams(
        dimension_semantics=("arbitrary",),     # recurrence carries across chunks
        vmem_limit_bytes=_VMEM_LIMIT,
    )


def _lstm_layer(xt, w_ih_t, w_hh_t, bias, tb, t_real):
    t_pad, bp, din = xt.shape
    G = w_ih_t.shape[1]
    Hp = G // 4
    n_chunks = t_pad // tb
    kernel = functools.partial(_lstm_chunk_kernel, t_real=t_real)
    return pl.pallas_call(
        kernel,
        out_shape=jax.ShapeDtypeStruct((t_pad, bp, Hp), jnp.bfloat16),
        grid_spec=pltpu.PrefetchScalarGridSpec(
            num_scalar_prefetch=0,
            grid=(n_chunks,),
            in_specs=[
                pl.BlockSpec((tb, bp, din), lambda c: (c, 0, 0)),   # input chunk
                pl.BlockSpec((din, G), lambda c: (0, 0)),           # W_ih (resident)
                pl.BlockSpec((Hp, G), lambda c: (0, 0)),            # W_hh (resident)
                pl.BlockSpec((1, G), lambda c: (0, 0)),             # bias (resident)
            ],
            out_specs=pl.BlockSpec((tb, bp, Hp), lambda c: (c, 0, 0)),
            scratch_shapes=[
                pltpu.VMEM((tb, bp, G), jnp.float32),   # chunk gate pre-activations
                pltpu.VMEM((bp, Hp), jnp.float32),      # h carry (persists)
                pltpu.VMEM((bp, Hp), jnp.float32),      # c carry (persists)
            ],
        ),
        compiler_params=_compiler_params(),
    )(xt, w_ih_t, w_hh_t, bias)


def _lstm_last_layer(xt, w_ih_t, w_hh_t, bias, w_out_t, b_out, tb, t_real):
    t_pad, bp, din = xt.shape
    G = w_ih_t.shape[1]
    Hp = G // 4
    O = w_out_t.shape[1]
    n_chunks = t_pad // tb
    kernel = functools.partial(_lstm_chunk_last_kernel, t_real=t_real)
    return pl.pallas_call(
        kernel,
        out_shape=jax.ShapeDtypeStruct((bp, O), jnp.float32),
        grid_spec=pltpu.PrefetchScalarGridSpec(
            num_scalar_prefetch=0,
            grid=(n_chunks,),
            in_specs=[
                pl.BlockSpec((tb, bp, din), lambda c: (c, 0, 0)),
                pl.BlockSpec((din, G), lambda c: (0, 0)),
                pl.BlockSpec((Hp, G), lambda c: (0, 0)),
                pl.BlockSpec((1, G), lambda c: (0, 0)),
                pl.BlockSpec((Hp, O), lambda c: (0, 0)),             # W_out
                pl.BlockSpec((1, O), lambda c: (0, 0)),              # b_out
            ],
            out_specs=pl.BlockSpec((bp, O), lambda c: (0, 0)),
            scratch_shapes=[
                pltpu.VMEM((tb, bp, G), jnp.float32),
                pltpu.VMEM((bp, Hp), jnp.float32),
                pltpu.VMEM((bp, Hp), jnp.float32),
            ],
        ),
        compiler_params=_compiler_params(),
    )(xt, w_ih_t, w_hh_t, bias, w_out_t, b_out)


@jax.jit
def lstm_forward(x, lstm_params, w_out_t, b_out):
    """Full module forward.

    x           : (B, T, D) batch-first (like PyTorch)
    lstm_params : list of (w_ih_t [Din_p,4Hp] bf16, w_hh_t [Hp,4Hp] bf16,
                           bias [1,4Hp] f32) — prepared by prepare_params()
    w_out_t     : (Hp, O) bf16 ; b_out : (1, O) f32
    returns     : (B, O) f32
    """
    B, T, _ = x.shape
    bp = _round_up(B, _SUBLANE)
    tb = T if T <= _TB_MAX else _TB_MAX
    n_chunks = pl.cdiv(T, tb)
    t_pad = n_chunks * tb

    # Time-major + pad batch / time (padded timesteps are masked in-kernel).
    xt = jnp.transpose(x, (1, 0, 2))
    xt = jnp.pad(xt, ((0, t_pad - T), (0, bp - B), (0, 0)))

    n_layers = len(lstm_params)
    out = None
    for li, (w_ih_t, w_hh_t, bias) in enumerate(lstm_params):
        if li + 1 < n_layers:
            xt = _lstm_layer(xt, w_ih_t, w_hh_t, bias, tb, T)   # (t_pad, bp, Hp) bf16
            # Dropout between stacked LSTM layers is identity in eval mode.
        else:
            out = _lstm_last_layer(xt, w_ih_t, w_hh_t, bias, w_out_t, b_out, tb, T)
    return out[:B]


# ----------------------------------------------------------------------------
# Parameter construction (PyTorch shapes) + kernel-side preparation (pad/cast).
# ----------------------------------------------------------------------------
def init_params(key, input_dim, hidden_dim, n_hidden, output_dim):
    """Raw params in nn.LSTM / nn.Linear shapes; Uniform(-1/sqrt(H), 1/sqrt(H)).
    Mirrors Layers.get('LSTM'): LSTM(D->H) + n_hidden x LSTM(H->H), then
    Linear(H -> output_dim)."""
    k = 1.0 / (hidden_dim ** 0.5)
    raw = []
    in_dim = input_dim
    for _ in range(n_hidden + 1):
        key, k1, k2, k3, k4 = jax.random.split(key, 5)
        w_ih = jax.random.uniform(k1, (4 * hidden_dim, in_dim), jnp.float32, -k, k)
        w_hh = jax.random.uniform(k2, (4 * hidden_dim, hidden_dim), jnp.float32, -k, k)
        b_ih = jax.random.uniform(k3, (4 * hidden_dim,), jnp.float32, -k, k)
        b_hh = jax.random.uniform(k4, (4 * hidden_dim,), jnp.float32, -k, k)
        raw.append((w_ih, w_hh, b_ih, b_hh))
        in_dim = hidden_dim
    key, k1, k2 = jax.random.split(key, 3)
    w_out = jax.random.uniform(k1, (output_dim, hidden_dim), jnp.float32, -k, k)
    b_out = jax.random.uniform(k2, (output_dim,), jnp.float32, -k, k)
    return raw, w_out, b_out


def _pad_gate_cols(w_t, H, Hp):
    """(rows, 4H) -> (rows, 4Hp): each gate's H columns placed at offset g*Hp."""
    if Hp == H:
        return w_t
    rows = w_t.shape[0]
    out = jnp.zeros((rows, 4 * Hp), w_t.dtype)
    for g in range(4):
        out = out.at[:, g * Hp:g * Hp + H].set(w_t[:, g * H:(g + 1) * H])
    return out


def prepare_params(raw_lstm, w_out, b_out):
    """Transpose, fold biases, zero-pad H -> Hp (multiple of 128), cast to bf16.
    Zero padding keeps padded hidden units exactly 0, so the padded network
    computes the identical function."""
    H = raw_lstm[0][1].shape[1]
    Hp = _round_up(H, _LANE)
    prepared = []
    for li, (w_ih, w_hh, b_ih, b_hh) in enumerate(raw_lstm):
        din = w_ih.shape[1]
        din_p = din if li == 0 else Hp
        wih_t = _pad_gate_cols(w_ih.T, H, Hp)                         # (din, 4Hp)
        wih_t = jnp.pad(wih_t, ((0, din_p - din), (0, 0)))
        whh_t = _pad_gate_cols(w_hh.T, H, Hp)                         # (H, 4Hp)
        whh_t = jnp.pad(whh_t, ((0, Hp - H), (0, 0)))
        bias = _pad_gate_cols((b_ih + b_hh)[None, :], H, Hp)          # (1, 4Hp)
        prepared.append((wih_t.astype(jnp.bfloat16),
                         whh_t.astype(jnp.bfloat16),
                         bias.astype(jnp.float32)))
    w_out_t = jnp.pad(w_out.T, ((0, Hp - H), (0, 0))).astype(jnp.bfloat16)   # (Hp, O)
    return prepared, w_out_t, b_out[None, :].astype(jnp.float32)


# ----------------------------------------------------------------------------
# Pure-JAX reference (unpadded; mirrors bf16-operand / f32-accumulate numerics).
# ----------------------------------------------------------------------------
def lstm_forward_ref(x, raw_lstm, w_out, b_out):
    B, T, _ = x.shape
    xt = jnp.transpose(x, (1, 0, 2))                                  # (T, B, D)
    h_last = None
    for (w_ih, w_hh, b_ih, b_hh) in raw_lstm:
        H = w_hh.shape[1]
        din = w_ih.shape[1]
        wih_t = w_ih.T.astype(jnp.bfloat16)
        whh_t = w_hh.T.astype(jnp.bfloat16)
        bias = (b_ih + b_hh)[None, :]
        gx = (jnp.dot(xt.reshape(T * B, din).astype(jnp.bfloat16), wih_t,
                      preferred_element_type=jnp.float32) + bias).reshape(T, B, 4 * H)

        def step(carry, g_t, whh_t=whh_t, H=H):
            h, c = carry
            gates = g_t + jnp.dot(h.astype(jnp.bfloat16), whh_t,
                                  preferred_element_type=jnp.float32)
            i = jax.nn.sigmoid(gates[:, 0 * H:1 * H])
            f = jax.nn.sigmoid(gates[:, 1 * H:2 * H])
            g = jnp.tanh(gates[:, 2 * H:3 * H])
            o = jax.nn.sigmoid(gates[:, 3 * H:4 * H])
            c = f * c + i * g
            h = o * jnp.tanh(c)
            return (h, c), h

        init = (jnp.zeros((B, H), jnp.float32), jnp.zeros((B, H), jnp.float32))
        (h_last, _), hs = lax.scan(step, init, gx)
        xt = hs
    return (jnp.dot(h_last.astype(jnp.bfloat16), w_out.T.astype(jnp.bfloat16),
                    preferred_element_type=jnp.float32) + b_out[None, :])


# ----------------------------------------------------------------------------
if __name__ == "__main__":
    # Small config consistent with Params(input_dim, hidden_dim, n_hidden, ...)
    B, T = 2, 8
    input_dim, hidden_dim, n_hidden, output_dim = 16, 32, 1, 9

    key = jax.random.PRNGKey(0)
    key, kx, kp = jax.random.split(key, 3)
    x = jax.random.normal(kx, (B, T, input_dim), jnp.float32)   # (B, T, D)

    raw_lstm, w_out, b_out = init_params(kp, input_dim, hidden_dim, n_hidden,
                                         output_dim)
    lstm_params, w_out_t, b_out_k = prepare_params(raw_lstm, w_out, b_out)

    out = lstm_forward(x, lstm_params, w_out_t, b_out_k)
    out = jax.block_until_ready(out)

    ref = lstm_forward_ref(x, raw_lstm, w_out, b_out)
    assert out.shape == (B, output_dim), out.shape
    max_err = float(jnp.max(jnp.abs(out - ref)))
    assert jnp.allclose(out, ref, rtol=1e-3, atol=1e-3), ("mismatch", max_err)

    print("KERNEL_OK")
</pallas_src>

<mosaic_0001>
module attributes {stable_mosaic.version = 11 : i64} {
  func.func @_lstm_chunk_kernel(%arg0: i32, %arg1: memref<8x8x16xf32, #tpu.memory_space<vmem>>, %arg2: memref<16x512xbf16, #tpu.memory_space<vmem>>, %arg3: memref<128x512xbf16, #tpu.memory_space<vmem>>, %arg4: memref<1x512xf32, #tpu.memory_space<vmem>>, %arg5: memref<8x8x128xbf16, #tpu.memory_space<vmem>>, %arg6: memref<8x8x512xf32, #tpu.memory_space<vmem>>, %arg7: memref<8x128xf32, #tpu.memory_space<vmem>>, %arg8: memref<8x128xf32, #tpu.memory_space<vmem>>) attributes {dimension_semantics = [#tpu.dimension_semantics<arbitrary>], iteration_bounds = array<i64: 1>, scalar_prefetch = 0 : i64, scratch_operands = 3 : i64, tpu.core_type = #tpu.core_type<tc>, window_params = [{transform_indices = @transform_0, window_bounds = array<i64: 8, 8, 16>}, {pipeline_mode = #tpu.pipeline_mode<synchronous>, transform_indices = @transform_1, window_bounds = array<i64: 16, 512>}, {pipeline_mode = #tpu.pipeline_mode<synchronous>, transform_indices = @transform_2, window_bounds = array<i64: 128, 512>}, {pipeline_mode = #tpu.pipeline_mode<synchronous>, transform_indices = @transform_3, window_bounds = array<i64: 1, 512>}, {transform_indices = @transform_4, window_bounds = array<i64: 8, 8, 128>}]} {
    %c0_i32 = arith.constant 0 : i32
    %0 = arith.cmpi eq, %arg0, %c0_i32 : i32
    %1 = arith.extui %0 : i1 to i32
    %c0_i32_0 = arith.constant 0 : i32
    %2 = arith.cmpi ne, %1, %c0_i32_0 : i32
    scf.if %2 {
      %cst_85 = arith.constant 0.000000e+00 : f32
      %306 = vector.broadcast %cst_85 : f32 to vector<8x128xf32>
      %c0_86 = arith.constant 0 : index
      %c0_87 = arith.constant 0 : index
      %307 = vector.load %arg7[%c0_86, %c0_87] : memref<8x128xf32, #tpu.memory_space<vmem>>, vector<8x128xf32>
      tpu.vector_store %arg7[%c0_86, %c0_87], %306 {strides = array<i32>} : memref<8x128xf32, #tpu.memory_space<vmem>>, vector<8x128xf32>,
      %cst_88 = arith.constant 0.000000e+00 : f32
      %308 = vector.broadcast %cst_88 : f32 to vector<8x128xf32>
      %c0_89 = arith.constant 0 : index
      %c0_90 = arith.constant 0 : index
      %309 = vector.load %arg8[%c0_89, %c0_90] : memref<8x128xf32, #tpu.memory_space<vmem>>, vector<8x128xf32>
      tpu.vector_store %arg8[%c0_89, %c0_90], %308 {strides = array<i32>} : memref<8x128xf32, #tpu.memory_space<vmem>>, vector<8x128xf32>,
    } else {
    }
    %c0 = arith.constant 0 : index
    %c0_1 = arith.constant 0 : index
    %c0_2 = arith.constant 0 : index
    %3 = vector.load %arg1[%c0, %c0_1, %c0_2] : memref<8x8x16xf32, #tpu.memory_space<vmem>>, vector<8x8x16xf32>
    %4 = arith.truncf %3 : vector<8x8x16xf32> to vector<8x8x16xbf16>
    %5 = vector.shape_cast %4 : vector<8x8x16xbf16> to vector<64x16xbf16>
    %c0_3 = arith.constant 0 : index
    %c0_4 = arith.constant 0 : index
    %6 = vector.load %arg2[%c0_3, %c0_4] : memref<16x512xbf16, #tpu.memory_space<vmem>>, vector<16x512xbf16>
    %cst = arith.constant dense<0.000000e+00> : vector<64x512xf32>
    %7 = tpu.matmul %5, %6, %cst {dimension_numbers = #tpu.dot_dimension_numbers<[1], [0], [0], [1], [0, 0, 1, 1], [], []>} : vector<64x16xbf16>, vector<16x512xbf16>, vector<64x512xf32> -> vector<64x512xf32>
    %c0_5 = arith.constant 0 : index
    %c0_6 = arith.constant 0 : index
    %8 = vector.load %arg4[%c0_5, %c0_6] : memref<1x512xf32, #tpu.memory_space<vmem>>, vector<1x512xf32>
    %9 = vector.broadcast %8 : vector<1x512xf32> to vector<64x512xf32>
    %10 = arith.addf %7, %9 : vector<64x512xf32>
    %11 = vector.shape_cast %10 : vector<64x512xf32> to vector<8x8x512xf32>
    %c0_7 = arith.constant 0 : index
    %c0_8 = arith.constant 0 : index
    %c0_9 = arith.constant 0 : index
    %12 = vector.load %arg6[%c0_7, %c0_8, %c0_9] : memref<8x8x512xf32, #tpu.memory_space<vmem>>, vector<8x8x512xf32>
    tpu.vector_store %arg6[%c0_7, %c0_8, %c0_9], %11 {strides = array<i32>} : memref<8x8x512xf32, #tpu.memory_space<vmem>>, vector<8x8x512xf32>,
    %c0_10 = arith.constant 0 : index
    %c0_11 = arith.constant 0 : index
    %13 = vector.load %arg3[%c0_10, %c0_11] : memref<128x512xbf16, #tpu.memory_space<vmem>>, vector<128x512xbf16>
    %c0_12 = arith.constant 0 : index
    %c0_13 = arith.constant 0 : index
    %14 = vector.load %arg7[%c0_12, %c0_13] : memref<8x128xf32, #tpu.memory_space<vmem>>, vector<8x128xf32>
    %c0_14 = arith.constant 0 : index
    %c0_15 = arith.constant 0 : index
    %15 = vector.load %arg8[%c0_14, %c0_15] : memref<8x128xf32, #tpu.memory_space<vmem>>, vector<8x128xf32>
    %c0_i32_16 = arith.constant 0 : i32
    %16 = arith.index_cast %c0_i32_16 : i32 to index
    %c0_17 = arith.constant 0 : index
    %c0_18 = arith.constant 0 : index
    %17 = vector.load %arg6[%16, %c0_17, %c0_18] : memref<8x8x512xf32, #tpu.memory_space<vmem>>, vector<1x8x512xf32>
    %18 = vector.shape_cast %17 : vector<1x8x512xf32> to vector<8x512xf32>
    %19 = arith.truncf %14 : vector<8x128xf32> to vector<8x128xbf16>
    %cst_19 = arith.constant dense<0.000000e+00> : vector<8x512xf32>
    %20 = tpu.matmul %19, %13, %cst_19 {dimension_numbers = #tpu.dot_dimension_numbers<[1], [0], [0], [1], [0, 0, 1, 1], [], []>} : vector<8x128xbf16>, vector<128x512xbf16>, vector<8x512xf32> -> vector<8x512xf32>
    %21 = arith.addf %18, %20 : vector<8x512xf32>
    %22 = vector.extract_strided_slice %21 {offsets = [0, 0], sizes = [8, 128], strides = [1, 1]} : vector<8x512xf32> to vector<8x128xf32>
    %23 = arith.negf %22 : vector<8x128xf32>
    %24 = math.exp %23 : vector<8x128xf32>
    %cst_20 = arith.constant 1.000000e+00 : f32
    %25 = vector.broadcast %cst_20 : f32 to vector<8x128xf32>
    %26 = arith.addf %25, %24 : vector<8x128xf32>
    %27 = arith.divf %25, %26 : vector<8x128xf32>
    %28 = vector.extract_strided_slice %21 {offsets = [0, 128], sizes = [8, 128], strides = [1, 1]} : vector<8x512xf32> to vector<8x128xf32>
    %29 = arith.negf %28 : vector<8x128xf32>
    %30 = math.exp %29 : vector<8x128xf32>
    %cst_21 = arith.constant 1.000000e+00 : f32
    %31 = vector.broadcast %cst_21 : f32 to vector<8x128xf32>
    %32 = arith.addf %31, %30 : vector<8x128xf32>
    %33 = arith.divf %31, %32 : vector<8x128xf32>
    %34 = vector.extract_strided_slice %21 {offsets = [0, 256], sizes = [8, 128], strides = [1, 1]} : vector<8x512xf32> to vector<8x128xf32>
    %35 = math.tanh %34 : vector<8x128xf32>
    %36 = vector.extract_strided_slice %21 {offsets = [0, 384], sizes = [8, 128], strides = [1, 1]} : vector<8x512xf32> to vector<8x128xf32>
    %37 = arith.negf %36 : vector<8x128xf32>
    %38 = math.exp %37 : vector<8x128xf32>
    %cst_22 = arith.constant 1.000000e+00 : f32
    %39 = vector.broadcast %cst_22 : f32 to vector<8x128xf32>
    %40 = arith.addf %39, %38 : vector<8x128xf32>
    %41 = arith.divf %39, %40 : vector<8x128xf32>
    %42 = arith.mulf %33, %15 : vector<8x128xf32>
    %43 = arith.mulf %27, %35 : vector<8x128xf32>
    %44 = arith.addf %42, %43 : vector<8x128xf32>
    %45 = math.tanh %44 : vector<8x128xf32>
    %46 = arith.mulf %41, %45 : vector<8x128xf32>
    %47 = arith.truncf %46 : vector<8x128xf32> to vector<8x128xbf16>
    %48 = arith.index_cast %c0_i32_16 : i32 to index
    %c0_23 = arith.constant 0 : index
    %c0_24 = arith.constant 0 : index
    %49 = vector.load %arg5[%48, %c0_23, %c0_24] : memref<8x8x128xbf16, #tpu.memory_space<vmem>>, vector<1x8x128xbf16>
    %50 = vector.shape_cast %49 : vector<1x8x128xbf16> to vector<8x128xbf16>
    %51 = vector.shape_cast %47 : vector<8x128xbf16> to vector<1x8x128xbf16>
    tpu.vector_store %arg5[%48, %c0_23, %c0_24], %51 {strides = array<i32>} : memref<8x8x128xbf16, #tpu.memory_space<vmem>>, vector<1x8x128xbf16>,
    %c1_i32 = arith.constant 1 : i32
    %52 = arith.index_cast %c1_i32 : i32 to index
    %c0_25 = arith.constant 0 : index
    %c0_26 = arith.constant 0 : index
    %53 = vector.load %arg6[%52, %c0_25, %c0_26] : memref<8x8x512xf32, #tpu.memory_space<vmem>>, vector<1x8x512xf32>
    %54 = vector.shape_cast %53 : vector<1x8x512xf32> to vector<8x512xf32>
    %55 = arith.truncf %46 : vector<8x128xf32> to vector<8x128xbf16>
    %cst_27 = arith.constant dense<0.000000e+00> : vector<8x512xf32>
    %56 = tpu.matmul %55, %13, %cst_27 {dimension_numbers = #tpu.dot_dimension_numbers<[1], [0], [0], [1], [0, 0, 1, 1], [], []>} : vector<8x128xbf16>, vector<128x512xbf16>, vector<8x512xf32> -> vector<8x512xf32>
    %57 = arith.addf %54, %56 : vector<8x512xf32>
    %58 = vector.extract_strided_slice %57 {offsets = [0, 0], sizes = [8, 128], strides = [1, 1]} : vector<8x512xf32> to vector<8x128xf32>
    %59 = arith.negf %58 : vector<8x128xf32>
    %60 = math.exp %59 : vector<8x128xf32>
    %cst_28 = arith.constant 1.000000e+00 : f32
    %61 = vector.broadcast %cst_28 : f32 to vector<8x128xf32>
    %62 = arith.addf %61, %60 : vector<8x128xf32>
    %63 = arith.divf %61, %62 : vector<8x128xf32>
    %64 = vector.extract_strided_slice %57 {offsets = [0, 128], sizes = [8, 128], strides = [1, 1]} : vector<8x512xf32> to vector<8x128xf32>
    %65 = arith.negf %64 : vector<8x128xf32>
    %66 = math.exp %65 : vector<8x128xf32>
    %cst_29 = arith.constant 1.000000e+00 : f32
    %67 = vector.broadcast %cst_29 : f32 to vector<8x128xf32>
    %68 = arith.addf %67, %66 : vector<8x128xf32>
    %69 = arith.divf %67, %68 : vector<8x128xf32>
    %70 = vector.extract_strided_slice %57 {offsets = [0, 256], sizes = [8, 128], strides = [1, 1]} : vector<8x512xf32> to vector<8x128xf32>
    %71 = math.tanh %70 : vector<8x128xf32>
    %72 = vector.extract_strided_slice %57 {offsets = [0, 384], sizes = [8, 128], strides = [1, 1]} : vector<8x512xf32> to vector<8x128xf32>
    %73 = arith.negf %72 : vector<8x128xf32>
    %74 = math.exp %73 : vector<8x128xf32>
    %cst_30 = arith.constant 1.000000e+00 : f32
    %75 = vector.broadcast %cst_30 : f32 to vector<8x128xf32>
    %76 = arith.addf %75, %74 : vector<8x128xf32>
    %77 = arith.divf %75, %76 : vector<8x128xf32>
    %78 = arith.mulf %69, %44 : vector<8x128xf32>
    %79 = arith.mulf %63, %71 : vector<8x128xf32>
    %80 = arith.addf %78, %79 : vector<8x128xf32>
    %81 = math.tanh %80 : vector<8x128xf32>
    %82 = arith.mulf %77, %81 : vector<8x128xf32>
    %83 = arith.truncf %82 : vector<8x128xf32> to vector<8x128xbf16>
    %84 = arith.index_cast %c1_i32 : i32 to index
    %c0_31 = arith.constant 0 : index
    %c0_32 = arith.constant 0 : index
    %85 = vector.load %arg5[%84, %c0_31, %c0_32] : memref<8x8x128xbf16, #tpu.memory_space<vmem>>, vector<1x8x128xbf16>
    %86 = vector.shape_cast %85 : vector<1x8x128xbf16> to vector<8x128xbf16>
    %87 = vector.shape_cast %83 : vector<8x128xbf16> to vector<1x8x128xbf16>
    tpu.vector_store %arg5[%84, %c0_31, %c0_32], %87 {strides = array<i32>} : memref<8x8x128xbf16, #tpu.memory_space<vmem>>, vector<1x8x128xbf16>,
    %c2_i32 = arith.constant 2 : i32
    %88 = arith.index_cast %c2_i32 : i32 to index
    %c0_33 = arith.constant 0 : index
    %c0_34 = arith.constant 0 : index
    %89 = vector.load %arg6[%88, %c0_33, %c0_34] : memref<8x8x512xf32, #tpu.memory_space<vmem>>, vector<1x8x512xf32>
    %90 = vector.shape_cast %89 : vector<1x8x512xf32> to vector<8x512xf32>
    %91 = arith.truncf %82 : vector<8x128xf32> to vector<8x128xbf16>
    %cst_35 = arith.constant dense<0.000000e+00> : vector<8x512xf32>
    %92 = tpu.matmul %91, %13, %cst_35 {dimension_numbers = #tpu.dot_dimension_numbers<[1], [0], [0], [1], [0, 0, 1, 1], [], []>} : vector<8x128xbf16>, vector<128x512xbf16>, vector<8x512xf32> -> vector<8x512xf32>
    %93 = arith.addf %90, %92 : vector<8x512xf32>
    %94 = vector.extract_strided_slice %93 {offsets = [0, 0], sizes = [8, 128], strides = [1, 1]} : vector<8x512xf32> to vector<8x128xf32>
    %95 = arith.negf %94 : vector<8x128xf32>
    %96 = math.exp %95 : vector<8x128xf32>
    %cst_36 = arith.constant 1.000000e+00 : f32
    %97 = vector.broadcast %cst_36 : f32 to vector<8x128xf32>
    %98 = arith.addf %97, %96 : vector<8x128xf32>
    %99 = arith.divf %97, %98 : vector<8x128xf32>
    %100 = vector.extract_strided_slice %93 {offsets = [0, 128], sizes = [8, 128], strides = [1, 1]} : vector<8x512xf32> to vector<8x128xf32>
    %101 = arith.negf %100 : vector<8x128xf32>
    %102 = math.exp %101 : vector<8x128xf32>
    %cst_37 = arith.constant 1.000000e+00 : f32
    %103 = vector.broadcast %cst_37 : f32 to vector<8x128xf32>
    %104 = arith.addf %103, %102 : vector<8x128xf32>
    %105 = arith.divf %103, %104 : vector<8x128xf32>
    %106 = vector.extract_strided_slice %93 {offsets = [0, 256], sizes = [8, 128], strides = [1, 1]} : vector<8x512xf32> to vector<8x128xf32>
    %107 = math.tanh %106 : vector<8x128xf32>
    %108 = vector.extract_strided_slice %93 {offsets = [0, 384], sizes = [8, 128], strides = [1, 1]} : vector<8x512xf32> to vector<8x128xf32>
    %109 = arith.negf %108 : vector<8x128xf32>
    %110 = math.exp %109 : vector<8x128xf32>
    %cst_38 = arith.constant 1.000000e+00 : f32
    %111 = vector.broadcast %cst_38 : f32 to vector<8x128xf32>
    %112 = arith.addf %111, %110 : vector<8x128xf32>
    %113 = arith.divf %111, %112 : vector<8x128xf32>
    %114 = arith.mulf %105, %80 : vector<8x128xf32>
    %115 = arith.mulf %99, %107 : vector<8x128xf32>
    %116 = arith.addf %114, %115 : vector<8x128xf32>
    %117 = math.tanh %116 : vector<8x128xf32>
    %118 = arith.mulf %113, %117 : vector<8x128xf32>
    %119 = arith.truncf %118 : vector<8x128xf32> to vector<8x128xbf16>
    %120 = arith.index_cast %c2_i32 : i32 to index
    %c0_39 = arith.constant 0 : index
    %c0_40 = arith.constant 0 : index
    %121 = vector.load %arg5[%120, %c0_39, %c0_40] : memref<8x8x128xbf16, #tpu.memory_space<vmem>>, vector<1x8x128xbf16>
    %122 = vector.shape_cast %121 : vector<1x8x128xbf16> to vector<8x128xbf16>
    %123 = vector.shape_cast %119 : vector<8x128xbf16> to vector<1x8x128xbf16>
    tpu.vector_store %arg5[%120, %c0_39, %c0_40], %123 {strides = array<i32>} : memref<8x8x128xbf16, #tpu.memory_space<vmem>>, vector<1x8x128xbf16>,
    %c3_i32 = arith.constant 3 : i32
    %124 = arith.index_cast %c3_i32 : i32 to index
    %c0_41 = arith.constant 0 : index
    %c0_42 = arith.constant 0 : index
    %125 = vector.load %arg6[%124, %c0_41, %c0_42] : memref<8x8x512xf32, #tpu.memory_space<vmem>>, vector<1x8x512xf32>
    %126 = vector.shape_cast %125 : vector<1x8x512xf32> to vector<8x512xf32>
    %127 = arith.truncf %118 : vector<8x128xf32> to vector<8x128xbf16>
    %cst_43 = arith.constant dense<0.000000e+00> : vector<8x512xf32>
    %128 = tpu.matmul %127, %13, %cst_43 {dimension_numbers = #tpu.dot_dimension_numbers<[1], [0], [0], [1], [0, 0, 1, 1], [], []>} : vector<8x128xbf16>, vector<128x512xbf16>, vector<8x512xf32> -> vector<8x512xf32>
    %129 = arith.addf %126, %128 : vector<8x512xf32>
    %130 = vector.extract_strided_slice %129 {offsets = [0, 0], sizes = [8, 128], strides = [1, 1]} : vector<8x512xf32> to vector<8x128xf32>
    %131 = arith.negf %130 : vector<8x128xf32>
    %132 = math.exp %131 : vector<8x128xf32>
    %cst_44 = arith.constant 1.000000e+00 : f32
    %133 = vector.broadcast %cst_44 : f32 to vector<8x128xf32>
    %134 = arith.addf %133, %132 : vector<8x128xf32>
    %135 = arith.divf %133, %134 : vector<8x128xf32>
    %136 = vector.extract_strided_slice %129 {offsets = [0, 128], sizes = [8, 128], strides = [1, 1]} : vector<8x512xf32> to vector<8x128xf32>
    %137 = arith.negf %136 : vector<8x128xf32>
    %138 = math.exp %137 : vector<8x128xf32>
    %cst_45 = arith.constant 1.000000e+00 : f32
    %139 = vector.broadcast %cst_45 : f32 to vector<8x128xf32>
    %140 = arith.addf %139, %138 : vector<8x128xf32>
    %141 = arith.divf %139, %140 : vector<8x128xf32>
    %142 = vector.extract_strided_slice %129 {offsets = [0, 256], sizes = [8, 128], strides = [1, 1]} : vector<8x512xf32> to vector<8x128xf32>
    %143 = math.tanh %142 : vector<8x128xf32>
    %144 = vector.extract_strided_slice %129 {offsets = [0, 384], sizes = [8, 128], strides = [1, 1]} : vector<8x512xf32> to vector<8x128xf32>
    %145 = arith.negf %144 : vector<8x128xf32>
    %146 = math.exp %145 : vector<8x128xf32>
    %cst_46 = arith.constant 1.000000e+00 : f32
    %147 = vector.broadcast %cst_46 : f32 to vector<8x128xf32>
    %148 = arith.addf %147, %146 : vector<8x128xf32>
    %149 = arith.divf %147, %148 : vector<8x128xf32>
    %150 = arith.mulf %141, %116 : vector<8x128xf32>
    %151 = arith.mulf %135, %143 : vector<8x128xf32>
    %152 = arith.addf %150, %151 : vector<8x128xf32>
    %153 = math.tanh %152 : vector<8x128xf32>
    %154 = arith.mulf %149, %153 : vector<8x128xf32>
    %155 = arith.truncf %154 : vector<8x128xf32> to vector<8x128xbf16>
    %156 = arith.index_cast %c3_i32 : i32 to index
    %c0_47 = arith.constant 0 : index
    %c0_48 = arith.constant 0 : index
    %157 = vector.load %arg5[%156, %c0_47, %c0_48] : memref<8x8x128xbf16, #tpu.memory_space<vmem>>, vector<1x8x128xbf16>
    %158 = vector.shape_cast %157 : vector<1x8x128xbf16> to vector<8x128xbf16>
    %159 = vector.shape_cast %155 : vector<8x128xbf16> to vector<1x8x128xbf16>
    tpu.vector_store %arg5[%156, %c0_47, %c0_48], %159 {strides = array<i32>} : memref<8x8x128xbf16, #tpu.memory_space<vmem>>, vector<1x8x128xbf16>,
    %c4_i32 = arith.constant 4 : i32
    %160 = arith.index_cast %c4_i32 : i32 to index
    %c0_49 = arith.constant 0 : index
    %c0_50 = arith.constant 0 : index
    %161 = vector.load %arg6[%160, %c0_49, %c0_50] : memref<8x8x512xf32, #tpu.memory_space<vmem>>, vector<1x8x512xf32>
    %162 = vector.shape_cast %161 : vector<1x8x512xf32> to vector<8x512xf32>
    %163 = arith.truncf %154 : vector<8x128xf32> to vector<8x128xbf16>
    %cst_51 = arith.constant dense<0.000000e+00> : vector<8x512xf32>
    %164 = tpu.matmul %163, %13, %cst_51 {dimension_numbers = #tpu.dot_dimension_numbers<[1], [0], [0], [1], [0, 0, 1, 1], [], []>} : vector<8x128xbf16>, vector<128x512xbf16>, vector<8x512xf32> -> vector<8x512xf32>
    %165 = arith.addf %162, %164 : vector<8x512xf32>
    %166 = vector.extract_strided_slice %165 {offsets = [0, 0], sizes = [8, 128], strides = [1, 1]} : vector<8x512xf32> to vector<8x128xf32>
    %167 = arith.negf %166 : vector<8x128xf32>
    %168 = math.exp %167 : vector<8x128xf32>
    %cst_52 = arith.constant 1.000000e+00 : f32
    %169 = vector.broadcast %cst_52 : f32 to vector<8x128xf32>
    %170 = arith.addf %169, %168 : vector<8x128xf32>
    %171 = arith.divf %169, %170 : vector<8x128xf32>
    %172 = vector.extract_strided_slice %165 {offsets = [0, 128], sizes = [8, 128], strides = [1, 1]} : vector<8x512xf32> to vector<8x128xf32>
    %173 = arith.negf %172 : vector<8x128xf32>
    %174 = math.exp %173 : vector<8x128xf32>
    %cst_53 = arith.constant 1.000000e+00 : f32
    %175 = vector.broadcast %cst_53 : f32 to vector<8x128xf32>
    %176 = arith.addf %175, %174 : vector<8x128xf32>
    %177 = arith.divf %175, %176 : vector<8x128xf32>
    %178 = vector.extract_strided_slice %165 {offsets = [0, 256], sizes = [8, 128], strides = [1, 1]} : vector<8x512xf32> to vector<8x128xf32>
    %179 = math.tanh %178 : vector<8x128xf32>
    %180 = vector.extract_strided_slice %165 {offsets = [0, 384], sizes = [8, 128], strides = [1, 1]} : vector<8x512xf32> to vector<8x128xf32>
    %181 = arith.negf %180 : vector<8x128xf32>
    %182 = math.exp %181 : vector<8x128xf32>
    %cst_54 = arith.constant 1.000000e+00 : f32
    %183 = vector.broadcast %cst_54 : f32 to vector<8x128xf32>
    %184 = arith.addf %183, %182 : vector<8x128xf32>
    %185 = arith.divf %183, %184 : vector<8x128xf32>
    %186 = arith.mulf %177, %152 : vector<8x128xf32>
    %187 = arith.mulf %171, %179 : vector<8x128xf32>
    %188 = arith.addf %186, %187 : vector<8x128xf32>
    %189 = math.tanh %188 : vector<8x128xf32>
    %190 = arith.mulf %185, %189 : vector<8x128xf32>
    %191 = arith.truncf %190 : vector<8x128xf32> to vector<8x128xbf16>
    %192 = arith.index_cast %c4_i32 : i32 to index
    %c0_55 = arith.constant 0 : index
    %c0_56 = arith.constant 0 : index
    %193 = vector.load %arg5[%192, %c0_55, %c0_56] : memref<8x8x128xbf16, #tpu.memory_space<vmem>>, vector<1x8x128xbf16>
    %194 = vector.shape_cast %193 : vector<1x8x128xbf16> to vector<8x128xbf16>
    %195 = vector.shape_cast %191 : vector<8x128xbf16> to vector<1x8x128xbf16>
    tpu.vector_store %arg5[%192, %c0_55, %c0_56], %195 {strides = array<i32>} : memref<8x8x128xbf16, #tpu.memory_space<vmem>>, vector<1x8x128xbf16>,
    %c5_i32 = arith.constant 5 : i32
    %196 = arith.index_cast %c5_i32 : i32 to index
    %c0_57 = arith.constant 0 : index
    %c0_58 = arith.constant 0 : index
    %197 = vector.load %arg6[%196, %c0_57, %c0_58] : memref<8x8x512xf32, #tpu.memory_space<vmem>>, vector<1x8x512xf32>
    %198 = vector.shape_cast %197 : vector<1x8x512xf32> to vector<8x512xf32>
    %199 = arith.truncf %190 : vector<8x128xf32> to vector<8x128xbf16>
    %cst_59 = arith.constant dense<0.000000e+00> : vector<8x512xf32>
    %200 = tpu.matmul %199, %13, %cst_59 {dimension_numbers = #tpu.dot_dimension_numbers<[1], [0], [0], [1], [0, 0, 1, 1], [], []>} : vector<8x128xbf16>, vector<128x512xbf16>, vector<8x512xf32> -> vector<8x512xf32>
    %201 = arith.addf %198, %200 : vector<8x512xf32>
    %202 = vector.extract_strided_slice %201 {offsets = [0, 0], sizes = [8, 128], strides = [1, 1]} : vector<8x512xf32> to vector<8x128xf32>
    %203 = arith.negf %202 : vector<8x128xf32>
    %204 = math.exp %203 : vector<8x128xf32>
    %cst_60 = arith.constant 1.000000e+00 : f32
    %205 = vector.broadcast %cst_60 : f32 to vector<8x128xf32>
    %206 = arith.addf %205, %204 : vector<8x128xf32>
    %207 = arith.divf %205, %206 : vector<8x128xf32>
    %208 = vector.extract_strided_slice %201 {offsets = [0, 128], sizes = [8, 128], strides = [1, 1]} : vector<8x512xf32> to vector<8x128xf32>
    %209 = arith.negf %208 : vector<8x128xf32>
    %210 = math.exp %209 : vector<8x128xf32>
    %cst_61 = arith.constant 1.000000e+00 : f32
    %211 = vector.broadcast %cst_61 : f32 to vector<8x128xf32>
    %212 = arith.addf %211, %210 : vector<8x128xf32>
    %213 = arith.divf %211, %212 : vector<8x128xf32>
    %214 = vector.extract_strided_slice %201 {offsets = [0, 256], sizes = [8, 128], strides = [1, 1]} : vector<8x512xf32> to vector<8x128xf32>
    %215 = math.tanh %214 : vector<8x128xf32>
    %216 = vector.extract_strided_slice %201 {offsets = [0, 384], sizes = [8, 128], strides = [1, 1]} : vector<8x512xf32> to vector<8x128xf32>
    %217 = arith.negf %216 : vector<8x128xf32>
    %218 = math.exp %217 : vector<8x128xf32>
    %cst_62 = arith.constant 1.000000e+00 : f32
    %219 = vector.broadcast %cst_62 : f32 to vector<8x128xf32>
    %220 = arith.addf %219, %218 : vector<8x128xf32>
    %221 = arith.divf %219, %220 : vector<8x128xf32>
    %222 = arith.mulf %213, %188 : vector<8x128xf32>
    %223 = arith.mulf %207, %215 : vector<8x128xf32>
    %224 = arith.addf %222, %223 : vector<8x128xf32>
    %225 = math.tanh %224 : vector<8x128xf32>
    %226 = arith.mulf %221, %225 : vector<8x128xf32>
    %227 = arith.truncf %226 : vector<8x128xf32> to vector<8x128xbf16>
    %228 = arith.index_cast %c5_i32 : i32 to index
    %c0_63 = arith.constant 0 : index
    %c0_64 = arith.constant 0 : index
    %229 = vector.load %arg5[%228, %c0_63, %c0_64] : memref<8x8x128xbf16, #tpu.memory_space<vmem>>, vector<1x8x128xbf16>
    %230 = vector.shape_cast %229 : vector<1x8x128xbf16> to vector<8x128xbf16>
    %231 = vector.shape_cast %227 : vector<8x128xbf16> to vector<1x8x128xbf16>
    tpu.vector_store %arg5[%228, %c0_63, %c0_64], %231 {strides = array<i32>} : memref<8x8x128xbf16, #tpu.memory_space<vmem>>, vector<1x8x128xbf16>,
    %c6_i32 = arith.constant 6 : i32
    %232 = arith.index_cast %c6_i32 : i32 to index
    %c0_65 = arith.constant 0 : index
    %c0_66 = arith.constant 0 : index
    %233 = vector.load %arg6[%232, %c0_65, %c0_66] : memref<8x8x512xf32, #tpu.memory_space<vmem>>, vector<1x8x512xf32>
    %234 = vector.shape_cast %233 : vector<1x8x512xf32> to vector<8x512xf32>
    %235 = arith.truncf %226 : vector<8x128xf32> to vector<8x128xbf16>
    %cst_67 = arith.constant dense<0.000000e+00> : vector<8x512xf32>
    %236 = tpu.matmul %235, %13, %cst_67 {dimension_numbers = #tpu.dot_dimension_numbers<[1], [0], [0], [1], [0, 0, 1, 1], [], []>} : vector<8x128xbf16>, vector<128x512xbf16>, vector<8x512xf32> -> vector<8x512xf32>
    %237 = arith.addf %234, %236 : vector<8x512xf32>
    %238 = vector.extract_strided_slice %237 {offsets = [0, 0], sizes = [8, 128], strides = [1, 1]} : vector<8x512xf32> to vector<8x128xf32>
    %239 = arith.negf %238 : vector<8x128xf32>
    %240 = math.exp %239 : vector<8x128xf32>
    %cst_68 = arith.constant 1.000000e+00 : f32
    %241 = vector.broadcast %cst_68 : f32 to vector<8x128xf32>
    %242 = arith.addf %241, %240 : vector<8x128xf32>
    %243 = arith.divf %241, %242 : vector<8x128xf32>
    %244 = vector.extract_strided_slice %237 {offsets = [0, 128], sizes = [8, 128], strides = [1, 1]} : vector<8x512xf32> to vector<8x128xf32>
    %245 = arith.negf %244 : vector<8x128xf32>
    %246 = math.exp %245 : vector<8x128xf32>
    %cst_69 = arith.constant 1.000000e+00 : f32
    %247 = vector.broadcast %cst_69 : f32 to vector<8x128xf32>
    %248 = arith.addf %247, %246 : vector<8x128xf32>
    %249 = arith.divf %247, %248 : vector<8x128xf32>
    %250 = vector.extract_strided_slice %237 {offsets = [0, 256], sizes = [8, 128], strides = [1, 1]} : vector<8x512xf32> to vector<8x128xf32>
    %251 = math.tanh %250 : vector<8x128xf32>
    %252 = vector.extract_strided_slice %237 {offsets = [0, 384], sizes = [8, 128], strides = [1, 1]} : vector<8x512xf32> to vector<8x128xf32>
    %253 = arith.negf %252 : vector<8x128xf32>
    %254 = math.exp %253 : vector<8x128xf32>
    %cst_70 = arith.constant 1.000000e+00 : f32
    %255 = vector.broadcast %cst_70 : f32 to vector<8x128xf32>
    %256 = arith.addf %255, %254 : vector<8x128xf32>
    %257 = arith.divf %255, %256 : vector<8x128xf32>
    %258 = arith.mulf %249, %224 : vector<8x128xf32>
    %259 = arith.mulf %243, %251 : vector<8x128xf32>
    %260 = arith.addf %258, %259 : vector<8x128xf32>
    %261 = math.tanh %260 : vector<8x128xf32>
    %262 = arith.mulf %257, %261 : vector<8x128xf32>
    %263 = arith.truncf %262 : vector<8x128xf32> to vector<8x128xbf16>
    %264 = arith.index_cast %c6_i32 : i32 to index
    %c0_71 = arith.constant 0 : index
    %c0_72 = arith.constant 0 : index
    %265 = vector.load %arg5[%264, %c0_71, %c0_72] : memref<8x8x128xbf16, #tpu.memory_space<vmem>>, vector<1x8x128xbf16>
    %266 = vector.shape_cast %265 : vector<1x8x128xbf16> to vector<8x128xbf16>
    %267 = vector.shape_cast %263 : vector<8x128xbf16> to vector<1x8x128xbf16>
    tpu.vector_store %arg5[%264, %c0_71, %c0_72], %267 {strides = array<i32>} : memref<8x8x128xbf16, #tpu.memory_space<vmem>>, vector<1x8x128xbf16>,
    %c7_i32 = arith.constant 7 : i32
    %268 = arith.index_cast %c7_i32 : i32 to index
    %c0_73 = arith.constant 0 : index
    %c0_74 = arith.constant 0 : index
    %269 = vector.load %arg6[%268, %c0_73, %c0_74] : memref<8x8x512xf32, #tpu.memory_space<vmem>>, vector<1x8x512xf32>
    %270 = vector.shape_cast %269 : vector<1x8x512xf32> to vector<8x512xf32>
    %271 = arith.truncf %262 : vector<8x128xf32> to vector<8x128xbf16>
    %cst_75 = arith.constant dense<0.000000e+00> : vector<8x512xf32>
    %272 = tpu.matmul %271, %13, %cst_75 {dimension_numbers = #tpu.dot_dimension_numbers<[1], [0], [0], [1], [0, 0, 1, 1], [], []>} : vector<8x128xbf16>, vector<128x512xbf16>, vector<8x512xf32> -> vector<8x512xf32>
    %273 = arith.addf %270, %272 : vector<8x512xf32>
    %274 = vector.extract_strided_slice %273 {offsets = [0, 0], sizes = [8, 128], strides = [1, 1]} : vector<8x512xf32> to vector<8x128xf32>
    %275 = arith.negf %274 : vector<8x128xf32>
    %276 = math.exp %275 : vector<8x128xf32>
    %cst_76 = arith.constant 1.000000e+00 : f32
    %277 = vector.broadcast %cst_76 : f32 to vector<8x128xf32>
    %278 = arith.addf %277, %276 : vector<8x128xf32>
    %279 = arith.divf %277, %278 : vector<8x128xf32>
    %280 = vector.extract_strided_slice %273 {offsets = [0, 128], sizes = [8, 128], strides = [1, 1]} : vector<8x512xf32> to vector<8x128xf32>
    %281 = arith.negf %280 : vector<8x128xf32>
    %282 = math.exp %281 : vector<8x128xf32>
    %cst_77 = arith.constant 1.000000e+00 : f32
    %283 = vector.broadcast %cst_77 : f32 to vector<8x128xf32>
    %284 = arith.addf %283, %282 : vector<8x128xf32>
    %285 = arith.divf %283, %284 : vector<8x128xf32>
    %286 = vector.extract_strided_slice %273 {offsets = [0, 256], sizes = [8, 128], strides = [1, 1]} : vector<8x512xf32> to vector<8x128xf32>
    %287 = math.tanh %286 : vector<8x128xf32>
    %288 = vector.extract_strided_slice %273 {offsets = [0, 384], sizes = [8, 128], strides = [1, 1]} : vector<8x512xf32> to vector<8x128xf32>
    %289 = arith.negf %288 : vector<8x128xf32>
    %290 = math.exp %289 : vector<8x128xf32>
    %cst_78 = arith.constant 1.000000e+00 : f32
    %291 = vector.broadcast %cst_78 : f32 to vector<8x128xf32>
    %292 = arith.addf %291, %290 : vector<8x128xf32>
    %293 = arith.divf %291, %292 : vector<8x128xf32>
    %294 = arith.mulf %285, %260 : vector<8x128xf32>
    %295 = arith.mulf %279, %287 : vector<8x128xf32>
    %296 = arith.addf %294, %295 : vector<8x128xf32>
    %297 = math.tanh %296 : vector<8x128xf32>
    %298 = arith.mulf %293, %297 : vector<8x128xf32>
    %299 = arith.truncf %298 : vector<8x128xf32> to vector<8x128xbf16>
    %300 = arith.index_cast %c7_i32 : i32 to index
    %c0_79 = arith.constant 0 : index
    %c0_80 = arith.constant 0 : index
    %301 = vector.load %arg5[%300, %c0_79, %c0_80] : memref<8x8x128xbf16, #tpu.memory_space<vmem>>, vector<1x8x128xbf16>
    %302 = vector.shape_cast %301 : vector<1x8x128xbf16> to vector<8x128xbf16>
    %303 = vector.shape_cast %299 : vector<8x128xbf16> to vector<1x8x128xbf16>
    tpu.vector_store %arg5[%300, %c0_79, %c0_80], %303 {strides = array<i32>} : memref<8x8x128xbf16, #tpu.memory_space<vmem>>, vector<1x8x128xbf16>,
    %c8_i32 = arith.constant 8 : i32
    %c0_81 = arith.constant 0 : index
    %c0_82 = arith.constant 0 : index
    %304 = vector.load %arg7[%c0_81, %c0_82] : memref<8x128xf32, #tpu.memory_space<vmem>>, vector<8x128xf32>
    tpu.vector_store %arg7[%c0_81, %c0_82], %298 {strides = array<i32>} : memref<8x128xf32, #tpu.memory_space<vmem>>, vector<8x128xf32>,
    %c0_83 = arith.constant 0 : index
    %c0_84 = arith.constant 0 : index
    %305 = vector.load %arg8[%c0_83, %c0_84] : memref<8x128xf32, #tpu.memory_space<vmem>>, vector<8x128xf32>
    tpu.vector_store %arg8[%c0_83, %c0_84], %296 {strides = array<i32>} : memref<8x128xf32, #tpu.memory_space<vmem>>, vector<8x128xf32>,
    return
  }
  func.func @transform_0(%arg0: i32) -> (i32, i32, i32) {
    %c0_i32 = arith.constant 0 : i32
    %c0_i32_0 = arith.constant 0 : i32
    %c0_i32_1 = arith.constant 0 : i32
    return %arg0, %c0_i32, %c0_i32_0 : i32, i32, i32
  }
  func.func @transform_1(%arg0: i32) -> (i32, i32) {
    %c0_i32 = arith.constant 0 : i32
    %c0_i32_0 = arith.constant 0 : i32
    %c0_i32_1 = arith.constant 0 : i32
    return %c0_i32, %c0_i32_0 : i32, i32
  }
  func.func @transform_2(%arg0: i32) -> (i32, i32) {
    %c0_i32 = arith.constant 0 : i32
    %c0_i32_0 = arith.constant 0 : i32
    %c0_i32_1 = arith.constant 0 : i32
    return %c0_i32, %c0_i32_0 : i32, i32
  }
  func.func @transform_3(%arg0: i32) -> (i32, i32) {
    %c0_i32 = arith.constant 0 : i32
    %c0_i32_0 = arith.constant 0 : i32
    %c0_i32_1 = arith.constant 0 : i32
    return %c0_i32, %c0_i32_0 : i32, i32
  }
  func.func @transform_4(%arg0: i32) -> (i32, i32, i32) {
    %c0_i32 = arith.constant 0 : i32
    %c0_i32_0 = arith.constant 0 : i32
    %c0_i32_1 = arith.constant 0 : i32
    return %arg0, %c0_i32, %c0_i32_0 : i32, i32, i32
  }
}

module attributes {stable_mosaic.version = 11 : i64} {
  func.func @_lstm_chunk_last_kernel(%arg0: i32, %arg1: memref<8x8x128xbf16, #tpu.memory_space<vmem>>, %arg2: memref<128x512xbf16, #tpu.memory_space<vmem>>, %arg3: memref<128x512xbf16, #tpu.memory_space<vmem>>, %arg4: memref<1x512xf32, #tpu.memory_space<vmem>>, %arg5: memref<128x9xbf16, #tpu.memory_space<vmem>>, %arg6: memref<1x9xf32, #tpu.memory_space<vmem>>, %arg7: memref<8x9xf32, #tpu.memory_space<vmem>>, %arg8: memref<8x8x512xf32, #tpu.memory_space<vmem>>, %arg9: memref<8x128xf32, #tpu.memory_space<vmem>>, %arg10: memref<8x128xf32, #tpu.memory_space<vmem>>) attributes {dimension_semantics = [#tpu.dimension_semantics<arbitrary>], iteration_bounds = array<i64: 1>, scalar_prefetch = 0 : i64, scratch_operands = 3 : i64, tpu.core_type = #tpu.core_type<tc>, window_params = [{transform_indices = @transform_0, window_bounds = array<i64: 8, 8, 128>}, {pipeline_mode = #tpu.pipeline_mode<synchronous>, transform_indices = @transform_1, window_bounds = array<i64: 128, 512>}, {pipeline_mode = #tpu.pipeline_mode<synchronous>, transform_indices = @transform_2, window_bounds = array<i64: 128, 512>}, {pipeline_mode = #tpu.pipeline_mode<synchronous>, transform_indices = @transform_3, window_bounds = array<i64: 1, 512>}, {pipeline_mode = #tpu.pipeline_mode<synchronous>, transform_indices = @transform_4, window_bounds = array<i64: 128, 9>}, {pipeline_mode = #tpu.pipeline_mode<synchronous>, transform_indices = @transform_5, window_bounds = array<i64: 1, 9>}, {pipeline_mode = #tpu.pipeline_mode<synchronous>, transform_indices = @transform_6, window_bounds = array<i64: 8, 9>}]} {
    %c0_i32 = arith.constant 0 : i32
    %0 = arith.cmpi eq, %arg0, %c0_i32 : i32
    %1 = arith.extui %0 : i1 to i32
    %c0_i32_0 = arith.constant 0 : i32
    %2 = arith.cmpi ne, %1, %c0_i32_0 : i32
    scf.if %2 {
      %cst_71 = arith.constant 0.000000e+00 : f32
      %268 = vector.broadcast %cst_71 : f32 to vector<8x128xf32>
      %c0_72 = arith.constant 0 : index
      %c0_73 = arith.constant 0 : index
      %269 = vector.load %arg9[%c0_72, %c0_73] : memref<8x128xf32, #tpu.memory_space<vmem>>, vector<8x128xf32>
      tpu.vector_store %arg9[%c0_72, %c0_73], %268 {strides = array<i32>} : memref<8x128xf32, #tpu.memory_space<vmem>>, vector<8x128xf32>,
      %cst_74 = arith.constant 0.000000e+00 : f32
      %270 = vector.broadcast %cst_74 : f32 to vector<8x128xf32>
      %c0_75 = arith.constant 0 : index
      %c0_76 = arith.constant 0 : index
      %271 = vector.load %arg10[%c0_75, %c0_76] : memref<8x128xf32, #tpu.memory_space<vmem>>, vector<8x128xf32>
      tpu.vector_store %arg10[%c0_75, %c0_76], %270 {strides = array<i32>} : memref<8x128xf32, #tpu.memory_space<vmem>>, vector<8x128xf32>,
    } else {
    }
    %c0 = arith.constant 0 : index
    %c0_1 = arith.constant 0 : index
    %c0_2 = arith.constant 0 : index
    %3 = vector.load %arg1[%c0, %c0_1, %c0_2] : memref<8x8x128xbf16, #tpu.memory_space<vmem>>, vector<8x8x128xbf16>
    %4 = vector.shape_cast %3 : vector<8x8x128xbf16> to vector<64x128xbf16>
    %c0_3 = arith.constant 0 : index
    %c0_4 = arith.constant 0 : index
    %5 = vector.load %arg2[%c0_3, %c0_4] : memref<128x512xbf16, #tpu.memory_space<vmem>>, vector<128x512xbf16>
    %cst = arith.constant dense<0.000000e+00> : vector<64x512xf32>
    %6 = tpu.matmul %4, %5, %cst {dimension_numbers = #tpu.dot_dimension_numbers<[1], [0], [0], [1], [0, 0, 1, 1], [], []>} : vector<64x128xbf16>, vector<128x512xbf16>, vector<64x512xf32> -> vector<64x512xf32>
    %c0_5 = arith.constant 0 : index
    %c0_6 = arith.constant 0 : index
    %7 = vector.load %arg4[%c0_5, %c0_6] : memref<1x512xf32, #tpu.memory_space<vmem>>, vector<1x512xf32>
    %8 = vector.broadcast %7 : vector<1x512xf32> to vector<64x512xf32>
    %9 = arith.addf %6, %8 : vector<64x512xf32>
    %10 = vector.shape_cast %9 : vector<64x512xf32> to vector<8x8x512xf32>
    %c0_7 = arith.constant 0 : index
    %c0_8 = arith.constant 0 : index
    %c0_9 = arith.constant 0 : index
    %11 = vector.load %arg8[%c0_7, %c0_8, %c0_9] : memref<8x8x512xf32, #tpu.memory_space<vmem>>, vector<8x8x512xf32>
    tpu.vector_store %arg8[%c0_7, %c0_8, %c0_9], %10 {strides = array<i32>} : memref<8x8x512xf32, #tpu.memory_space<vmem>>, vector<8x8x512xf32>,
    %c0_10 = arith.constant 0 : index
    %c0_11 = arith.constant 0 : index
    %12 = vector.load %arg3[%c0_10, %c0_11] : memref<128x512xbf16, #tpu.memory_space<vmem>>, vector<128x512xbf16>
    %c0_12 = arith.constant 0 : index
    %c0_13 = arith.constant 0 : index
    %13 = vector.load %arg9[%c0_12, %c0_13] : memref<8x128xf32, #tpu.memory_space<vmem>>, vector<8x128xf32>
    %c0_14 = arith.constant 0 : index
    %c0_15 = arith.constant 0 : index
    %14 = vector.load %arg10[%c0_14, %c0_15] : memref<8x128xf32, #tpu.memory_space<vmem>>, vector<8x128xf32>
    %c0_i32_16 = arith.constant 0 : i32
    %15 = arith.index_cast %c0_i32_16 : i32 to index
    %c0_17 = arith.constant 0 : index
    %c0_18 = arith.constant 0 : index
    %16 = vector.load %arg8[%15, %c0_17, %c0_18] : memref<8x8x512xf32, #tpu.memory_space<vmem>>, vector<1x8x512xf32>
    %17 = vector.shape_cast %16 : vector<1x8x512xf32> to vector<8x512xf32>
    %18 = arith.truncf %13 : vector<8x128xf32> to vector<8x128xbf16>
    %cst_19 = arith.constant dense<0.000000e+00> : vector<8x512xf32>
    %19 = tpu.matmul %18, %12, %cst_19 {dimension_numbers = #tpu.dot_dimension_numbers<[1], [0], [0], [1], [0, 0, 1, 1], [], []>} : vector<8x128xbf16>, vector<128x512xbf16>, vector<8x512xf32> -> vector<8x512xf32>
    %20 = arith.addf %17, %19 : vector<8x512xf32>
    %21 = vector.extract_strided_slice %20 {offsets = [0, 0], sizes = [8, 128], strides = [1, 1]} : vector<8x512xf32> to vector<8x128xf32>
    %22 = arith.negf %21 : vector<8x128xf32>
    %23 = math.exp %22 : vector<8x128xf32>
    %cst_20 = arith.constant 1.000000e+00 : f32
    %24 = vector.broadcast %cst_20 : f32 to vector<8x128xf32>
    %25 = arith.addf %24, %23 : vector<8x128xf32>
    %26 = arith.divf %24, %25 : vector<8x128xf32>
    %27 = vector.extract_strided_slice %20 {offsets = [0, 128], sizes = [8, 128], strides = [1, 1]} : vector<8x512xf32> to vector<8x128xf32>
    %28 = arith.negf %27 : vector<8x128xf32>
    %29 = math.exp %28 : vector<8x128xf32>
    %cst_21 = arith.constant 1.000000e+00 : f32
    %30 = vector.broadcast %cst_21 : f32 to vector<8x128xf32>
    %31 = arith.addf %30, %29 : vector<8x128xf32>
    %32 = arith.divf %30, %31 : vector<8x128xf32>
    %33 = vector.extract_strided_slice %20 {offsets = [0, 256], sizes = [8, 128], strides = [1, 1]} : vector<8x512xf32> to vector<8x128xf32>
    %34 = math.tanh %33 : vector<8x128xf32>
    %35 = vector.extract_strided_slice %20 {offsets = [0, 384], sizes = [8, 128], strides = [1, 1]} : vector<8x512xf32> to vector<8x128xf32>
    %36 = arith.negf %35 : vector<8x128xf32>
    %37 = math.exp %36 : vector<8x128xf32>
    %cst_22 = arith.constant 1.000000e+00 : f32
    %38 = vector.broadcast %cst_22 : f32 to vector<8x128xf32>
    %39 = arith.addf %38, %37 : vector<8x128xf32>
    %40 = arith.divf %38, %39 : vector<8x128xf32>
    %41 = arith.mulf %32, %14 : vector<8x128xf32>
    %42 = arith.mulf %26, %34 : vector<8x128xf32>
    %43 = arith.addf %41, %42 : vector<8x128xf32>
    %44 = math.tanh %43 : vector<8x128xf32>
    %45 = arith.mulf %40, %44 : vector<8x128xf32>
    %c1_i32 = arith.constant 1 : i32
    %46 = arith.index_cast %c1_i32 : i32 to index
    %c0_23 = arith.constant 0 : index
    %c0_24 = arith.constant 0 : index
    %47 = vector.load %arg8[%46, %c0_23, %c0_24] : memref<8x8x512xf32, #tpu.memory_space<vmem>>, vector<1x8x512xf32>
    %48 = vector.shape_cast %47 : vector<1x8x512xf32> to vector<8x512xf32>
    %49 = arith.truncf %45 : vector<8x128xf32> to vector<8x128xbf16>
    %cst_25 = arith.constant dense<0.000000e+00> : vector<8x512xf32>
    %50 = tpu.matmul %49, %12, %cst_25 {dimension_numbers = #tpu.dot_dimension_numbers<[1], [0], [0], [1], [0, 0, 1, 1], [], []>} : vector<8x128xbf16>, vector<128x512xbf16>, vector<8x512xf32> -> vector<8x512xf32>
    %51 = arith.addf %48, %50 : vector<8x512xf32>
    %52 = vector.extract_strided_slice %51 {offsets = [0, 0], sizes = [8, 128], strides = [1, 1]} : vector<8x512xf32> to vector<8x128xf32>
    %53 = arith.negf %52 : vector<8x128xf32>
    %54 = math.exp %53 : vector<8x128xf32>
    %cst_26 = arith.constant 1.000000e+00 : f32
    %55 = vector.broadcast %cst_26 : f32 to vector<8x128xf32>
    %56 = arith.addf %55, %54 : vector<8x128xf32>
    %57 = arith.divf %55, %56 : vector<8x128xf32>
    %58 = vector.extract_strided_slice %51 {offsets = [0, 128], sizes = [8, 128], strides = [1, 1]} : vector<8x512xf32> to vector<8x128xf32>
    %59 = arith.negf %58 : vector<8x128xf32>
    %60 = math.exp %59 : vector<8x128xf32>
    %cst_27 = arith.constant 1.000000e+00 : f32
    %61 = vector.broadcast %cst_27 : f32 to vector<8x128xf32>
    %62 = arith.addf %61, %60 : vector<8x128xf32>
    %63 = arith.divf %61, %62 : vector<8x128xf32>
    %64 = vector.extract_strided_slice %51 {offsets = [0, 256], sizes = [8, 128], strides = [1, 1]} : vector<8x512xf32> to vector<8x128xf32>
    %65 = math.tanh %64 : vector<8x128xf32>
    %66 = vector.extract_strided_slice %51 {offsets = [0, 384], sizes = [8, 128], strides = [1, 1]} : vector<8x512xf32> to vector<8x128xf32>
    %67 = arith.negf %66 : vector<8x128xf32>
    %68 = math.exp %67 : vector<8x128xf32>
    %cst_28 = arith.constant 1.000000e+00 : f32
    %69 = vector.broadcast %cst_28 : f32 to vector<8x128xf32>
    %70 = arith.addf %69, %68 : vector<8x128xf32>
    %71 = arith.divf %69, %70 : vector<8x128xf32>
    %72 = arith.mulf %63, %43 : vector<8x128xf32>
    %73 = arith.mulf %57, %65 : vector<8x128xf32>
    %74 = arith.addf %72, %73 : vector<8x128xf32>
    %75 = math.tanh %74 : vector<8x128xf32>
    %76 = arith.mulf %71, %75 : vector<8x128xf32>
    %c2_i32 = arith.constant 2 : i32
    %77 = arith.index_cast %c2_i32 : i32 to index
    %c0_29 = arith.constant 0 : index
    %c0_30 = arith.constant 0 : index
    %78 = vector.load %arg8[%77, %c0_29, %c0_30] : memref<8x8x512xf32, #tpu.memory_space<vmem>>, vector<1x8x512xf32>
    %79 = vector.shape_cast %78 : vector<1x8x512xf32> to vector<8x512xf32>
    %80 = arith.truncf %76 : vector<8x128xf32> to vector<8x128xbf16>
    %cst_31 = arith.constant dense<0.000000e+00> : vector<8x512xf32>
    %81 = tpu.matmul %80, %12, %cst_31 {dimension_numbers = #tpu.dot_dimension_numbers<[1], [0], [0], [1], [0, 0, 1, 1], [], []>} : vector<8x128xbf16>, vector<128x512xbf16>, vector<8x512xf32> -> vector<8x512xf32>
    %82 = arith.addf %79, %81 : vector<8x512xf32>
    %83 = vector.extract_strided_slice %82 {offsets = [0, 0], sizes = [8, 128], strides = [1, 1]} : vector<8x512xf32> to vector<8x128xf32>
    %84 = arith.negf %83 : vector<8x128xf32>
    %85 = math.exp %84 : vector<8x128xf32>
    %cst_32 = arith.constant 1.000000e+00 : f32
    %86 = vector.broadcast %cst_32 : f32 to vector<8x128xf32>
    %87 = arith.addf %86, %85 : vector<8x128xf32>
    %88 = arith.divf %86, %87 : vector<8x128xf32>
    %89 = vector.extract_strided_slice %82 {offsets = [0, 128], sizes = [8, 128], strides = [1, 1]} : vector<8x512xf32> to vector<8x128xf32>
    %90 = arith.negf %89 : vector<8x128xf32>
    %91 = math.exp %90 : vector<8x128xf32>
    %cst_33 = arith.constant 1.000000e+00 : f32
    %92 = vector.broadcast %cst_33 : f32 to vector<8x128xf32>
    %93 = arith.addf %92, %91 : vector<8x128xf32>
    %94 = arith.divf %92, %93 : vector<8x128xf32>
    %95 = vector.extract_strided_slice %82 {offsets = [0, 256], sizes = [8, 128], strides = [1, 1]} : vector<8x512xf32> to vector<8x128xf32>
    %96 = math.tanh %95 : vector<8x128xf32>
    %97 = vector.extract_strided_slice %82 {offsets = [0, 384], sizes = [8, 128], strides = [1, 1]} : vector<8x512xf32> to vector<8x128xf32>
    %98 = arith.negf %97 : vector<8x128xf32>
    %99 = math.exp %98 : vector<8x128xf32>
    %cst_34 = arith.constant 1.000000e+00 : f32
    %100 = vector.broadcast %cst_34 : f32 to vector<8x128xf32>
    %101 = arith.addf %100, %99 : vector<8x128xf32>
    %102 = arith.divf %100, %101 : vector<8x128xf32>
    %103 = arith.mulf %94, %74 : vector<8x128xf32>
    %104 = arith.mulf %88, %96 : vector<8x128xf32>
    %105 = arith.addf %103, %104 : vector<8x128xf32>
    %106 = math.tanh %105 : vector<8x128xf32>
    %107 = arith.mulf %102, %106 : vector<8x128xf32>
    %c3_i32 = arith.constant 3 : i32
    %108 = arith.index_cast %c3_i32 : i32 to index
    %c0_35 = arith.constant 0 : index
    %c0_36 = arith.constant 0 : index
    %109 = vector.load %arg8[%108, %c0_35, %c0_36] : memref<8x8x512xf32, #tpu.memory_space<vmem>>, vector<1x8x512xf32>
    %110 = vector.shape_cast %109 : vector<1x8x512xf32> to vector<8x512xf32>
    %111 = arith.truncf %107 : vector<8x128xf32> to vector<8x128xbf16>
    %cst_37 = arith.constant dense<0.000000e+00> : vector<8x512xf32>
    %112 = tpu.matmul %111, %12, %cst_37 {dimension_numbers = #tpu.dot_dimension_numbers<[1], [0], [0], [1], [0, 0, 1, 1], [], []>} : vector<8x128xbf16>, vector<128x512xbf16>, vector<8x512xf32> -> vector<8x512xf32>
    %113 = arith.addf %110, %112 : vector<8x512xf32>
    %114 = vector.extract_strided_slice %113 {offsets = [0, 0], sizes = [8, 128], strides = [1, 1]} : vector<8x512xf32> to vector<8x128xf32>
    %115 = arith.negf %114 : vector<8x128xf32>
    %116 = math.exp %115 : vector<8x128xf32>
    %cst_38 = arith.constant 1.000000e+00 : f32
    %117 = vector.broadcast %cst_38 : f32 to vector<8x128xf32>
    %118 = arith.addf %117, %116 : vector<8x128xf32>
    %119 = arith.divf %117, %118 : vector<8x128xf32>
    %120 = vector.extract_strided_slice %113 {offsets = [0, 128], sizes = [8, 128], strides = [1, 1]} : vector<8x512xf32> to vector<8x128xf32>
    %121 = arith.negf %120 : vector<8x128xf32>
    %122 = math.exp %121 : vector<8x128xf32>
    %cst_39 = arith.constant 1.000000e+00 : f32
    %123 = vector.broadcast %cst_39 : f32 to vector<8x128xf32>
    %124 = arith.addf %123, %122 : vector<8x128xf32>
    %125 = arith.divf %123, %124 : vector<8x128xf32>
    %126 = vector.extract_strided_slice %113 {offsets = [0, 256], sizes = [8, 128], strides = [1, 1]} : vector<8x512xf32> to vector<8x128xf32>
    %127 = math.tanh %126 : vector<8x128xf32>
    %128 = vector.extract_strided_slice %113 {offsets = [0, 384], sizes = [8, 128], strides = [1, 1]} : vector<8x512xf32> to vector<8x128xf32>
    %129 = arith.negf %128 : vector<8x128xf32>
    %130 = math.exp %129 : vector<8x128xf32>
    %cst_40 = arith.constant 1.000000e+00 : f32
    %131 = vector.broadcast %cst_40 : f32 to vector<8x128xf32>
    %132 = arith.addf %131, %130 : vector<8x128xf32>
    %133 = arith.divf %131, %132 : vector<8x128xf32>
    %134 = arith.mulf %125, %105 : vector<8x128xf32>
    %135 = arith.mulf %119, %127 : vector<8x128xf32>
    %136 = arith.addf %134, %135 : vector<8x128xf32>
    %137 = math.tanh %136 : vector<8x128xf32>
    %138 = arith.mulf %133, %137 : vector<8x128xf32>
    %c4_i32 = arith.constant 4 : i32
    %139 = arith.index_cast %c4_i32 : i32 to index
    %c0_41 = arith.constant 0 : index
    %c0_42 = arith.constant 0 : index
    %140 = vector.load %arg8[%139, %c0_41, %c0_42] : memref<8x8x512xf32, #tpu.memory_space<vmem>>, vector<1x8x512xf32>
    %141 = vector.shape_cast %140 : vector<1x8x512xf32> to vector<8x512xf32>
    %142 = arith.truncf %138 : vector<8x128xf32> to vector<8x128xbf16>
    %cst_43 = arith.constant dense<0.000000e+00> : vector<8x512xf32>
    %143 = tpu.matmul %142, %12, %cst_43 {dimension_numbers = #tpu.dot_dimension_numbers<[1], [0], [0], [1], [0, 0, 1, 1], [], []>} : vector<8x128xbf16>, vector<128x512xbf16>, vector<8x512xf32> -> vector<8x512xf32>
    %144 = arith.addf %141, %143 : vector<8x512xf32>
    %145 = vector.extract_strided_slice %144 {offsets = [0, 0], sizes = [8, 128], strides = [1, 1]} : vector<8x512xf32> to vector<8x128xf32>
    %146 = arith.negf %145 : vector<8x128xf32>
    %147 = math.exp %146 : vector<8x128xf32>
    %cst_44 = arith.constant 1.000000e+00 : f32
    %148 = vector.broadcast %cst_44 : f32 to vector<8x128xf32>
    %149 = arith.addf %148, %147 : vector<8x128xf32>
    %150 = arith.divf %148, %149 : vector<8x128xf32>
    %151 = vector.extract_strided_slice %144 {offsets = [0, 128], sizes = [8, 128], strides = [1, 1]} : vector<8x512xf32> to vector<8x128xf32>
    %152 = arith.negf %151 : vector<8x128xf32>
    %153 = math.exp %152 : vector<8x128xf32>
    %cst_45 = arith.constant 1.000000e+00 : f32
    %154 = vector.broadcast %cst_45 : f32 to vector<8x128xf32>
    %155 = arith.addf %154, %153 : vector<8x128xf32>
    %156 = arith.divf %154, %155 : vector<8x128xf32>
    %157 = vector.extract_strided_slice %144 {offsets = [0, 256], sizes = [8, 128], strides = [1, 1]} : vector<8x512xf32> to vector<8x128xf32>
    %158 = math.tanh %157 : vector<8x128xf32>
    %159 = vector.extract_strided_slice %144 {offsets = [0, 384], sizes = [8, 128], strides = [1, 1]} : vector<8x512xf32> to vector<8x128xf32>
    %160 = arith.negf %159 : vector<8x128xf32>
    %161 = math.exp %160 : vector<8x128xf32>
    %cst_46 = arith.constant 1.000000e+00 : f32
    %162 = vector.broadcast %cst_46 : f32 to vector<8x128xf32>
    %163 = arith.addf %162, %161 : vector<8x128xf32>
    %164 = arith.divf %162, %163 : vector<8x128xf32>
    %165 = arith.mulf %156, %136 : vector<8x128xf32>
    %166 = arith.mulf %150, %158 : vector<8x128xf32>
    %167 = arith.addf %165, %166 : vector<8x128xf32>
    %168 = math.tanh %167 : vector<8x128xf32>
    %169 = arith.mulf %164, %168 : vector<8x128xf32>
    %c5_i32 = arith.constant 5 : i32
    %170 = arith.index_cast %c5_i32 : i32 to index
    %c0_47 = arith.constant 0 : index
    %c0_48 = arith.constant 0 : index
    %171 = vector.load %arg8[%170, %c0_47, %c0_48] : memref<8x8x512xf32, #tpu.memory_space<vmem>>, vector<1x8x512xf32>
    %172 = vector.shape_cast %171 : vector<1x8x512xf32> to vector<8x512xf32>
    %173 = arith.truncf %169 : vector<8x128xf32> to vector<8x128xbf16>
    %cst_49 = arith.constant dense<0.000000e+00> : vector<8x512xf32>
    %174 = tpu.matmul %173, %12, %cst_49 {dimension_numbers = #tpu.dot_dimension_numbers<[1], [0], [0], [1], [0, 0, 1, 1], [], []>} : vector<8x128xbf16>, vector<128x512xbf16>, vector<8x512xf32> -> vector<8x512xf32>
    %175 = arith.addf %172, %174 : vector<8x512xf32>
    %176 = vector.extract_strided_slice %175 {offsets = [0, 0], sizes = [8, 128], strides = [1, 1]} : vector<8x512xf32> to vector<8x128xf32>
    %177 = arith.negf %176 : vector<8x128xf32>
    %178 = math.exp %177 : vector<8x128xf32>
    %cst_50 = arith.constant 1.000000e+00 : f32
    %179 = vector.broadcast %cst_50 : f32 to vector<8x128xf32>
    %180 = arith.addf %179, %178 : vector<8x128xf32>
    %181 = arith.divf %179, %180 : vector<8x128xf32>
    %182 = vector.extract_strided_slice %175 {offsets = [0, 128], sizes = [8, 128], strides = [1, 1]} : vector<8x512xf32> to vector<8x128xf32>
    %183 = arith.negf %182 : vector<8x128xf32>
    %184 = math.exp %183 : vector<8x128xf32>
    %cst_51 = arith.constant 1.000000e+00 : f32
    %185 = vector.broadcast %cst_51 : f32 to vector<8x128xf32>
    %186 = arith.addf %185, %184 : vector<8x128xf32>
    %187 = arith.divf %185, %186 : vector<8x128xf32>
    %188 = vector.extract_strided_slice %175 {offsets = [0, 256], sizes = [8, 128], strides = [1, 1]} : vector<8x512xf32> to vector<8x128xf32>
    %189 = math.tanh %188 : vector<8x128xf32>
    %190 = vector.extract_strided_slice %175 {offsets = [0, 384], sizes = [8, 128], strides = [1, 1]} : vector<8x512xf32> to vector<8x128xf32>
    %191 = arith.negf %190 : vector<8x128xf32>
    %192 = math.exp %191 : vector<8x128xf32>
    %cst_52 = arith.constant 1.000000e+00 : f32
    %193 = vector.broadcast %cst_52 : f32 to vector<8x128xf32>
    %194 = arith.addf %193, %192 : vector<8x128xf32>
    %195 = arith.divf %193, %194 : vector<8x128xf32>
    %196 = arith.mulf %187, %167 : vector<8x128xf32>
    %197 = arith.mulf %181, %189 : vector<8x128xf32>
    %198 = arith.addf %196, %197 : vector<8x128xf32>
    %199 = math.tanh %198 : vector<8x128xf32>
    %200 = arith.mulf %195, %199 : vector<8x128xf32>
    %c6_i32 = arith.constant 6 : i32
    %201 = arith.index_cast %c6_i32 : i32 to index
    %c0_53 = arith.constant 0 : index
    %c0_54 = arith.constant 0 : index
    %202 = vector.load %arg8[%201, %c0_53, %c0_54] : memref<8x8x512xf32, #tpu.memory_space<vmem>>, vector<1x8x512xf32>
    %203 = vector.shape_cast %202 : vector<1x8x512xf32> to vector<8x512xf32>
    %204 = arith.truncf %200 : vector<8x128xf32> to vector<8x128xbf16>
    %cst_55 = arith.constant dense<0.000000e+00> : vector<8x512xf32>
    %205 = tpu.matmul %204, %12, %cst_55 {dimension_numbers = #tpu.dot_dimension_numbers<[1], [0], [0], [1], [0, 0, 1, 1], [], []>} : vector<8x128xbf16>, vector<128x512xbf16>, vector<8x512xf32> -> vector<8x512xf32>
    %206 = arith.addf %203, %205 : vector<8x512xf32>
    %207 = vector.extract_strided_slice %206 {offsets = [0, 0], sizes = [8, 128], strides = [1, 1]} : vector<8x512xf32> to vector<8x128xf32>
    %208 = arith.negf %207 : vector<8x128xf32>
    %209 = math.exp %208 : vector<8x128xf32>
    %cst_56 = arith.constant 1.000000e+00 : f32
    %210 = vector.broadcast %cst_56 : f32 to vector<8x128xf32>
    %211 = arith.addf %210, %209 : vector<8x128xf32>
    %212 = arith.divf %210, %211 : vector<8x128xf32>
    %213 = vector.extract_strided_slice %206 {offsets = [0, 128], sizes = [8, 128], strides = [1, 1]} : vector<8x512xf32> to vector<8x128xf32>
    %214 = arith.negf %213 : vector<8x128xf32>
    %215 = math.exp %214 : vector<8x128xf32>
    %cst_57 = arith.constant 1.000000e+00 : f32
    %216 = vector.broadcast %cst_57 : f32 to vector<8x128xf32>
    %217 = arith.addf %216, %215 : vector<8x128xf32>
    %218 = arith.divf %216, %217 : vector<8x128xf32>
    %219 = vector.extract_strided_slice %206 {offsets = [0, 256], sizes = [8, 128], strides = [1, 1]} : vector<8x512xf32> to vector<8x128xf32>
    %220 = math.tanh %219 : vector<8x128xf32>
    %221 = vector.extract_strided_slice %206 {offsets = [0, 384], sizes = [8, 128], strides = [1, 1]} : vector<8x512xf32> to vector<8x128xf32>
    %222 = arith.negf %221 : vector<8x128xf32>
    %223 = math.exp %222 : vector<8x128xf32>
    %cst_58 = arith.constant 1.000000e+00 : f32
    %224 = vector.broadcast %cst_58 : f32 to vector<8x128xf32>
    %225 = arith.addf %224, %223 : vector<8x128xf32>
    %226 = arith.divf %224, %225 : vector<8x128xf32>
    %227 = arith.mulf %218, %198 : vector<8x128xf32>
    %228 = arith.mulf %212, %220 : vector<8x128xf32>
    %229 = arith.addf %227, %228 : vector<8x128xf32>
    %230 = math.tanh %229 : vector<8x128xf32>
    %231 = arith.mulf %226, %230 : vector<8x128xf32>
    %c7_i32 = arith.constant 7 : i32
    %232 = arith.index_cast %c7_i32 : i32 to index
    %c0_59 = arith.constant 0 : index
    %c0_60 = arith.constant 0 : index
    %233 = vector.load %arg8[%232, %c0_59, %c0_60] : memref<8x8x512xf32, #tpu.memory_space<vmem>>, vector<1x8x512xf32>
    %234 = vector.shape_cast %233 : vector<1x8x512xf32> to vector<8x512xf32>
    %235 = arith.truncf %231 : vector<8x128xf32> to vector<8x128xbf16>
    %cst_61 = arith.constant dense<0.000000e+00> : vector<8x512xf32>
    %236 = tpu.matmul %235, %12, %cst_61 {dimension_numbers = #tpu.dot_dimension_numbers<[1], [0], [0], [1], [0, 0, 1, 1], [], []>} : vector<8x128xbf16>, vector<128x512xbf16>, vector<8x512xf32> -> vector<8x512xf32>
    %237 = arith.addf %234, %236 : vector<8x512xf32>
    %238 = vector.extract_strided_slice %237 {offsets = [0, 0], sizes = [8, 128], strides = [1, 1]} : vector<8x512xf32> to vector<8x128xf32>
    %239 = arith.negf %238 : vector<8x128xf32>
    %240 = math.exp %239 : vector<8x128xf32>
    %cst_62 = arith.constant 1.000000e+00 : f32
    %241 = vector.broadcast %cst_62 : f32 to vector<8x128xf32>
    %242 = arith.addf %241, %240 : vector<8x128xf32>
    %243 = arith.divf %241, %242 : vector<8x128xf32>
    %244 = vector.extract_strided_slice %237 {offsets = [0, 128], sizes = [8, 128], strides = [1, 1]} : vector<8x512xf32> to vector<8x128xf32>
    %245 = arith.negf %244 : vector<8x128xf32>
    %246 = math.exp %245 : vector<8x128xf32>
    %cst_63 = arith.constant 1.000000e+00 : f32
    %247 = vector.broadcast %cst_63 : f32 to vector<8x128xf32>
    %248 = arith.addf %247, %246 : vector<8x128xf32>
    %249 = arith.divf %247, %248 : vector<8x128xf32>
    %250 = vector.extract_strided_slice %237 {offsets = [0, 256], sizes = [8, 128], strides = [1, 1]} : vector<8x512xf32> to vector<8x128xf32>
    %251 = math.tanh %250 : vector<8x128xf32>
    %252 = vector.extract_strided_slice %237 {offsets = [0, 384], sizes = [8, 128], strides = [1, 1]} : vector<8x512xf32> to vector<8x128xf32>
    %253 = arith.negf %252 : vector<8x128xf32>
    %254 = math.exp %253 : vector<8x128xf32>
    %cst_64 = arith.constant 1.000000e+00 : f32
    %255 = vector.broadcast %cst_64 : f32 to vector<8x128xf32>
    %256 = arith.addf %255, %254 : vector<8x128xf32>
    %257 = arith.divf %255, %256 : vector<8x128xf32>
    %258 = arith.mulf %249, %229 : vector<8x128xf32>
    %259 = arith.mulf %243, %251 : vector<8x128xf32>
    %260 = arith.addf %258, %259 : vector<8x128xf32>
    %261 = math.tanh %260 : vector<8x128xf32>
    %262 = arith.mulf %257, %261 : vector<8x128xf32>
    %c8_i32 = arith.constant 8 : i32
    %c0_65 = arith.constant 0 : index
    %c0_66 = arith.constant 0 : index
    %263 = vector.load %arg9[%c0_65, %c0_66] : memref<8x128xf32, #tpu.memory_space<vmem>>, vector<8x128xf32>
    tpu.vector_store %arg9[%c0_65, %c0_66], %262 {strides = array<i32>} : memref<8x128xf32, #tpu.memory_space<vmem>>, vector<8x128xf32>,
    %c0_67 = arith.constant 0 : index
    %c0_68 = arith.constant 0 : index
    %264 = vector.load %arg10[%c0_67, %c0_68] : memref<8x128xf32, #tpu.memory_space<vmem>>, vector<8x128xf32>
    tpu.vector_store %arg10[%c0_67, %c0_68], %260 {strides = array<i32>} : memref<8x128xf32, #tpu.memory_space<vmem>>, vector<8x128xf32>,
    %c0_i32_69 = arith.constant 0 : i32
    %265 = arith.cmpi eq, %arg0, %c0_i32_69 : i32
    %266 = arith.extui %265 : i1 to i32
    %c0_i32_70 = arith.constant 0 : i32
    %267 = arith.cmpi ne, %266, %c0_i32_70 : i32
    scf.if %267 {
      %268 = arith.truncf %262 : vector<8x128xf32> to vector<8x128xbf16>
      %c0_71 = arith.constant 0 : index
      %c0_72 = arith.constant 0 : index
      %269 = vector.load %arg5[%c0_71, %c0_72] : memref<128x9xbf16, #tpu.memory_space<vmem>>, vector<128x9xbf16>
      %cst_73 = arith.constant dense<0.000000e+00> : vector<8x9xf32>
      %270 = tpu.matmul %268, %269, %cst_73 {dimension_numbers = #tpu.dot_dimension_numbers<[1], [0], [0], [1], [0, 0, 1, 1], [], []>} : vector<8x128xbf16>, vector<128x9xbf16>, vector<8x9xf32> -> vector<8x9xf32>
      %c0_74 = arith.constant 0 : index
      %c0_75 = arith.constant 0 : index
      %271 = vector.load %arg6[%c0_74, %c0_75] : memref<1x9xf32, #tpu.memory_space<vmem>>, vector<1x9xf32>
      %272 = vector.broadcast %271 : vector<1x9xf32> to vector<8x9xf32>
      %273 = arith.addf %270, %272 : vector<8x9xf32>
      %c0_76 = arith.constant 0 : index
      %c0_77 = arith.constant 0 : index
      %274 = vector.load %arg7[%c0_76, %c0_77] : memref<8x9xf32, #tpu.memory_space<vmem>>, vector<8x9xf32>
      tpu.vector_store %arg7[%c0_76, %c0_77], %273 {strides = array<i32>} : memref<8x9xf32, #tpu.memory_space<vmem>>, vector<8x9xf32>,
    } else {
    }
    return
  }
  func.func @transform_0(%arg0: i32) -> (i32, i32, i32) {
    %c0_i32 = arith.constant 0 : i32
    %c0_i32_0 = arith.constant 0 : i32
    %c0_i32_1 = arith.constant 0 : i32
    return %arg0, %c0_i32, %c0_i32_0 : i32, i32, i32
  }
  func.func @transform_1(%arg0: i32) -> (i32, i32) {
    %c0_i32 = arith.constant 0 : i32
    %c0_i32_0 = arith.constant 0 : i32
    %c0_i32_1 = arith.constant 0 : i32
    return %c0_i32, %c0_i32_0 : i32, i32
  }
  func.func @transform_2(%arg0: i32) -> (i32, i32) {
    %c0_i32 = arith.constant 0 : i32
    %c0_i32_0 = arith.constant 0 : i32
    %c0_i32_1 = arith.constant 0 : i32
    return %c0_i32, %c0_i32_0 : i32, i32
  }
  func.func @transform_3(%arg0: i32) -> (i32, i32) {
    %c0_i32 = arith.constant 0 : i32
    %c0_i32_0 = arith.constant 0 : i32
    %c0_i32_1 = arith.constant 0 : i32
    return %c0_i32, %c0_i32_0 : i32, i32
  }
  func.func @transform_4(%arg0: i32) -> (i32, i32) {
    %c0_i32 = arith.constant 0 : i32
    %c0_i32_0 = arith.constant 0 : i32
    %c0_i32_1 = arith.constant 0 : i32
    return %c0_i32, %c0_i32_0 : i32, i32
  }
  func.func @transform_5(%arg0: i32) -> (i32, i32) {
    %c0_i32 = arith.constant 0 : i32
    %c0_i32_0 = arith.constant 0 : i32
    %c0_i32_1 = arith.constant 0 : i32
    return %c0_i32, %c0_i32_0 : i32, i32
  }
  func.func @transform_6(%arg0: i32) -> (i32, i32) {
    %c0_i32 = arith.constant 0 : i32
    %c0_i32_0 = arith.constant 0 : i32
    %c0_i32_1 = arith.constant 0 : i32
    return %c0_i32, %c0_i32_0 : i32, i32
  }
}

</mosaic_0001>

<bundles_post_ra>
// kernel: lstm_forward.2
= control target key start
LH: loop header
LB: loop body
LE: loop exit
PB: predicated region body
PF: predicated region fallthrough
CT: control target
= control target key end

     0   :  { %9 = vsyncpa [#allocation6], 0  ;;  %s1781_s15 = smov [#allocation5]   ;;  %s2412_s0 = inlined_call_operand.vmem [shape: f32[8,8,16], index: 0, kind: input, shape index: {}]   ;;  %s2413_s1 = inlined_call_operand.vmem [shape: bf16[16,512], index: 1, kind: input, shape index: {}]   ;;  %s2414_s2 = inlined_call_operand.hbm [shape: bf16[128,512], index: 2, kind: input, shape index: {}]   ;;  %s2415_s3 = inlined_call_operand.vmem [shape: f32[1,512], index: 3, kind: input, shape index: {}]   ;;  %s2416_s4 = inlined_call_operand.vmem [shape: bf16[8,8,128], index: 4, kind: output, shape index: {}]  }
   0x1   :  { %s19_s16 = sshll.u32 %s1781_s15, 4  ;;  %s1757_s19 = scalar_lea.hbm %s2414_s2, 4096  ;;  %s20_s16 = int_to_ptr.vmem [resolvable:$true] %s19_s16 }
   0x2   :  { %p1758_p0 = scmp.ne.s32.totalorder %s2414_s2, %s1757_s19  ;;  %p1761_p1 = scmp.lt.u32.totalorder %s1757_s19, %s2414_s2 }
   0x4   :  { %p1763_p2 = pnand %p1761_p1, %p1758_p0 }
   0x6   :  { %1766 = shalt.err (!%p1763_p2)
}
   0x7   :  { %s1767_s24 = scalar_lea.vmem %s20_s16, 4096  ;;  %p1772_p4 = scmp.lt.s32.totalorder %s20_s16, %s20_s16 }
   0x8   :  { %p1768_p3 = scmp.ne.s32.totalorder %s20_s16, %s1767_s24  ;;  %p1773_p5 = scmp.lt.s32.totalorder %s1767_s24, %s1767_s24 }
   0xa   :  { %p1774_p6 = por %p1773_p5, %p1772_p4 }
   0xc   :  { %p1775_p7 = pnand %p1774_p6, %p1768_p3 }
   0xe   :  { %1778 = shalt.err (!%p1775_p7)
}
   0xf   :  { %s1782_s25 = smov 256   ;;  %s1783_s26 = smov 16  }
  0x10   :  { %25 = dma.hbm_to_vmem [thread:$0]  %s2414_s2, 4096, %s20_s16, [#allocation6], %s1782_s25, %s1782_s25, %s1783_s26  }
  0x11   :  { %1779 = dma.done.wait [#allocation6], 4096  }
  0x12   :  { %1780 = vsyncadd [#allocation6], 4294963200  ;;  %v2417_v0 = vmov 0   ;;  %v1543_v1 = vld [vmem:[%s2413_s1 + $0x4] ss:$16 sps:$4 sm:$0xff]   ;;  %v39_v6 = vld [vmem:[%s2412_s0 + $0x8] sm:$0xff]  ;;  %v60_v50 = vlaneseq }
  0x13   :  { %165 = vmatprep.mubr.bf16.mxu0 %v2417_v0  ;;  %238 = vmatprep.mubr.bf16.mxu1 %v2417_v0  ;;  %v1545_v2 = vld [vmem:[%s2413_s1 + $0xc] ss:$16 sps:$4 sm:$0xff]   ;;  %v1547_v3 = vld [vmem:[%s2413_s1] ss:$16 sps:$4 sm:$0xff]   ;;  %v1548_v4 = vld [vmem:[%s2413_s1 + $0x8] ss:$16 sps:$4 sm:$0xff]  }
  0x14   :  { %133 = vmatprep.subr.bf16.mxu0 %v1543_v1  ;;  %v38_v5 = vld [vmem:[%s2412_s0] sm:$0xff]  ;;  %206 = vmatprep.subr.bf16.mxu1 %v1545_v2  ;;  %vm120_vm0 = vcmask 130048   ;;  %v1845_v9 = vld [vmem:[#allocation5 + $0xc] ss:$16 sps:$4 sm:$0xff]   ;;  %v1849_v11 = vld [vmem:[#allocation5 + $0x8] ss:$16 sps:$4 sm:$0xff]  }
  0x15   :  { %134 = vmatpush1.bf16.msra.mxu0 %v1547_v3  ;;  %207 = vmatpush1.bf16.msra.mxu1 %v1548_v4  ;;  %v1534_v7 = vpack.c.bf16 %v39_v6, %v38_v5  ;;  %v1843_v8 = vld [vmem:[#allocation5 + $0x4] ss:$16 sps:$4 sm:$0xff]   ;;  %v1847_v10 = vld [vmem:[#allocation5] ss:$16 sps:$4 sm:$0xff]   ;;  %v1856_v13 = vld [vmem:[#allocation5 + $0x2c] ss:$16 sps:$4 sm:$0xff]  }
  0x16   :  { %510 = vmatprep.subr.bf16.mxu0 %v1843_v8  ;;  %v1852_v12 = vld [vmem:[#allocation5 + $0x24] ss:$16 sps:$4 sm:$0xff]   ;;  %551 = vmatprep.subr.bf16.mxu1 %v1845_v9  ;;  %v1860_v14 = vld [vmem:[#allocation5 + $0x20] ss:$16 sps:$4 sm:$0xff]   ;;  %v1862_v15 = vld [vmem:[#allocation5 + $0x28] ss:$16 sps:$4 sm:$0xff]  }
  0x17   :  { %v40_v16 = vld [vmem:[%s2412_s0 + $0x10] sm:$0xff]  ;;  %v41_v17 = vld [vmem:[%s2412_s0 + $0x18] sm:$0xff]  ;;  %v42_v26 = vld [vmem:[%s2412_s0 + $0x20] sm:$0xff]  ;;  %v1785_v49 = vmov 0.0|0.0   ;;  %v61_v51 = vshrl.u32 %v60_v50, 7 }
  0x18   :  { %1463 = vmatmul.mubr.msk.bf16.vlgmr.msra.gmra.mrb[0].mxu0 %vm120_vm0, %v1534_v7  ;;  %1467 = vmatmul.mubr.msk.bf16.vlgmr.msra.gmra.mrb[0].mxu1 %vm120_vm0, %v1534_v7  ;;  %v1874_v18 = vld [vmem:[#allocation5 + $0x44] ss:$16 sps:$4 sm:$0xff]   ;;  %v1535_v19 = vpack.c.bf16 %v41_v17, %v40_v16  ;;  %v1877_v20 = vld [vmem:[#allocation5 + $0x4c] ss:$16 sps:$4 sm:$0xff]   ;;  %v1879_v21 = vld [vmem:[#allocation5 + $0x40] ss:$16 sps:$4 sm:$0xff]  }
  0x19   :  { %511 = vmatpush1.bf16.msra.mxu0 %v1847_v10  ;;  %552 = vmatpush1.bf16.msra.mxu1 %v1849_v11  ;;  %v1882_v22 = vld [vmem:[#allocation5 + $0x48] ss:$16 sps:$4 sm:$0xff]   ;;  %v1886_v23 = vld [vmem:[#allocation5 + $0x64] ss:$16 sps:$4 sm:$0xff]   ;;  %v1889_v24 = vld [vmem:[#allocation5 + $0x6c] ss:$16 sps:$4 sm:$0xff]  }
  0x1a   :  { %512 = vmatprep.subr.bf16.mxu0 %v1852_v12  ;;  %553 = vmatprep.subr.bf16.mxu1 %v1856_v13  ;;  %v1891_v25 = vld [vmem:[#allocation5 + $0x60] ss:$16 sps:$4 sm:$0xff]   ;;  %v43_v27 = vld [vmem:[%s2412_s0 + $0x28] sm:$0xff]  ;;  %v1907_v29 = vld [vmem:[#allocation5 + $0x84] ss:$16 sps:$4 sm:$0xff]   ;;  %v70_v52 = vsub.s32 2, %v61_v51 }
  0x1b   :  { %175 = vmatprep.mubr.bf16.mxu0 %v2417_v0  ;;  %248 = vmatprep.mubr.bf16.mxu1 %v2417_v0  ;;  %v1905_v28 = vld [vmem:[#allocation5 + $0x68] ss:$16 sps:$4 sm:$0xff]   ;;  %v1911_v30 = vld [vmem:[#allocation5 + $0x8c] ss:$16 sps:$4 sm:$0xff]   ;;  %v1536_v31 = vpack.c.bf16 %v43_v27, %v42_v26  ;;  %v1914_v32 = vld [vmem:[#allocation5 + $0x80] ss:$16 sps:$4 sm:$0xff]  }
  0x1c   :  { %v1916_v33 = vld [vmem:[#allocation5 + $0x88] ss:$16 sps:$4 sm:$0xff]   ;;  %v1920_v34 = vld [vmem:[#allocation5 + $0xa4] ss:$16 sps:$4 sm:$0xff]   ;;  %v1923_v35 = vld [vmem:[#allocation5 + $0xac] ss:$16 sps:$4 sm:$0xff]  }
  0x1d   :  { %513 = vmatpush1.bf16.msra.mxu0 %v1860_v14  ;;  %554 = vmatpush1.bf16.msra.mxu1 %v1862_v15  ;;  %v1927_v36 = vld [vmem:[#allocation5 + $0xa0] ss:$16 sps:$4 sm:$0xff]   ;;  %v1929_v37 = vld [vmem:[#allocation5 + $0xa8] ss:$16 sps:$4 sm:$0xff]   ;;  %v1941_v40 = vld [vmem:[#allocation5 + $0xc4] ss:$16 sps:$4 sm:$0xff]  }
  0x1e   :  { %514 = vmatprep.subr.bf16.mxu0 %v1874_v18  ;;  %555 = vmatprep.subr.bf16.mxu1 %v1877_v20  ;;  %v44_v38 = vld [vmem:[%s2412_s0 + $0x30] sm:$0xff]  ;;  %v45_v39 = vld [vmem:[%s2412_s0 + $0x38] sm:$0xff]  ;;  %v74_v53 = vsub.s32 3, %v61_v51  ;;  %v62_v54 = vsub.s32 0, %v61_v51  ;;  %v58_v55 = vld [vmem:[%s2415_s3] sm:$0xf] }
  0x1f   :  { %v1945_v41 = vld [vmem:[#allocation5 + $0xcc] ss:$16 sps:$4 sm:$0xff]   ;;  %v1537_v42 = vpack.c.bf16 %v45_v39, %v44_v38  ;;  %v1948_v43 = vld [vmem:[#allocation5 + $0xc0] ss:$16 sps:$4 sm:$0xff]   ;;  %v1952_v44 = vld [vmem:[#allocation5 + $0xc8] ss:$16 sps:$4 sm:$0xff]   ;;  %v2012_v57 = vrot.slane %v58_v55, %v70_v52 }
  0x20   :  { %1464 = vmatmul.mubr.msk.bf16.gmra.mrb[4].mxu0 %vm120_vm0, %v1535_v19  ;;  %1468 = vmatmul.mubr.msk.bf16.gmra.mrb[4].mxu1 %vm120_vm0, %v1535_v19  ;;  %v1954_v45 = vld [vmem:[#allocation5 + $0xe4] ss:$16 sps:$4 sm:$0xff]   ;;  %v1957_v46 = vld [vmem:[#allocation5 + $0xec] ss:$16 sps:$4 sm:$0xff]   ;;  %v1962_v47 = vld [vmem:[#allocation5 + $0xe0] ss:$16 sps:$4 sm:$0xff]   ;;  %v2018_v60 = vrot.slane %v58_v55, %v74_v53  ;;  %v63_v61 = vrot.slane %v58_v55, %v62_v54 }
  0x21   :  { %515 = vmatpush1.bf16.msra.mxu0 %v1879_v21  ;;  %185 = vmatprep.mubr.bf16.mxu0 %v2417_v0  ;;  %v1967_v48 = vld [vmem:[#allocation5 + $0xe8] ss:$16 sps:$4 sm:$0xff]   ;;  %v66_v56 = vsub.s32 1, %v61_v51 }
  0x22   :  { %556 = vmatpush1.bf16.msra.mxu1 %v1882_v22  ;;  %516 = vmatprep.subr.bf16.mxu0 %v1886_v23 }
  0x23   :  { %557 = vmatprep.subr.bf16.mxu1 %v1889_v24  ;;  %258 = vmatprep.mubr.bf16.mxu1 %v2417_v0  ;;  %v67_v1 = vrot.slane %v58_v55, %v66_v56 }
  0x25   :  { %517 = vmatpush1.bf16.msra.mxu0 %v1891_v25 }
  0x26   :  { %558 = vmatpush1.bf16.msra.mxu1 %v1905_v28  ;;  %518 = vmatprep.subr.bf16.mxu0 %v1907_v29 }
  0x27   :  { %559 = vmatprep.subr.bf16.mxu1 %v1911_v30 }
  0x28   :  { %1465 = vmatmul.mubr.msk.bf16.gmra.mrb[8].mxu0 %vm120_vm0, %v1536_v31  ;;  %1469 = vmatmul.mubr.msk.bf16.gmra.mrb[8].mxu1 %vm120_vm0, %v1536_v31 }
  0x29   :  { %519 = vmatpush1.bf16.msra.mxu0 %v1914_v32  ;;  %195 = vmatprep.mubr.bf16.mxu0 %v2417_v0 }
  0x2a   :  { %560 = vmatpush1.bf16.msra.mxu1 %v1916_v33  ;;  %520 = vmatprep.subr.bf16.mxu0 %v1920_v34 }
  0x2b   :  { %561 = vmatprep.subr.bf16.mxu1 %v1923_v35  ;;  %268 = vmatprep.mubr.bf16.mxu1 %v2417_v0 }
  0x2d   :  { %521 = vmatpush1.bf16.msra.mxu0 %v1927_v36 }
  0x2e   :  { %562 = vmatpush1.bf16.msra.mxu1 %v1929_v37  ;;  %522 = vmatprep.subr.bf16.mxu0 %v1941_v40 }
  0x2f   :  { %563 = vmatprep.subr.bf16.mxu1 %v1945_v41 }
  0x30   :  { %1466 = vmatmul.mubr.msk.bf16.gmra.mrb[12].mxu0 %vm120_vm0, %v1537_v42  ;;  %1470 = vmatmul.mubr.msk.bf16.gmra.mrb[12].mxu1 %vm120_vm0, %v1537_v42 }
  0x31   :  { %523 = vmatpush1.bf16.msra.mxu0 %v1948_v43  ;;  %542 = vmatprep.mubr.bf16.mxu0 %v2417_v0 }
  0x32   :  { %564 = vmatpush1.bf16.msra.mxu1 %v1952_v44  ;;  %524 = vmatprep.subr.bf16.mxu0 %v1954_v45 }
  0x33   :  { %565 = vmatprep.subr.bf16.mxu1 %v1957_v46  ;;  %583 = vmatprep.mubr.bf16.mxu1 %v2417_v0 }
  0x35   :  { %525 = vmatpush1.bf16.msra.mxu0 %v1962_v47 }
  0x36   :  { %566 = vmatpush1.bf16.msra.mxu1 %v1967_v48  ;;  %627 = vmatprep.subr.bf16.mxu0 %v1843_v8 }
  0x37   :  { %668 = vmatprep.subr.bf16.mxu1 %v1845_v9 }
  0x38   :  { %543 = vmatmul.mubr.bf16.vlgmr.msra.gmra.mrb[16].mxu0 %v1785_v49 }
  0x39   :  { %584 = vmatmul.mubr.bf16.vlgmr.msra.gmra.mrb[16].mxu1 %v1785_v49  ;;  %628 = vmatpush1.bf16.msra.mxu0 %v1847_v10 }
  0x3a   :  { %669 = vmatpush1.bf16.msra.mxu1 %v1849_v11  ;;  %629 = vmatprep.subr.bf16.mxu0 %v1852_v12 }
  0x3b   :  { %670 = vmatprep.subr.bf16.mxu1 %v1856_v13  ;;  %659 = vmatprep.mubr.bf16.mxu0 %v2417_v0 }
  0x3c   :  { %700 = vmatprep.mubr.bf16.mxu1 %v2417_v0 }
  0x3d   :  { %630 = vmatpush1.bf16.msra.mxu0 %v1860_v14 }
  0x3e   :  { %671 = vmatpush1.bf16.msra.mxu1 %v1862_v15  ;;  %631 = vmatprep.subr.bf16.mxu0 %v1874_v18 }
  0x3f   :  { %672 = vmatprep.subr.bf16.mxu1 %v1877_v20 }
  0x41   :  { %632 = vmatpush1.bf16.msra.mxu0 %v1879_v21 }
  0x42   :  { %673 = vmatpush1.bf16.msra.mxu1 %v1882_v22  ;;  %633 = vmatprep.subr.bf16.mxu0 %v1886_v23 }
  0x43   :  { %674 = vmatprep.subr.bf16.mxu1 %v1889_v24 }
  0x45   :  { %634 = vmatpush1.bf16.msra.mxu0 %v1891_v25 }
  0x46   :  { %675 = vmatpush1.bf16.msra.mxu1 %v1905_v28  ;;  %635 = vmatprep.subr.bf16.mxu0 %v1907_v29 }
  0x47   :  { %676 = vmatprep.subr.bf16.mxu1 %v1911_v30 }
  0x49   :  { %636 = vmatpush1.bf16.msra.mxu0 %v1914_v32 }
  0x4a   :  { %677 = vmatpush1.bf16.msra.mxu1 %v1916_v33  ;;  %637 = vmatprep.subr.bf16.mxu0 %v1920_v34 }
  0x4b   :  { %678 = vmatprep.subr.bf16.mxu1 %v1923_v35 }
  0x4d   :  { %638 = vmatpush1.bf16.msra.mxu0 %v1927_v36 }
  0x4e   :  { %679 = vmatpush1.bf16.msra.mxu1 %v1929_v37  ;;  %639 = vmatprep.subr.bf16.mxu0 %v1941_v40 }
  0x4f   :  { %680 = vmatprep.subr.bf16.mxu1 %v1945_v41 }
  0x51   :  { %640 = vmatpush1.bf16.msra.mxu0 %v1948_v43 }
  0x52   :  { %681 = vmatpush1.bf16.msra.mxu1 %v1952_v44  ;;  %641 = vmatprep.subr.bf16.mxu0 %v1954_v45 }
  0x53   :  { %682 = vmatprep.subr.bf16.mxu1 %v1957_v46 }
  0x55   :  { %642 = vmatpush1.bf16.msra.mxu0 %v1962_v47 }
  0x56   :  { %683 = vmatpush1.bf16.msra.mxu1 %v1967_v48  ;;  %745 = vmatprep.subr.bf16.mxu0 %v1843_v8 }
  0x57   :  { %786 = vmatprep.subr.bf16.mxu1 %v1845_v9 }
  0xeb   :  { %v2014_v58 = vpop.f32.mrb[0].mxu0  ;;  %v2016_v59 = vpop.f32.mrb[0].mxu1 }
  0xec   :  { %v169_v62 = vpop.f32.mrb[1].mxu0  ;;  %v242_v63 = vpop.f32.mrb[1].mxu1 }
  0xed   :  { %v171_v2 = vpop.f32.mrb[2].mxu0  ;;  %v244_v3 = vpop.f32.mrb[2].mxu1 }
  0xee   :  { %v2020_v4 = vadd.f32 %v171_v2, %v63_v61  ;;  %v173_v5 = vpop.f32.mrb[3].mxu0  ;;  %v2023_v6 = vadd.f32 %v244_v3, %v2012_v57  ;;  %v246_v7 = vpop.f32.mrb[3].mxu1 }
  0xef   :  { %v2025_v16 = vadd.f32 %v173_v5, %v67_v1  ;;  %v2028_v17 = vadd.f32 %v246_v7, %v2018_v60 }
  0xf3   :  { %v177_v19 = vpop.f32.mrb[4].mxu0  ;;  %v250_v26 = vpop.f32.mrb[4].mxu1 }
  0xf4   :  { %v2030_v27 = vadd.f32 %v177_v19, %v63_v61  ;;  %v179_v31 = vpop.f32.mrb[5].mxu0  ;;  %v2033_v38 = vadd.f32 %v250_v26, %v2012_v57  ;;  %v252_v39 = vpop.f32.mrb[5].mxu1 }
  0xf5   :  { %v2035_v42 = vadd.f32 %v179_v31, %v67_v1  ;;  %v181_v49 = vpop.f32.mrb[6].mxu0  ;;  %v2038_v50 = vadd.f32 %v252_v39, %v2018_v60  ;;  %v254_v51 = vpop.f32.mrb[6].mxu1 }
  0xf6   :  { %v2040_v52 = vadd.f32 %v181_v49, %v63_v61  ;;  %v183_v53 = vpop.f32.mrb[7].mxu0  ;;  %v2043_v54 = vadd.f32 %v254_v51, %v2012_v57  ;;  %v256_v55 = vpop.f32.mrb[7].mxu1 }
  0xf7   :  { %2419 = vst [vmem:[#allocation8_spill] sm:$0xff] %v2038_v50  ;;  %v2045_v56 = vadd.f32 %v183_v53, %v67_v1  ;;  %v2048_v2 = vadd.f32 %v256_v55, %v2018_v60 }
  0xf8   :  { %2420 = vst [vmem:[#allocation9_spill] sm:$0xff] %v2040_v52  ;;  %2421 = vst [vmem:[#allocation10_spill] sm:$0xff] %v2043_v54 }
  0xf9   :  { %2422 = vst [vmem:[#allocation11_spill] sm:$0xff] %v2045_v56  ;;  %2423 = vst [vmem:[#allocation12_spill] sm:$0xff] %v2048_v2 }
  0xfb   :  { %v187_v3 = vpop.f32.mrb[8].mxu0  ;;  %v260_v5 = vpop.f32.mrb[8].mxu1 }
  0xfc   :  { %v2050_v7 = vadd.f32 %v187_v3, %v63_v61  ;;  %v189_v19 = vpop.f32.mrb[9].mxu0  ;;  %v2053_v26 = vadd.f32 %v260_v5, %v2012_v57  ;;  %v262_v31 = vpop.f32.mrb[9].mxu1 }
  0xfd   :  { %v2055_v39 = vadd.f32 %v189_v19, %v67_v1  ;;  %v191_v49 = vpop.f32.mrb[10].mxu0  ;;  %v2058_v51 = vadd.f32 %v262_v31, %v2018_v60  ;;  %v264_v53 = vpop.f32.mrb[10].mxu1 }
  0xfe   :  { %2424 = vst [vmem:[#allocation13_spill] sm:$0xff] %v2050_v7  ;;  %2425 = vst [vmem:[#allocation14_spill] sm:$0xff] %v2053_v26  ;;  %v2060_v0 = vadd.f32 %v191_v49, %v63_v61  ;;  %v193_v55 = vpop.f32.mrb[11].mxu0  ;;  %v2063_v2 = vadd.f32 %v264_v53, %v2012_v57  ;;  %v266_v3 = vpop.f32.mrb[11].mxu1 }
  0xff   :  { %2426 = vst [vmem:[#allocation15_spill] sm:$0xff] %v2055_v39  ;;  %2427 = vst [vmem:[#allocation16_spill] sm:$0xff] %v2058_v51  ;;  %v2065_v7 = vadd.f32 %v193_v55, %v67_v1  ;;  %v2068_v5 = vadd.f32 %v266_v3, %v2018_v60 }
 0x100   :  { %2428 = vst [vmem:[#allocation17_spill] sm:$0xff] %v2060_v0  ;;  %2429 = vst [vmem:[#allocation18_spill] sm:$0xff] %v2063_v2 }
 0x101   :  { %2430 = vst [vmem:[#allocation19_spill] sm:$0xff] %v2065_v7  ;;  %2431 = vst [vmem:[#allocation20_spill] sm:$0xff] %v2068_v5 }
 0x103   :  { %v197_v26 = vpop.f32.mrb[12].mxu0  ;;  %v270_v19 = vpop.f32.mrb[12].mxu1 }
 0x104   :  { %v2070_v39 = vadd.f32 %v197_v26, %v63_v61  ;;  %v199_v56 = vpop.f32.mrb[13].mxu0  ;;  %v2073_v31 = vadd.f32 %v270_v19, %v2012_v57  ;;  %v272_v49 = vpop.f32.mrb[13].mxu1 }
 0x105   :  { %v2075_v0 = vadd.f32 %v199_v56, %v67_v1  ;;  %v201_v51 = vpop.f32.mrb[14].mxu0  ;;  %v2078_v53 = vadd.f32 %v272_v49, %v2018_v60  ;;  %v274_v55 = vpop.f32.mrb[14].mxu1  ;;  %v168_v56 = vadd.f32 %v2014_v58, %v63_v61  ;;  %v241_v49 = vadd.f32 %v2016_v59, %v2012_v57 }
 0x106   :  { %2432 = vst [vmem:[#allocation21_spill] sm:$0xff] %v2070_v39  ;;  %2433 = vst [vmem:[#allocation22_spill] sm:$0xff] %v2073_v31  ;;  %v2080_v7 = vadd.f32 %v201_v51, %v63_v61  ;;  %v203_v3 = vpop.f32.mrb[15].mxu0  ;;  %v2083_v5 = vadd.f32 %v274_v55, %v2012_v57  ;;  %v276_v26 = vpop.f32.mrb[15].mxu1  ;;  %v243_v51 = vadd.f32 %v242_v63, %v2018_v60 }
 0x107   :  { %2434 = vst [vmem:[#allocation23_spill] sm:$0xff] %v2075_v0  ;;  %2435 = vst [vmem:[#allocation24_spill] sm:$0xff] %v2078_v53  ;;  %v2085_v39 = vadd.f32 %v203_v3, %v67_v1  ;;  %v2088_v19 = vadd.f32 %v276_v26, %v2018_v60  ;;  %v170_v0 = vadd.f32 %v169_v62, %v67_v1 }
 0x108   :  { %2436 = vst [vmem:[#allocation25_spill] sm:$0xff] %v2080_v7  ;;  %2437 = vst [vmem:[#allocation26_spill] sm:$0xff] %v2083_v5 }
 0x109   :  { %2438 = vst [vmem:[#allocation27_spill] sm:$0xff] %v2085_v39  ;;  %2439 = vst [vmem:[#allocation28_spill] sm:$0xff] %v2088_v19 }
 0x10b   :  { %v544_v53 = vpop.f32.mrb[16].mxu0 }
 0x10c   :  { %v592_v7 = vadd.f32 %v544_v53, %v168_v56  ;;  %v585_v31 = vpop.f32.mrb[16].mxu1  ;;  %v546_v2 = vpop.f32.mrb[17].mxu0 }
 0x10d   :  { %v594_v55 = vadd.f32 %v585_v31, %v241_v49  ;;  %v593_v5 = vadd.f32 %v546_v2, %v170_v0  ;;  %v587_v54 = vpop.f32.mrb[17].mxu1  ;;  %v548_v3 = vpop.f32.mrb[18].mxu0 }
 0x10e   :  { %v1503_v39 = vmul.f32 -1.442695, %v592_v7  ;;  %v595_v52 = vadd.f32 %v587_v54, %v243_v51  ;;  %v549_v26 = vpop.f32.mrb[19].mxu0  ;;  %v589_v19 = vpop.f32.mrb[18].mxu1 }
 0x10f   :  { %v1504_v50 = vmul.f32 -1.442695, %v593_v5  ;;  %v590_v58 = vpop.f32.mrb[19].mxu1  ;;  %v2440_v19 = vmov 0  }
 0x110   :  { %1597 = vpow2.f32 %v1503_v39  ;;  %v1505_v61 = vmul.f32 -1.442695, %v595_v52 }
 0x111   :  { %1599 = vpow2.f32 %v1504_v50 }
 0x112   :  { %1601 = vpow2.f32 %v1505_v61 }
 0x113   :  { %1603 = vtanh.f32 %v594_v55 }
 0x11a   :  { %v1598_v57 = vpop.eup %1597 }
 0x11b   :  { %v1600_v59 = vpop.eup %1599  ;;  %v599_v62 = vadd.f32 1.0, %v1598_v57 }
 0x11c   :  { %v605_v60 = vadd.f32 1.0, %v1600_v59  ;;  %v1602_v0 = vpop.eup %1601 }
 0x11d   :  { %1605 = vrcp.f32 %v599_v62  ;;  %v1604_v63 = vpop.eup %1603  ;;  %v612_v7 = vadd.f32 1.0, %v1602_v0 }
 0x11e   :  { %1607 = vrcp.f32 %v605_v60 }
 0x11f   :  { %1609 = vrcp.f32 %v612_v7 }
 0x127   :  { %v1606_v1 = vpop.eup %1605 }
 0x128   :  { %v1608_v2 = vpop.eup %1607  ;;  %v616_v54 = vmul.f32 %v1606_v1, %v1604_v63 }
 0x129   :  { %v615_v31 = vmul.f32 0.0, %v1608_v2  ;;  %v1610_v50 = vpop.eup %1609 }
 0x12b   :  { %v2094_v5 = vadd.f32 %v616_v54, %v615_v31 }
 0x12d   :  { %1611 = vtanh.f32 %v2094_v5 }
 0x137   :  { %v1612_v52 = vpop.eup %1611 }
 0x138   :  { %v619_v39 = vmul.f32 %v1612_v52, %v1610_v50 }
 0x13a   :  { %v620_v53 = vpack.c.bf16 %v619_v39, %v619_v39 }
 0x13c   :  { %621 = vst [vmem:[%s2416_s4] sm:$0xf] %v620_v53  ;;  %660 = vmatmul.mubr.bf16.vlgmr.msra.gmra.mrb[20].mxu0 %v620_v53  ;;  %701 = vmatmul.mubr.bf16.vlgmr.msra.gmra.mrb[20].mxu1 %v620_v53 }
 0x13d   :  { %746 = vmatpush1.bf16.msra.mxu0 %v1847_v10  ;;  %787 = vmatpush1.bf16.msra.mxu1 %v1849_v11 }
 0x13e   :  { %747 = vmatprep.subr.bf16.mxu0 %v1852_v12  ;;  %788 = vmatprep.subr.bf16.mxu1 %v1856_v13 }
 0x13f   :  { %777 = vmatprep.mubr.bf16.mxu0 %v2440_v19  ;;  %818 = vmatprep.mubr.bf16.mxu1 %v2440_v19 }
 0x141   :  { %748 = vmatpush1.bf16.msra.mxu0 %v1860_v14  ;;  %789 = vmatpush1.bf16.msra.mxu1 %v1862_v15 }
 0x142   :  { %749 = vmatprep.subr.bf16.mxu0 %v1874_v18  ;;  %790 = vmatprep.subr.bf16.mxu1 %v1877_v20 }
 0x145   :  { %750 = vmatpush1.bf16.msra.mxu0 %v1879_v21  ;;  %791 = vmatpush1.bf16.msra.mxu1 %v1882_v22 }
 0x146   :  { %751 = vmatprep.subr.bf16.mxu0 %v1886_v23  ;;  %792 = vmatprep.subr.bf16.mxu1 %v1889_v24 }
 0x149   :  { %752 = vmatpush1.bf16.msra.mxu0 %v1891_v25  ;;  %793 = vmatpush1.bf16.msra.mxu1 %v1905_v28 }
 0x14a   :  { %753 = vmatprep.subr.bf16.mxu0 %v1907_v29  ;;  %794 = vmatprep.subr.bf16.mxu1 %v1911_v30 }
 0x14d   :  { %754 = vmatpush1.bf16.msra.mxu0 %v1914_v32  ;;  %795 = vmatpush1.bf16.msra.mxu1 %v1916_v33 }
 0x14e   :  { %755 = vmatprep.subr.bf16.mxu0 %v1920_v34  ;;  %796 = vmatprep.subr.bf16.mxu1 %v1923_v35 }
 0x151   :  { %756 = vmatpush1.bf16.msra.mxu0 %v1927_v36  ;;  %797 = vmatpush1.bf16.msra.mxu1 %v1929_v37 }
 0x152   :  { %757 = vmatprep.subr.bf16.mxu0 %v1941_v40  ;;  %798 = vmatprep.subr.bf16.mxu1 %v1945_v41 }
 0x155   :  { %758 = vmatpush1.bf16.msra.mxu0 %v1948_v43  ;;  %799 = vmatpush1.bf16.msra.mxu1 %v1952_v44 }
 0x156   :  { %759 = vmatprep.subr.bf16.mxu0 %v1954_v45  ;;  %800 = vmatprep.subr.bf16.mxu1 %v1957_v46 }
 0x159   :  { %760 = vmatpush1.bf16.msra.mxu0 %v1962_v47  ;;  %801 = vmatpush1.bf16.msra.mxu1 %v1967_v48 }
 0x15a   :  { %863 = vmatprep.subr.bf16.mxu0 %v1843_v8  ;;  %904 = vmatprep.subr.bf16.mxu1 %v1845_v9 }
 0x20f   :  { %v661_v56 = vpop.f32.mrb[20].mxu0  ;;  %v702_v49 = vpop.f32.mrb[20].mxu1 }
 0x210   :  { %v709_v51 = vadd.f32 %v661_v56, %v2020_v4  ;;  %v711_v55 = vadd.f32 %v702_v49, %v2023_v6  ;;  %v663_v3 = vpop.f32.mrb[21].mxu0  ;;  %v704_v26 = vpop.f32.mrb[21].mxu1 }
 0x211   :  { %v710_v58 = vadd.f32 %v663_v3, %v2025_v16  ;;  %v712_v61 = vadd.f32 %v704_v26, %v2028_v17  ;;  %v665_v57 = vpop.f32.mrb[22].mxu0  ;;  %v706_v59 = vpop.f32.mrb[22].mxu1 }
 0x212   :  { %v1506_v62 = vmul.f32 -1.442695, %v709_v51  ;;  %v666_v60 = vpop.f32.mrb[23].mxu0  ;;  %v707_v0 = vpop.f32.mrb[23].mxu1 }
 0x213   :  { %v1507_v63 = vmul.f32 -1.442695, %v710_v58  ;;  %v1508_v1 = vmul.f32 -1.442695, %v712_v61 }
 0x214   :  { %1613 = vpow2.f32 %v1506_v62  ;;  %v2441_v62 = vld [vmem:[#allocation8_spill] sm:$0xff] }
 0x215   :  { %1615 = vpow2.f32 %v1507_v63 }
 0x216   :  { %1617 = vpow2.f32 %v1508_v1 }
 0x217   :  { %1619 = vtanh.f32 %v711_v55 }
 0x21e   :  { %v1614_v2 = vpop.eup %1613 }
 0x21f   :  { %v1616_v54 = vpop.eup %1615  ;;  %v716_v4 = vadd.f32 1.0, %v1614_v2 }
 0x220   :  { %v722_v6 = vadd.f32 1.0, %v1616_v54  ;;  %v1618_v16 = vpop.eup %1617 }
 0x221   :  { %1621 = vrcp.f32 %v716_v4  ;;  %v1620_v7 = vpop.eup %1619  ;;  %v729_v52 = vadd.f32 1.0, %v1618_v16 }
 0x222   :  { %1623 = vrcp.f32 %v722_v6 }
 0x223   :  { %1625 = vrcp.f32 %v729_v52 }
 0x22b   :  { %v1622_v17 = vpop.eup %1621 }
 0x22c   :  { %v1624_v31 = vpop.eup %1623  ;;  %v733_v50 = vmul.f32 %v1622_v17, %v1620_v7 }
 0x22d   :  { %v732_v39 = vmul.f32 %v1624_v31, %v2094_v5  ;;  %v1626_v56 = vpop.eup %1625 }
 0x22f   :  { %v2139_v53 = vadd.f32 %v733_v50, %v732_v39 }
 0x231   :  { %1627 = vtanh.f32 %v2139_v53 }
 0x23b   :  { %v1628_v49 = vpop.eup %1627 }
 0x23c   :  { %v736_v51 = vmul.f32 %v1628_v49, %v1626_v56 }
 0x23e   :  { %v737_v55 = vpack.c.bf16 %v736_v51, %v736_v51 }
 0x240   :  { %1509 = vst [vmem:[%s2416_s4 + $0x4] sm:$0xf] %v737_v55  ;;  %778 = vmatmul.mubr.bf16.vlgmr.msra.gmra.mrb[24].mxu0 %v737_v55  ;;  %819 = vmatmul.mubr.bf16.vlgmr.msra.gmra.mrb[24].mxu1 %v737_v55 }
 0x241   :  { %864 = vmatpush1.bf16.msra.mxu0 %v1847_v10  ;;  %905 = vmatpush1.bf16.msra.mxu1 %v1849_v11 }
 0x242   :  { %865 = vmatprep.subr.bf16.mxu0 %v1852_v12  ;;  %906 = vmatprep.subr.bf16.mxu1 %v1856_v13 }
 0x243   :  { %895 = vmatprep.mubr.bf16.mxu0 %v2440_v19  ;;  %936 = vmatprep.mubr.bf16.mxu1 %v2440_v19 }
 0x245   :  { %866 = vmatpush1.bf16.msra.mxu0 %v1860_v14  ;;  %907 = vmatpush1.bf16.msra.mxu1 %v1862_v15 }
 0x246   :  { %867 = vmatprep.subr.bf16.mxu0 %v1874_v18  ;;  %908 = vmatprep.subr.bf16.mxu1 %v1877_v20 }
 0x249   :  { %868 = vmatpush1.bf16.msra.mxu0 %v1879_v21  ;;  %909 = vmatpush1.bf16.msra.mxu1 %v1882_v22 }
 0x24a   :  { %869 = vmatprep.subr.bf16.mxu0 %v1886_v23  ;;  %910 = vmatprep.subr.bf16.mxu1 %v1889_v24 }
 0x24d   :  { %870 = vmatpush1.bf16.msra.mxu0 %v1891_v25  ;;  %911 = vmatpush1.bf16.msra.mxu1 %v1905_v28 }
 0x24e   :  { %871 = vmatprep.subr.bf16.mxu0 %v1907_v29  ;;  %912 = vmatprep.subr.bf16.mxu1 %v1911_v30 }
 0x251   :  { %872 = vmatpush1.bf16.msra.mxu0 %v1914_v32  ;;  %913 = vmatpush1.bf16.msra.mxu1 %v1916_v33 }
 0x252   :  { %873 = vmatprep.subr.bf16.mxu0 %v1920_v34  ;;  %914 = vmatprep.subr.bf16.mxu1 %v1923_v35 }
 0x255   :  { %874 = vmatpush1.bf16.msra.mxu0 %v1927_v36  ;;  %915 = vmatpush1.bf16.msra.mxu1 %v1929_v37 }
 0x256   :  { %875 = vmatprep.subr.bf16.mxu0 %v1941_v40  ;;  %916 = vmatprep.subr.bf16.mxu1 %v1945_v41 }
 0x259   :  { %876 = vmatpush1.bf16.msra.mxu0 %v1948_v43  ;;  %917 = vmatpush1.bf16.msra.mxu1 %v1952_v44 }
 0x25a   :  { %877 = vmatprep.subr.bf16.mxu0 %v1954_v45  ;;  %918 = vmatprep.subr.bf16.mxu1 %v1957_v46 }
 0x25d   :  { %878 = vmatpush1.bf16.msra.mxu0 %v1962_v47  ;;  %919 = vmatpush1.bf16.msra.mxu1 %v1967_v48 }
 0x25e   :  { %981 = vmatprep.subr.bf16.mxu0 %v1843_v8  ;;  %1022 = vmatprep.subr.bf16.mxu1 %v1845_v9 }
 0x313   :  { %v779_v5 = vpop.f32.mrb[24].mxu0  ;;  %v820_v3 = vpop.f32.mrb[24].mxu1 }
 0x314   :  { %v827_v26 = vadd.f32 %v779_v5, %v2030_v27  ;;  %v829_v58 = vadd.f32 %v820_v3, %v2033_v38  ;;  %v781_v61 = vpop.f32.mrb[25].mxu0  ;;  %v822_v57 = vpop.f32.mrb[25].mxu1 }
 0x315   :  { %v828_v59 = vadd.f32 %v781_v61, %v2035_v42  ;;  %v830_v60 = vadd.f32 %v822_v57, %v2441_v62  ;;  %v783_v0 = vpop.f32.mrb[26].mxu0  ;;  %v824_v63 = vpop.f32.mrb[26].mxu1  ;;  %v2443_v57 = vld [vmem:[#allocation10_spill] sm:$0xff] }
 0x316   :  { %v1510_v1 = vmul.f32 -1.442695, %v827_v26  ;;  %v784_v2 = vpop.f32.mrb[27].mxu0  ;;  %v825_v54 = vpop.f32.mrb[27].mxu1  ;;  %v2444_v0 = vld [vmem:[#allocation11_spill] sm:$0xff] }
 0x317   :  { %v1511_v4 = vmul.f32 -1.442695, %v828_v59  ;;  %v1512_v6 = vmul.f32 -1.442695, %v830_v60 }
 0x318   :  { %1629 = vpow2.f32 %v1510_v1  ;;  %v2445_v1 = vld [vmem:[#allocation12_spill] sm:$0xff] }
 0x319   :  { %1631 = vpow2.f32 %v1511_v4 }
 0x31a   :  { %1633 = vpow2.f32 %v1512_v6 }
 0x31b   :  { %1635 = vtanh.f32 %v829_v58  ;;  %v2442_v58 = vld [vmem:[#allocation9_spill] sm:$0xff] }
 0x322   :  { %v1630_v16 = vpop.eup %1629 }
 0x323   :  { %v1632_v7 = vpop.eup %1631  ;;  %v834_v27 = vadd.f32 1.0, %v1630_v16 }
 0x324   :  { %v840_v38 = vadd.f32 1.0, %v1632_v7  ;;  %v1634_v42 = vpop.eup %1633 }
 0x325   :  { %1637 = vrcp.f32 %v834_v27  ;;  %v1636_v17 = vpop.eup %1635  ;;  %v847_v39 = vadd.f32 1.0, %v1634_v42 }
 0x326   :  { %1639 = vrcp.f32 %v840_v38 }
 0x327   :  { %1641 = vrcp.f32 %v847_v39 }
 0x32f   :  { %v1638_v31 = vpop.eup %1637 }
 0x330   :  { %v1640_v50 = vpop.eup %1639  ;;  %v851_v52 = vmul.f32 %v1638_v31, %v1636_v17 }
 0x331   :  { %v850_v56 = vmul.f32 %v1640_v50, %v2139_v53  ;;  %v1642_v51 = vpop.eup %1641 }
 0x333   :  { %v2184_v49 = vadd.f32 %v851_v52, %v850_v56 }
 0x335   :  { %1643 = vtanh.f32 %v2184_v49 }
 0x33f   :  { %v1644_v55 = vpop.eup %1643 }
 0x340   :  { %v854_v5 = vmul.f32 %v1644_v55, %v1642_v51 }
 0x342   :  { %v855_v3 = vpack.c.bf16 %v854_v5, %v854_v5 }
 0x344   :  { %1513 = vst [vmem:[%s2416_s4 + $0x8] sm:$0xf] %v855_v3  ;;  %896 = vmatmul.mubr.bf16.vlgmr.msra.gmra.mrb[28].mxu0 %v855_v3  ;;  %937 = vmatmul.mubr.bf16.vlgmr.msra.gmra.mrb[28].mxu1 %v855_v3 }
 0x345   :  { %982 = vmatpush1.bf16.msra.mxu0 %v1847_v10  ;;  %1023 = vmatpush1.bf16.msra.mxu1 %v1849_v11 }
 0x346   :  { %983 = vmatprep.subr.bf16.mxu0 %v1852_v12  ;;  %1024 = vmatprep.subr.bf16.mxu1 %v1856_v13 }
 0x347   :  { %1013 = vmatprep.mubr.bf16.mxu0 %v2440_v19  ;;  %1054 = vmatprep.mubr.bf16.mxu1 %v2440_v19 }
 0x349   :  { %984 = vmatpush1.bf16.msra.mxu0 %v1860_v14  ;;  %1025 = vmatpush1.bf16.msra.mxu1 %v1862_v15 }
 0x34a   :  { %985 = vmatprep.subr.bf16.mxu0 %v1874_v18  ;;  %1026 = vmatprep.subr.bf16.mxu1 %v1877_v20 }
 0x34d   :  { %986 = vmatpush1.bf16.msra.mxu0 %v1879_v21  ;;  %1027 = vmatpush1.bf16.msra.mxu1 %v1882_v22 }
 0x34e   :  { %987 = vmatprep.subr.bf16.mxu0 %v1886_v23  ;;  %1028 = vmatprep.subr.bf16.mxu1 %v1889_v24 }
 0x351   :  { %988 = vmatpush1.bf16.msra.mxu0 %v1891_v25  ;;  %1029 = vmatpush1.bf16.msra.mxu1 %v1905_v28 }
 0x352   :  { %989 = vmatprep.subr.bf16.mxu0 %v1907_v29  ;;  %1030 = vmatprep.subr.bf16.mxu1 %v1911_v30 }
 0x355   :  { %990 = vmatpush1.bf16.msra.mxu0 %v1914_v32  ;;  %1031 = vmatpush1.bf16.msra.mxu1 %v1916_v33 }
 0x356   :  { %991 = vmatprep.subr.bf16.mxu0 %v1920_v34  ;;  %1032 = vmatprep.subr.bf16.mxu1 %v1923_v35 }
 0x359   :  { %992 = vmatpush1.bf16.msra.mxu0 %v1927_v36  ;;  %1033 = vmatpush1.bf16.msra.mxu1 %v1929_v37 }
 0x35a   :  { %993 = vmatprep.subr.bf16.mxu0 %v1941_v40  ;;  %1034 = vmatprep.subr.bf16.mxu1 %v1945_v41 }
 0x35d   :  { %994 = vmatpush1.bf16.msra.mxu0 %v1948_v43  ;;  %1035 = vmatpush1.bf16.msra.mxu1 %v1952_v44 }
 0x35e   :  { %995 = vmatprep.subr.bf16.mxu0 %v1954_v45  ;;  %1036 = vmatprep.subr.bf16.mxu1 %v1957_v46 }
 0x361   :  { %996 = vmatpush1.bf16.msra.mxu0 %v1962_v47  ;;  %1037 = vmatpush1.bf16.msra.mxu1 %v1967_v48 }
 0x362   :  { %1099 = vmatprep.subr.bf16.mxu0 %v1843_v8  ;;  %1140 = vmatprep.subr.bf16.mxu1 %v1845_v9 }
 0x417   :  { %v897_v53 = vpop.f32.mrb[28].mxu0  ;;  %v938_v26 = vpop.f32.mrb[28].mxu1 }
 0x418   :  { %v945_v61 = vadd.f32 %v897_v53, %v2442_v58  ;;  %v947_v59 = vadd.f32 %v938_v26, %v2443_v57  ;;  %v899_v62 = vpop.f32.mrb[29].mxu0  ;;  %v940_v60 = vpop.f32.mrb[29].mxu1 }
 0x419   :  { %v946_v63 = vadd.f32 %v899_v62, %v2444_v0  ;;  %v948_v2 = vadd.f32 %v940_v60, %v2445_v1  ;;  %v901_v54 = vpop.f32.mrb[30].mxu0  ;;  %v942_v4 = vpop.f32.mrb[30].mxu1 }
 0x41a   :  { %v1514_v6 = vmul.f32 -1.442695, %v945_v61  ;;  %v902_v16 = vpop.f32.mrb[31].mxu0  ;;  %v943_v7 = vpop.f32.mrb[31].mxu1 }
 0x41b   :  { %v1515_v8 = vmul.f32 -1.442695, %v946_v63  ;;  %v1516_v9 = vmul.f32 -1.442695, %v948_v2 }
 0x41c   :  { %1645 = vpow2.f32 %v1514_v6 }
 0x41d   :  { %1647 = vpow2.f32 %v1515_v8  ;;  %v2284_v8 = vld [vmem:[#allocation5] ss:$16 sps:$4 sm:$0xff]  }
 0x41e   :  { %1649 = vpow2.f32 %v1516_v9  ;;  %v2287_v9 = vld [vmem:[#allocation5 + $0x8] ss:$16 sps:$4 sm:$0xff]  }
 0x41f   :  { %1651 = vtanh.f32 %v947_v59 }
 0x426   :  { %v1646_v27 = vpop.eup %1645 }
 0x427   :  { %v1648_v38 = vpop.eup %1647  ;;  %v952_v42 = vadd.f32 1.0, %v1646_v27  ;;  %v2290_v27 = vld [vmem:[#allocation5 + $0x24] ss:$16 sps:$4 sm:$0xff]  }
 0x428   :  { %v958_v17 = vadd.f32 1.0, %v1648_v38  ;;  %v1650_v31 = vpop.eup %1649  ;;  %v2293_v38 = vld [vmem:[#allocation5 + $0x2c] ss:$16 sps:$4 sm:$0xff]  }
 0x429   :  { %1653 = vrcp.f32 %v952_v42  ;;  %v1652_v50 = vpop.eup %1651  ;;  %v965_v51 = vadd.f32 1.0, %v1650_v31  ;;  %v2298_v42 = vld [vmem:[#allocation5 + $0x20] ss:$16 sps:$4 sm:$0xff]   ;;  %v2304_v31 = vld [vmem:[#allocation5 + $0x44] ss:$16 sps:$4 sm:$0xff]  }
 0x42a   :  { %1655 = vrcp.f32 %v958_v17  ;;  %v2301_v17 = vld [vmem:[#allocation5 + $0x28] ss:$16 sps:$4 sm:$0xff]  }
 0x42b   :  { %1657 = vrcp.f32 %v965_v51  ;;  %v2319_v51 = vld [vmem:[#allocation5 + $0x6c] ss:$16 sps:$4 sm:$0xff]  }
 0x433   :  { %v1654_v52 = vpop.eup %1653 }
 0x434   :  { %v1656_v39 = vpop.eup %1655  ;;  %v969_v56 = vmul.f32 %v1654_v52, %v1652_v50  ;;  %v2307_v50 = vld [vmem:[#allocation5 + $0x4c] ss:$16 sps:$4 sm:$0xff]   ;;  %v2310_v52 = vld [vmem:[#allocation5 + $0x40] ss:$16 sps:$4 sm:$0xff]  }
 0x435   :  { %v968_v55 = vmul.f32 %v1656_v39, %v2184_v49  ;;  %v1658_v3 = vpop.eup %1657  ;;  %v2313_v39 = vld [vmem:[#allocation5 + $0x48] ss:$16 sps:$4 sm:$0xff]  }
 0x437   :  { %v2229_v5 = vadd.f32 %v969_v56, %v968_v55  ;;  %v2316_v56 = vld [vmem:[#allocation5 + $0x64] ss:$16 sps:$4 sm:$0xff]   ;;  %v2322_v55 = vld [vmem:[#allocation5 + $0x60] ss:$16 sps:$4 sm:$0xff]  }
 0x439   :  { %1659 = vtanh.f32 %v2229_v5 }
 0x443   :  { %v1660_v53 = vpop.eup %1659 }
 0x444   :  { %v972_v26 = vmul.f32 %v1660_v53, %v1658_v3  ;;  %v2328_v3 = vld [vmem:[#allocation5 + $0x84] ss:$16 sps:$4 sm:$0xff]   ;;  %v2331_v53 = vld [vmem:[#allocation5 + $0x8c] ss:$16 sps:$4 sm:$0xff]  }
 0x446   :  { %v973_v58 = vpack.c.bf16 %v972_v26, %v972_v26  ;;  %v2334_v26 = vld [vmem:[#allocation5 + $0x80] ss:$16 sps:$4 sm:$0xff]  }
 0x448   :  { %1517 = vst [vmem:[%s2416_s4 + $0xc] sm:$0xf] %v973_v58  ;;  %1014 = vmatmul.mubr.bf16.vlgmr.msra.gmra.mrb[32].mxu0 %v973_v58  ;;  %1055 = vmatmul.mubr.bf16.vlgmr.msra.gmra.mrb[32].mxu1 %v973_v58  ;;  %v2337_v58 = vld [vmem:[#allocation5 + $0x88] ss:$16 sps:$4 sm:$0xff]  }
 0x449   :  { %1100 = vmatpush1.bf16.msra.mxu0 %v1847_v10  ;;  %1141 = vmatpush1.bf16.msra.mxu1 %v1849_v11  ;;  %v2267_v10 = vld [vmem:[#allocation5 + $0x4] ss:$16 sps:$4 sm:$0xff]   ;;  %v2270_v11 = vld [vmem:[#allocation5 + $0xc] ss:$16 sps:$4 sm:$0xff]  }
 0x44a   :  { %1101 = vmatprep.subr.bf16.mxu0 %v1852_v12  ;;  %1142 = vmatprep.subr.bf16.mxu1 %v1856_v13 }
 0x44b   :  { %1131 = vmatprep.mubr.bf16.mxu0 %v2440_v19  ;;  %1172 = vmatprep.mubr.bf16.mxu1 %v2440_v19 }
 0x44d   :  { %1102 = vmatpush1.bf16.msra.mxu0 %v1860_v14  ;;  %1143 = vmatpush1.bf16.msra.mxu1 %v1862_v15  ;;  %v2446_v14 = vld [vmem:[#allocation13_spill] sm:$0xff] }
 0x44e   :  { %1103 = vmatprep.subr.bf16.mxu0 %v1874_v18  ;;  %1144 = vmatprep.subr.bf16.mxu1 %v1877_v20  ;;  %v2447_v18 = vld [vmem:[#allocation14_spill] sm:$0xff] }
 0x451   :  { %1104 = vmatpush1.bf16.msra.mxu0 %v1879_v21  ;;  %1145 = vmatpush1.bf16.msra.mxu1 %v1882_v22 }
 0x452   :  { %1105 = vmatprep.subr.bf16.mxu0 %v1886_v23  ;;  %1146 = vmatprep.subr.bf16.mxu1 %v1889_v24  ;;  %v2448_v23 = vld [vmem:[#allocation15_spill] sm:$0xff] }
 0x455   :  { %1106 = vmatpush1.bf16.msra.mxu0 %v1891_v25  ;;  %1147 = vmatpush1.bf16.msra.mxu1 %v1905_v28  ;;  %v2449_v25 = vld [vmem:[#allocation16_spill] sm:$0xff] }
 0x456   :  { %1107 = vmatprep.subr.bf16.mxu0 %v1907_v29  ;;  %1148 = vmatprep.subr.bf16.mxu1 %v1911_v30 }
 0x459   :  { %1108 = vmatpush1.bf16.msra.mxu0 %v1914_v32  ;;  %1149 = vmatpush1.bf16.msra.mxu1 %v1916_v33 }
 0x45a   :  { %1109 = vmatprep.subr.bf16.mxu0 %v1920_v34  ;;  %1150 = vmatprep.subr.bf16.mxu1 %v1923_v35 }
 0x45d   :  { %1110 = vmatpush1.bf16.msra.mxu0 %v1927_v36  ;;  %1151 = vmatpush1.bf16.msra.mxu1 %v1929_v37 }
 0x45e   :  { %1111 = vmatprep.subr.bf16.mxu0 %v1941_v40  ;;  %1152 = vmatprep.subr.bf16.mxu1 %v1945_v41 }
 0x461   :  { %1112 = vmatpush1.bf16.msra.mxu0 %v1948_v43  ;;  %1153 = vmatpush1.bf16.msra.mxu1 %v1952_v44 }
 0x462   :  { %1113 = vmatprep.subr.bf16.mxu0 %v1954_v45  ;;  %1154 = vmatprep.subr.bf16.mxu1 %v1957_v46 }
 0x465   :  { %1114 = vmatpush1.bf16.msra.mxu0 %v1962_v47  ;;  %1155 = vmatpush1.bf16.msra.mxu1 %v1967_v48 }
 0x466   :  { %1217 = vmatprep.subr.bf16.mxu0 %v2267_v10  ;;  %1258 = vmatprep.subr.bf16.mxu1 %v2270_v11 }
 0x51b   :  { %v1015_v12 = vpop.f32.mrb[32].mxu0  ;;  %v1056_v13 = vpop.f32.mrb[32].mxu1 }
 0x51c   :  { %v1063_v15 = vadd.f32 %v1015_v12, %v2446_v14  ;;  %v1065_v20 = vadd.f32 %v1056_v13, %v2447_v18  ;;  %v1017_v21 = vpop.f32.mrb[33].mxu0  ;;  %v1058_v22 = vpop.f32.mrb[33].mxu1  ;;  %v2340_v12 = vld [vmem:[#allocation5 + $0xa4] ss:$16 sps:$4 sm:$0xff]   ;;  %v2343_v13 = vld [vmem:[#allocation5 + $0xac] ss:$16 sps:$4 sm:$0xff]  }
 0x51d   :  { %v1064_v24 = vadd.f32 %v1017_v21, %v2448_v23  ;;  %v1066_v28 = vadd.f32 %v1058_v22, %v2449_v25  ;;  %v1019_v29 = vpop.f32.mrb[34].mxu0  ;;  %v1060_v30 = vpop.f32.mrb[34].mxu1  ;;  %v2346_v14 = vld [vmem:[#allocation5 + $0xa0] ss:$16 sps:$4 sm:$0xff]   ;;  %v2452_v23 = vld [vmem:[#allocation19_spill] sm:$0xff] }
 0x51e   :  { %v1518_v32 = vmul.f32 -1.442695, %v1063_v15  ;;  %v1020_v33 = vpop.f32.mrb[35].mxu0  ;;  %v1061_v34 = vpop.f32.mrb[35].mxu1  ;;  %v2349_v15 = vld [vmem:[#allocation5 + $0xa8] ss:$16 sps:$4 sm:$0xff]  }
 0x51f   :  { %v1519_v35 = vmul.f32 -1.442695, %v1064_v24  ;;  %v1520_v36 = vmul.f32 -1.442695, %v1066_v28  ;;  %v2451_v21 = vld [vmem:[#allocation18_spill] sm:$0xff]  ;;  %v2453_v24 = vld [vmem:[#allocation20_spill] sm:$0xff] }
 0x520   :  { %1661 = vpow2.f32 %v1518_v32 }
 0x521   :  { %1663 = vpow2.f32 %v1519_v35 }
 0x522   :  { %1665 = vpow2.f32 %v1520_v36 }
 0x523   :  { %1667 = vtanh.f32 %v1065_v20  ;;  %v2450_v20 = vld [vmem:[#allocation17_spill] sm:$0xff] }
 0x52a   :  { %v1662_v37 = vpop.eup %1661 }
 0x52b   :  { %v1664_v49 = vpop.eup %1663  ;;  %v1070_v61 = vadd.f32 1.0, %v1662_v37 }
 0x52c   :  { %v1076_v57 = vadd.f32 1.0, %v1664_v49  ;;  %v1666_v59 = vpop.eup %1665 }
 0x52d   :  { %1669 = vrcp.f32 %v1070_v61  ;;  %v1668_v62 = vpop.eup %1667  ;;  %v1083_v1 = vadd.f32 1.0, %v1666_v59 }
 0x52e   :  { %1671 = vrcp.f32 %v1076_v57 }
 0x52f   :  { %1673 = vrcp.f32 %v1083_v1 }
 0x537   :  { %v1670_v60 = vpop.eup %1669 }
 0x538   :  { %v1672_v0 = vpop.eup %1671  ;;  %v1087_v63 = vmul.f32 %v1670_v60, %v1668_v62 }
 0x539   :  { %v1086_v2 = vmul.f32 %v1672_v0, %v2229_v5  ;;  %v1674_v4 = vpop.eup %1673  ;;  %v2325_v5 = vld [vmem:[#allocation5 + $0x68] ss:$16 sps:$4 sm:$0xff]  }
 0x53b   :  { %v2278_v54 = vadd.f32 %v1087_v63, %v1086_v2  ;;  %v1750_v2 = vld [vmem:[#allocation5 + $0xcc] ss:$16 sps:$4 sm:$0xff]  }
 0x53d   :  { %1675 = vtanh.f32 %v2278_v54 }
 0x547   :  { %v1676_v6 = vpop.eup %1675 }
 0x548   :  { %v1090_v16 = vmul.f32 %v1676_v6, %v1674_v4  ;;  %v1752_v4 = vld [vmem:[#allocation5 + $0xc8] ss:$16 sps:$4 sm:$0xff]   ;;  %v1753_v6 = vld [vmem:[#allocation5 + $0xe4] ss:$16 sps:$4 sm:$0xff]  }
 0x54a   :  { %v1091_v7 = vpack.c.bf16 %v1090_v16, %v1090_v16  ;;  %v1754_v16 = vld [vmem:[#allocation5 + $0xec] ss:$16 sps:$4 sm:$0xff]  }
 0x54c   :  { %1521 = vst [vmem:[%s2416_s4 + $0x10] sm:$0xf] %v1091_v7  ;;  %1132 = vmatmul.mubr.bf16.vlgmr.msra.gmra.mrb[36].mxu0 %v1091_v7  ;;  %1173 = vmatmul.mubr.bf16.vlgmr.msra.gmra.mrb[36].mxu1 %v1091_v7  ;;  %v1755_v7 = vld [vmem:[#allocation5 + $0xe0] ss:$16 sps:$4 sm:$0xff]  }
 0x54d   :  { %1218 = vmatpush1.bf16.msra.mxu0 %v2284_v8  ;;  %1259 = vmatpush1.bf16.msra.mxu1 %v2287_v9 }
 0x54e   :  { %1219 = vmatprep.subr.bf16.mxu0 %v2290_v27  ;;  %1260 = vmatprep.subr.bf16.mxu1 %v2293_v38 }
 0x54f   :  { %1249 = vmatprep.mubr.bf16.mxu0 %v2440_v19  ;;  %1290 = vmatprep.mubr.bf16.mxu1 %v2440_v19 }
 0x551   :  { %1220 = vmatpush1.bf16.msra.mxu0 %v2298_v42  ;;  %1261 = vmatpush1.bf16.msra.mxu1 %v2301_v17 }
 0x552   :  { %1221 = vmatprep.subr.bf16.mxu0 %v2304_v31  ;;  %1262 = vmatprep.subr.bf16.mxu1 %v2307_v50 }
 0x555   :  { %1222 = vmatpush1.bf16.msra.mxu0 %v2310_v52  ;;  %1263 = vmatpush1.bf16.msra.mxu1 %v2313_v39 }
 0x556   :  { %1223 = vmatprep.subr.bf16.mxu0 %v2316_v56  ;;  %1264 = vmatprep.subr.bf16.mxu1 %v2319_v51 }
 0x559   :  { %1224 = vmatpush1.bf16.msra.mxu0 %v2322_v55  ;;  %1265 = vmatpush1.bf16.msra.mxu1 %v2325_v5 }
 0x55a   :  { %1225 = vmatprep.subr.bf16.mxu0 %v2328_v3  ;;  %1266 = vmatprep.subr.bf16.mxu1 %v2331_v53 }
 0x55d   :  { %1226 = vmatpush1.bf16.msra.mxu0 %v2334_v26  ;;  %1267 = vmatpush1.bf16.msra.mxu1 %v2337_v58 }
 0x55e   :  { %1227 = vmatprep.subr.bf16.mxu0 %v2340_v12  ;;  %1268 = vmatprep.subr.bf16.mxu1 %v2343_v13 }
 0x561   :  { %1228 = vmatpush1.bf16.msra.mxu0 %v2346_v14  ;;  %1269 = vmatpush1.bf16.msra.mxu1 %v2349_v15 }
 0x562   :  { %1229 = vmatprep.subr.bf16.mxu0 %v1941_v40  ;;  %1270 = vmatprep.subr.bf16.mxu1 %v1945_v41 }
 0x565   :  { %1230 = vmatpush1.bf16.msra.mxu0 %v1948_v43  ;;  %1271 = vmatpush1.bf16.msra.mxu1 %v1952_v44 }
 0x566   :  { %1231 = vmatprep.subr.bf16.mxu0 %v1954_v45  ;;  %1272 = vmatprep.subr.bf16.mxu1 %v1957_v46 }
 0x569   :  { %1232 = vmatpush1.bf16.msra.mxu0 %v1962_v47  ;;  %1273 = vmatpush1.bf16.msra.mxu1 %v1967_v48 }
 0x56a   :  { %1335 = vmatprep.subr.bf16.mxu0 %v2267_v10  ;;  %1376 = vmatprep.subr.bf16.mxu1 %v2270_v11 }
 0x61f   :  { %v1133_v18 = vpop.f32.mrb[36].mxu0  ;;  %v1174_v40 = vpop.f32.mrb[36].mxu1 }
 0x620   :  { %v1181_v41 = vadd.f32 %v1133_v18, %v2450_v20  ;;  %v1183_v43 = vadd.f32 %v1174_v40, %v2451_v21  ;;  %v1135_v22 = vpop.f32.mrb[37].mxu0  ;;  %v1176_v44 = vpop.f32.mrb[37].mxu1 }
 0x621   :  { %v1182_v45 = vadd.f32 %v1135_v22, %v2452_v23  ;;  %v1184_v46 = vadd.f32 %v1176_v44, %v2453_v24  ;;  %v1137_v25 = vpop.f32.mrb[38].mxu0  ;;  %v1178_v47 = vpop.f32.mrb[38].mxu1 }
 0x622   :  { %v1522_v28 = vmul.f32 -1.442695, %v1181_v41  ;;  %v1138_v48 = vpop.f32.mrb[39].mxu0  ;;  %v1179_v29 = vpop.f32.mrb[39].mxu1 }
 0x623   :  { %v1523_v10 = vmul.f32 -1.442695, %v1182_v45  ;;  %v1524_v11 = vmul.f32 -1.442695, %v1184_v46  ;;  %v2458_v29 = vld [vmem:[#allocation25_spill] sm:$0xff] }
 0x624   :  { %1677 = vpow2.f32 %v1522_v28 }
 0x625   :  { %1679 = vpow2.f32 %v1523_v10 }
 0x626   :  { %1681 = vpow2.f32 %v1524_v11  ;;  %v2459_v11 = vld [vmem:[#allocation26_spill] sm:$0xff] }
 0x627   :  { %1683 = vtanh.f32 %v1183_v43 }
 0x62e   :  { %v1678_v30 = vpop.eup %1677 }
 0x62f   :  { %v1680_v32 = vpop.eup %1679  ;;  %v1188_v33 = vadd.f32 1.0, %v1678_v30 }
 0x630   :  { %v1194_v34 = vadd.f32 1.0, %v1680_v32  ;;  %v1682_v35 = vpop.eup %1681 }
 0x631   :  { %1685 = vrcp.f32 %v1188_v33  ;;  %v1684_v36 = vpop.eup %1683  ;;  %v1201_v57 = vadd.f32 1.0, %v1682_v35 }
 0x632   :  { %1687 = vrcp.f32 %v1194_v34  ;;  %v2460_v34 = vld [vmem:[#allocation27_spill] sm:$0xff] }
 0x633   :  { %1689 = vrcp.f32 %v1201_v57 }
 0x63b   :  { %v1686_v37 = vpop.eup %1685 }
 0x63c   :  { %v1688_v49 = vpop.eup %1687  ;;  %v1205_v61 = vmul.f32 %v1686_v37, %v1684_v36  ;;  %v2461_v36 = vld [vmem:[#allocation28_spill] sm:$0xff] }
 0x63d   :  { %v1204_v59 = vmul.f32 %v1688_v49, %v2278_v54  ;;  %v1690_v60 = vpop.eup %1689  ;;  %v1751_v54 = vld [vmem:[#allocation5 + $0xc0] ss:$16 sps:$4 sm:$0xff]  }
 0x63f   :  { %v2367_v62 = vadd.f32 %v1205_v61, %v1204_v59 }
 0x641   :  { %1691 = vtanh.f32 %v2367_v62 }
 0x64b   :  { %v1692_v0 = vpop.eup %1691 }
 0x64c   :  { %v1208_v63 = vmul.f32 %v1692_v0, %v1690_v60 }
 0x64e   :  { %v1209_v1 = vpack.c.bf16 %v1208_v63, %v1208_v63 }
 0x650   :  { %1525 = vst [vmem:[%s2416_s4 + $0x14] sm:$0xf] %v1209_v1  ;;  %1250 = vmatmul.mubr.bf16.vlgmr.msra.gmra.mrb[40].mxu0 %v1209_v1  ;;  %1291 = vmatmul.mubr.bf16.vlgmr.msra.gmra.mrb[40].mxu1 %v1209_v1 }
 0x651   :  { %1336 = vmatpush1.bf16.msra.mxu0 %v2284_v8  ;;  %1377 = vmatpush1.bf16.msra.mxu1 %v2287_v9  ;;  %v1756_v8 = vld [vmem:[#allocation5 + $0xe8] ss:$16 sps:$4 sm:$0xff]  }
 0x652   :  { %1337 = vmatprep.subr.bf16.mxu0 %v2290_v27  ;;  %1378 = vmatprep.subr.bf16.mxu1 %v2293_v38  ;;  %v2454_v38 = vld [vmem:[#allocation21_spill] sm:$0xff] }
 0x653   :  { %1367 = vmatprep.mubr.bf16.mxu0 %v2440_v19  ;;  %1408 = vmatprep.mubr.bf16.mxu1 %v2440_v19  ;;  %v1749_v19 = vld [vmem:[#allocation5 + $0xc4] ss:$16 sps:$4 sm:$0xff]  }
 0x655   :  { %1338 = vmatpush1.bf16.msra.mxu0 %v2298_v42  ;;  %1379 = vmatpush1.bf16.msra.mxu1 %v2301_v17  ;;  %v2455_v17 = vld [vmem:[#allocation22_spill] sm:$0xff] }
 0x656   :  { %1339 = vmatprep.subr.bf16.mxu0 %v2304_v31  ;;  %1380 = vmatprep.subr.bf16.mxu1 %v2307_v50 }
 0x659   :  { %1340 = vmatpush1.bf16.msra.mxu0 %v2310_v52  ;;  %1381 = vmatpush1.bf16.msra.mxu1 %v2313_v39  ;;  %v2456_v39 = vld [vmem:[#allocation23_spill] sm:$0xff] }
 0x65a   :  { %1341 = vmatprep.subr.bf16.mxu0 %v2316_v56  ;;  %1382 = vmatprep.subr.bf16.mxu1 %v2319_v51  ;;  %v2457_v51 = vld [vmem:[#allocation24_spill] sm:$0xff] }
 0x65d   :  { %1342 = vmatpush1.bf16.msra.mxu0 %v2322_v55  ;;  %1383 = vmatpush1.bf16.msra.mxu1 %v2325_v5 }
 0x65e   :  { %1343 = vmatprep.subr.bf16.mxu0 %v2328_v3  ;;  %1384 = vmatprep.subr.bf16.mxu1 %v2331_v53 }
 0x661   :  { %1344 = vmatpush1.bf16.msra.mxu0 %v2334_v26  ;;  %1385 = vmatpush1.bf16.msra.mxu1 %v2337_v58 }
 0x662   :  { %1345 = vmatprep.subr.bf16.mxu0 %v2340_v12  ;;  %1386 = vmatprep.subr.bf16.mxu1 %v2343_v13 }
 0x665   :  { %1346 = vmatpush1.bf16.msra.mxu0 %v2346_v14  ;;  %1387 = vmatpush1.bf16.msra.mxu1 %v2349_v15 }
 0x666   :  { %1347 = vmatprep.subr.bf16.mxu0 %v1749_v19  ;;  %1388 = vmatprep.subr.bf16.mxu1 %v1750_v2 }
 0x669   :  { %1348 = vmatpush1.bf16.msra.mxu0 %v1751_v54  ;;  %1389 = vmatpush1.bf16.msra.mxu1 %v1752_v4 }
 0x66a   :  { %1349 = vmatprep.subr.bf16.mxu0 %v1753_v6  ;;  %1390 = vmatprep.subr.bf16.mxu1 %v1754_v16 }
 0x66d   :  { %1350 = vmatpush1.bf16.msra.mxu0 %v1755_v7  ;;  %1391 = vmatpush1.bf16.msra.mxu1 %v1756_v8 }
 0x723   :  { %v1251_v9 = vpop.f32.mrb[40].mxu0  ;;  %v1292_v27 = vpop.f32.mrb[40].mxu1 }
 0x724   :  { %v1299_v42 = vadd.f32 %v1251_v9, %v2454_v38  ;;  %v1301_v31 = vadd.f32 %v1292_v27, %v2455_v17  ;;  %v1253_v50 = vpop.f32.mrb[41].mxu0  ;;  %v1294_v52 = vpop.f32.mrb[41].mxu1 }
 0x725   :  { %v1300_v56 = vadd.f32 %v1253_v50, %v2456_v39  ;;  %v1302_v55 = vadd.f32 %v1294_v52, %v2457_v51  ;;  %v1255_v5 = vpop.f32.mrb[42].mxu0  ;;  %v1296_v3 = vpop.f32.mrb[42].mxu1 }
 0x726   :  { %v1526_v53 = vmul.f32 -1.442695, %v1299_v42  ;;  %v1256_v26 = vpop.f32.mrb[43].mxu0  ;;  %v1297_v58 = vpop.f32.mrb[43].mxu1 }
 0x727   :  { %v1527_v12 = vmul.f32 -1.442695, %v1300_v56  ;;  %v1528_v13 = vmul.f32 -1.442695, %v1302_v55 }
 0x728   :  { %1693 = vpow2.f32 %v1526_v53 }
 0x729   :  { %1695 = vpow2.f32 %v1527_v12 }
 0x72a   :  { %1697 = vpow2.f32 %v1528_v13 }
 0x72b   :  { %1699 = vtanh.f32 %v1301_v31 }
 0x732   :  { %v1694_v14 = vpop.eup %1693 }
 0x733   :  { %v1696_v15 = vpop.eup %1695  ;;  %v1306_v18 = vadd.f32 1.0, %v1694_v14 }
 0x734   :  { %v1312_v40 = vadd.f32 1.0, %v1696_v15  ;;  %v1698_v20 = vpop.eup %1697 }
 0x735   :  { %1701 = vrcp.f32 %v1306_v18  ;;  %v1700_v41 = vpop.eup %1699  ;;  %v1319_v44 = vadd.f32 1.0, %v1698_v20 }
 0x736   :  { %1703 = vrcp.f32 %v1312_v40 }
 0x737   :  { %1705 = vrcp.f32 %v1319_v44 }
 0x73f   :  { %v1702_v21 = vpop.eup %1701 }
 0x740   :  { %v1704_v43 = vpop.eup %1703  ;;  %v1323_v22 = vmul.f32 %v1702_v21, %v1700_v41 }
 0x741   :  { %v1322_v23 = vmul.f32 %v1704_v43, %v2367_v62  ;;  %v1706_v24 = vpop.eup %1705 }
 0x743   :  { %v1324_v45 = vadd.f32 %v1323_v22, %v1322_v23 }
 0x745   :  { %1707 = vtanh.f32 %v1324_v45 }
 0x74f   :  { %v1708_v46 = vpop.eup %1707 }
 0x750   :  { %v1326_v25 = vmul.f32 %v1708_v46, %v1706_v24 }
 0x752   :  { %v1327_v47 = vpack.c.bf16 %v1326_v25, %v1326_v25 }
 0x754   :  { %1529 = vst [vmem:[%s2416_s4 + $0x18] sm:$0xf] %v1327_v47  ;;  %1368 = vmatmul.mubr.bf16.vlgmr.msra.gmra.mrb[44].mxu0 %v1327_v47  ;;  %1409 = vmatmul.mubr.bf16.vlgmr.msra.gmra.mrb[44].mxu1 %v1327_v47 }
 0x827   :  { %v1369_v28 = vpop.f32.mrb[44].mxu0  ;;  %v1410_v48 = vpop.f32.mrb[44].mxu1 }
 0x828   :  { %v1417_v10 = vadd.f32 %v1369_v28, %v2458_v29  ;;  %v1419_v30 = vadd.f32 %v1410_v48, %v2459_v11  ;;  %v1371_v32 = vpop.f32.mrb[45].mxu0  ;;  %v1412_v33 = vpop.f32.mrb[45].mxu1 }
 0x829   :  { %v1418_v35 = vadd.f32 %v1371_v32, %v2460_v34  ;;  %v1420_v37 = vadd.f32 %v1412_v33, %v2461_v36  ;;  %v1373_v49 = vpop.f32.mrb[46].mxu0  ;;  %v1414_v61 = vpop.f32.mrb[46].mxu1 }
 0x82a   :  { %v1530_v57 = vmul.f32 -1.442695, %v1417_v10  ;;  %v1374_v59 = vpop.f32.mrb[47].mxu0  ;;  %v1415_v62 = vpop.f32.mrb[47].mxu1 }
 0x82b   :  { %v1531_v60 = vmul.f32 -1.442695, %v1418_v35  ;;  %v1532_v0 = vmul.f32 -1.442695, %v1420_v37 }
 0x82c   :  { %1709 = vpow2.f32 %v1530_v57 }
 0x82d   :  { %1711 = vpow2.f32 %v1531_v60 }
 0x82e   :  { %1713 = vpow2.f32 %v1532_v0 }
 0x82f   :  { %1715 = vtanh.f32 %v1419_v30 }
 0x836   :  { %v1710_v63 = vpop.eup %1709 }
 0x837   :  { %v1712_v1 = vpop.eup %1711  ;;  %v1424_v19 = vadd.f32 1.0, %v1710_v63 }
 0x838   :  { %v1430_v2 = vadd.f32 1.0, %v1712_v1  ;;  %v1714_v54 = vpop.eup %1713 }
 0x839   :  { %1717 = vrcp.f32 %v1424_v19  ;;  %v1716_v4 = vpop.eup %1715  ;;  %v1437_v8 = vadd.f32 1.0, %v1714_v54 }
 0x83a   :  { %1719 = vrcp.f32 %v1430_v2 }
 0x83b   :  { %1721 = vrcp.f32 %v1437_v8 }
 0x843   :  { %v1718_v6 = vpop.eup %1717 }
 0x844   :  { %v1720_v16 = vpop.eup %1719  ;;  %v1441_v7 = vmul.f32 %v1718_v6, %v1716_v4 }
 0x845   :  { %v1440_v9 = vmul.f32 %v1720_v16, %v1324_v45  ;;  %v1722_v38 = vpop.eup %1721 }
 0x847   :  { %v1442_v27 = vadd.f32 %v1441_v7, %v1440_v9 }
 0x849   :  { %1723 = vtanh.f32 %v1442_v27 }
 0x853   :  { %v1724_v42 = vpop.eup %1723 }
 0x854   :  { %v1444_v17 = vmul.f32 %v1724_v42, %v1722_v38 }
 0x856   :  { %v1445_v31 = vpack.c.bf16 %v1444_v17, %v1444_v17 }
 0x858   :  { %1533 = vst [vmem:[%s2416_s4 + $0x1c] sm:$0xf] %v1445_v31 }
 0x859   :  { %1454 = vsyncpa [#allocation6], 1 }

// kernel: lstm_forward.3
= control target key start
LH: loop header
LB: loop body
LE: loop exit
PB: predicated region body
PF: predicated region fallthrough
CT: control target
= control target key end

     0   :  { %v2989_v1 = vmov 0   ;;  %vm2103_vm0 = vmmov 0   ;;  %vm1692_vm1 = vcmask 72704   ;;  %s2982_s1 = inlined_call_operand.vmem [shape: bf16[128,512], index: 1, kind: input, shape index: {}]   ;;  %s2983_s0 = inlined_call_operand.vmem [shape: bf16[8,8,128], index: 0, kind: input, shape index: {}]   ;;  %s2984_s2 = inlined_call_operand.vmem [shape: bf16[128,512], index: 2, kind: input, shape index: {}]   ;;  %s2985_s3 = inlined_call_operand.vmem [shape: f32[1,512], index: 3, kind: input, shape index: {}]   ;;  %s2986_s4 = inlined_call_operand.vmem [shape: bf16[128,9], index: 4, kind: input, shape index: {}]   ;;  %s2987_s5 = inlined_call_operand.vmem [shape: f32[1,9], index: 5, kind: input, shape index: {}]   ;;  %s2988_s6 = inlined_call_operand.vmem [shape: f32[8,9], index: 6, kind: output, shape index: {}]  }
   0x1   :  { %v1832_v0 = vld [vmem:[%s2982_s1 + $0x4] ss:$16 sps:$4 sm:$0xff]   ;;  %308 = vmatprep.mubr.bf16.mxu0 %v2989_v1  ;;  %381 = vmatprep.mubr.bf16.mxu1 %v2989_v1  ;;  %v1834_v2 = vld [vmem:[%s2982_s1 + $0xc] ss:$16 sps:$4 sm:$0xff]   ;;  %v1836_v3 = vld [vmem:[%s2982_s1] ss:$16 sps:$4 sm:$0xff]  }
   0x2   :  { %276 = vmatprep.subr.bf16.mxu0 %v1832_v0  ;;  %v1837_v4 = vld [vmem:[%s2982_s1 + $0x8] ss:$16 sps:$4 sm:$0xff]   ;;  %349 = vmatprep.subr.bf16.mxu1 %v1834_v2  ;;  %v1838_v5 = vld [vmem:[%s2982_s1 + $0x24] ss:$16 sps:$4 sm:$0xff]   ;;  %v1840_v6 = vld [vmem:[%s2982_s1 + $0x2c] ss:$16 sps:$4 sm:$0xff]  }
   0x3   :  { %277 = vmatpush1.bf16.msra.mxu0 %v1836_v3  ;;  %350 = vmatpush1.bf16.msra.mxu1 %v1837_v4  ;;  %v1842_v7 = vld [vmem:[%s2982_s1 + $0x20] ss:$16 sps:$4 sm:$0xff]   ;;  %v1843_v8 = vld [vmem:[%s2982_s1 + $0x28] ss:$16 sps:$4 sm:$0xff]   ;;  %v1844_v9 = vld [vmem:[%s2982_s1 + $0x44] ss:$16 sps:$4 sm:$0xff]  }
   0x4   :  { %278 = vmatprep.subr.bf16.mxu0 %v1838_v5  ;;  %351 = vmatprep.subr.bf16.mxu1 %v1840_v6  ;;  %v1846_v10 = vld [vmem:[%s2982_s1 + $0x4c] ss:$16 sps:$4 sm:$0xff]   ;;  %v1848_v11 = vld [vmem:[%s2982_s1 + $0x40] ss:$16 sps:$4 sm:$0xff]   ;;  %v1849_v12 = vld [vmem:[%s2982_s1 + $0x48] ss:$16 sps:$4 sm:$0xff]  }
   0x5   :  { %v1850_v13 = vld [vmem:[%s2982_s1 + $0x64] ss:$16 sps:$4 sm:$0xff]   ;;  %v1852_v14 = vld [vmem:[%s2982_s1 + $0x6c] ss:$16 sps:$4 sm:$0xff]   ;;  %v1854_v15 = vld [vmem:[%s2982_s1 + $0x60] ss:$16 sps:$4 sm:$0xff]  }
   0x6   :  { %v1855_v16 = vld [vmem:[%s2982_s1 + $0x68] ss:$16 sps:$4 sm:$0xff]   ;;  %v1856_v17 = vld [vmem:[%s2982_s1 + $0x84] ss:$16 sps:$4 sm:$0xff]   ;;  %v1858_v18 = vld [vmem:[%s2982_s1 + $0x8c] ss:$16 sps:$4 sm:$0xff]  }
   0x7   :  { %279 = vmatpush1.bf16.msra.mxu0 %v1842_v7  ;;  %352 = vmatpush1.bf16.msra.mxu1 %v1843_v8  ;;  %v1860_v19 = vld [vmem:[%s2982_s1 + $0x80] ss:$16 sps:$4 sm:$0xff]   ;;  %v1861_v20 = vld [vmem:[%s2982_s1 + $0x88] ss:$16 sps:$4 sm:$0xff]   ;;  %v1862_v21 = vld [vmem:[%s2982_s1 + $0xa4] ss:$16 sps:$4 sm:$0xff]   ;;  %v72_v7 = vlaneseq }
   0x8   :  { %280 = vmatprep.subr.bf16.mxu0 %v1844_v9  ;;  %353 = vmatprep.subr.bf16.mxu1 %v1846_v10  ;;  %v1864_v22 = vld [vmem:[%s2982_s1 + $0xac] ss:$16 sps:$4 sm:$0xff]   ;;  %v1866_v23 = vld [vmem:[%s2982_s1 + $0xa0] ss:$16 sps:$4 sm:$0xff]   ;;  %v1867_v24 = vld [vmem:[%s2982_s1 + $0xa8] ss:$16 sps:$4 sm:$0xff]  }
   0x9   :  { %v1868_v25 = vld [vmem:[%s2982_s1 + $0xc4] ss:$16 sps:$4 sm:$0xff]   ;;  %v1870_v26 = vld [vmem:[%s2982_s1 + $0xcc] ss:$16 sps:$4 sm:$0xff]   ;;  %v1872_v27 = vld [vmem:[%s2982_s1 + $0xc0] ss:$16 sps:$4 sm:$0xff]  }
   0xa   :  { %v1873_v28 = vld [vmem:[%s2982_s1 + $0xc8] ss:$16 sps:$4 sm:$0xff]   ;;  %v1874_v29 = vld [vmem:[%s2982_s1 + $0xe4] ss:$16 sps:$4 sm:$0xff]   ;;  %v1876_v30 = vld [vmem:[%s2982_s1 + $0xec] ss:$16 sps:$4 sm:$0xff]  }
   0xb   :  { %281 = vmatpush1.bf16.msra.mxu0 %v1848_v11  ;;  %354 = vmatpush1.bf16.msra.mxu1 %v1849_v12  ;;  %v1878_v31 = vld [vmem:[%s2982_s1 + $0xe0] ss:$16 sps:$4 sm:$0xff]   ;;  %v1879_v32 = vld [vmem:[%s2982_s1 + $0xe8] ss:$16 sps:$4 sm:$0xff]   ;;  %v2240_v33 = vld [vmem:[%s2984_s2 + $0x4] ss:$16 sps:$4 sm:$0xff]  }
   0xc   :  { %282 = vmatprep.subr.bf16.mxu0 %v1850_v13  ;;  %355 = vmatprep.subr.bf16.mxu1 %v1852_v14  ;;  %v2245_v34 = vld [vmem:[%s2984_s2 + $0xc] ss:$16 sps:$4 sm:$0xff]   ;;  %v1880_v35 = vld [vmem:[%s2983_s0] sm:$0xff]   ;;  %v2258_v37 = vld [vmem:[%s2984_s2 + $0x8] ss:$16 sps:$4 sm:$0xff]   ;;  %v2101_v6 = vmov 0.0|0.0  }
   0xd   :  { %v2253_v36 = vld [vmem:[%s2984_s2] ss:$16 sps:$4 sm:$0xff]   ;;  %v2265_v38 = vld [vmem:[%s2984_s2 + $0x24] ss:$16 sps:$4 sm:$0xff]   ;;  %v2270_v39 = vld [vmem:[%s2984_s2 + $0x2c] ss:$16 sps:$4 sm:$0xff]  }
   0xe   :  { %v2275_v40 = vld [vmem:[%s2984_s2 + $0x20] ss:$16 sps:$4 sm:$0xff]   ;;  %v2282_v41 = vld [vmem:[%s2984_s2 + $0x28] ss:$16 sps:$4 sm:$0xff]   ;;  %v2289_v42 = vld [vmem:[%s2984_s2 + $0x44] ss:$16 sps:$4 sm:$0xff]  }
   0xf   :  { %283 = vmatpush1.bf16.msra.mxu0 %v1854_v15  ;;  %356 = vmatpush1.bf16.msra.mxu1 %v1855_v16  ;;  %v2294_v43 = vld [vmem:[%s2984_s2 + $0x4c] ss:$16 sps:$4 sm:$0xff]   ;;  %v2304_v45 = vld [vmem:[%s2984_s2 + $0x40] ss:$16 sps:$4 sm:$0xff]   ;;  %v2309_v46 = vld [vmem:[%s2984_s2 + $0x48] ss:$16 sps:$4 sm:$0xff]  }
  0x10   :  { %284 = vmatprep.subr.bf16.mxu0 %v1856_v17  ;;  %357 = vmatprep.subr.bf16.mxu1 %v1858_v18  ;;  %v1893_v44 = vld [vmem:[%s2983_s0 + $0x8] sm:$0xff]   ;;  %v2316_v47 = vld [vmem:[%s2984_s2 + $0x64] ss:$16 sps:$4 sm:$0xff]   ;;  %v2328_v49 = vld [vmem:[%s2984_s2 + $0x60] ss:$16 sps:$4 sm:$0xff]   ;;  %v73_v8 = vshrl.u32 %v72_v7, 7 }
  0x11   :  { %v2323_v48 = vld [vmem:[%s2984_s2 + $0x6c] ss:$16 sps:$4 sm:$0xff]   ;;  %v2333_v50 = vld [vmem:[%s2984_s2 + $0x68] ss:$16 sps:$4 sm:$0xff]   ;;  %v2340_v51 = vld [vmem:[%s2984_s2 + $0x84] ss:$16 sps:$4 sm:$0xff]  }
  0x12   :  { %v2347_v52 = vld [vmem:[%s2984_s2 + $0x8c] ss:$16 sps:$4 sm:$0xff]   ;;  %v1906_v53 = vld [vmem:[%s2983_s0 + $0x10] sm:$0xff]   ;;  %v2364_v55 = vld [vmem:[%s2984_s2 + $0x88] ss:$16 sps:$4 sm:$0xff]   ;;  %v82_v9 = vsub.s32 2, %v73_v8 }
  0x13   :  { %285 = vmatpush1.bf16.msra.mxu0 %v1860_v19  ;;  %358 = vmatpush1.bf16.msra.mxu1 %v1861_v20  ;;  %v2359_v54 = vld [vmem:[%s2984_s2 + $0x80] ss:$16 sps:$4 sm:$0xff]   ;;  %v2371_v56 = vld [vmem:[%s2984_s2 + $0xa4] ss:$16 sps:$4 sm:$0xff]   ;;  %v2376_v57 = vld [vmem:[%s2984_s2 + $0xac] ss:$16 sps:$4 sm:$0xff]  }
  0x14   :  { %286 = vmatprep.subr.bf16.mxu0 %v1862_v21  ;;  %359 = vmatprep.subr.bf16.mxu1 %v1864_v22  ;;  %v2383_v58 = vld [vmem:[%s2984_s2 + $0xa0] ss:$16 sps:$4 sm:$0xff]   ;;  %v2388_v59 = vld [vmem:[%s2984_s2 + $0xa8] ss:$16 sps:$4 sm:$0xff]   ;;  %v2395_v60 = vld [vmem:[%s2984_s2 + $0xc4] ss:$16 sps:$4 sm:$0xff]  }
  0x15   :  { %v2400_v61 = vld [vmem:[%s2984_s2 + $0xcc] ss:$16 sps:$4 sm:$0xff]   ;;  %v2412_v63 = vld [vmem:[%s2984_s2 + $0xc0] ss:$16 sps:$4 sm:$0xff]   ;;  %v2417_v0 = vld [vmem:[%s2984_s2 + $0xc8] ss:$16 sps:$4 sm:$0xff]  }
  0x16   :  { %v1919_v62 = vld [vmem:[%s2983_s0 + $0x18] sm:$0xff]   ;;  %v2424_v2 = vld [vmem:[%s2984_s2 + $0xe4] ss:$16 sps:$4 sm:$0xff]   ;;  %v2436_v4 = vld [vmem:[%s2984_s2 + $0xe0] ss:$16 sps:$4 sm:$0xff]   ;;  %v86_v10 = vsub.s32 3, %v73_v8 }
  0x17   :  { %287 = vmatpush1.bf16.msra.mxu0 %v1866_v23  ;;  %360 = vmatpush1.bf16.msra.mxu1 %v1867_v24  ;;  %v2429_v3 = vld [vmem:[%s2984_s2 + $0xec] ss:$16 sps:$4 sm:$0xff]   ;;  %v2441_v5 = vld [vmem:[%s2984_s2 + $0xe8] ss:$16 sps:$4 sm:$0xff]   ;;  %v74_v11 = vsub.s32 0, %v73_v8  ;;  %v78_v13 = vsub.s32 1, %v73_v8 }
  0x18   :  { %288 = vmatprep.subr.bf16.mxu0 %v1868_v25  ;;  %361 = vmatprep.subr.bf16.mxu1 %v1870_v26  ;;  %v70_v12 = vld [vmem:[%s2985_s3] sm:$0xf] }
  0x19   :  { %v2488_v14 = vrot.slane %v70_v12, %v82_v9  ;;  %v2494_v17 = vrot.slane %v70_v12, %v86_v10  ;;  %v75_v18 = vrot.slane %v70_v12, %v74_v11  ;;  %v79_v21 = vrot.slane %v70_v12, %v78_v13 }
  0x1b   :  { %289 = vmatpush1.bf16.msra.mxu0 %v1872_v27  ;;  %362 = vmatpush1.bf16.msra.mxu1 %v1873_v28 }
  0x1c   :  { %290 = vmatprep.subr.bf16.mxu0 %v1874_v29  ;;  %363 = vmatprep.subr.bf16.mxu1 %v1876_v30 }
  0x1f   :  { %291 = vmatpush1.bf16.msra.mxu0 %v1878_v31  ;;  %364 = vmatpush1.bf16.msra.mxu1 %v1879_v32 }
  0x20   :  { %653 = vmatprep.subr.bf16.mxu0 %v2240_v33  ;;  %694 = vmatprep.subr.bf16.mxu1 %v2245_v34 }
  0x22   :  { %309 = vmatmul.mubr.bf16.vlgmr.msra.gmra.mrb[0].mxu0 %v1880_v35  ;;  %382 = vmatmul.mubr.bf16.vlgmr.msra.gmra.mrb[0].mxu1 %v1880_v35 }
  0x23   :  { %654 = vmatpush1.bf16.msra.mxu0 %v2253_v36  ;;  %695 = vmatpush1.bf16.msra.mxu1 %v2258_v37 }
  0x24   :  { %655 = vmatprep.subr.bf16.mxu0 %v2265_v38  ;;  %696 = vmatprep.subr.bf16.mxu1 %v2270_v39 }
  0x25   :  { %318 = vmatprep.mubr.bf16.mxu0 %v2989_v1  ;;  %391 = vmatprep.mubr.bf16.mxu1 %v2989_v1 }
  0x27   :  { %656 = vmatpush1.bf16.msra.mxu0 %v2275_v40  ;;  %697 = vmatpush1.bf16.msra.mxu1 %v2282_v41 }
  0x28   :  { %657 = vmatprep.subr.bf16.mxu0 %v2289_v42  ;;  %698 = vmatprep.subr.bf16.mxu1 %v2294_v43 }
  0x2a   :  { %319 = vmatmul.mubr.bf16.gmra.mrb[4].mxu0 %v1893_v44  ;;  %392 = vmatmul.mubr.bf16.gmra.mrb[4].mxu1 %v1893_v44 }
  0x2b   :  { %658 = vmatpush1.bf16.msra.mxu0 %v2304_v45  ;;  %699 = vmatpush1.bf16.msra.mxu1 %v2309_v46 }
  0x2c   :  { %659 = vmatprep.subr.bf16.mxu0 %v2316_v47  ;;  %700 = vmatprep.subr.bf16.mxu1 %v2323_v48 }
  0x2d   :  { %328 = vmatprep.mubr.bf16.mxu0 %v2989_v1  ;;  %401 = vmatprep.mubr.bf16.mxu1 %v2989_v1 }
  0x2f   :  { %660 = vmatpush1.bf16.msra.mxu0 %v2328_v49  ;;  %701 = vmatpush1.bf16.msra.mxu1 %v2333_v50 }
  0x30   :  { %661 = vmatprep.subr.bf16.mxu0 %v2340_v51  ;;  %702 = vmatprep.subr.bf16.mxu1 %v2347_v52 }
  0x32   :  { %329 = vmatmul.mubr.bf16.gmra.mrb[8].mxu0 %v1906_v53  ;;  %402 = vmatmul.mubr.bf16.gmra.mrb[8].mxu1 %v1906_v53 }
  0x33   :  { %662 = vmatpush1.bf16.msra.mxu0 %v2359_v54  ;;  %703 = vmatpush1.bf16.msra.mxu1 %v2364_v55 }
  0x34   :  { %663 = vmatprep.subr.bf16.mxu0 %v2371_v56  ;;  %704 = vmatprep.subr.bf16.mxu1 %v2376_v57 }
  0x35   :  { %338 = vmatprep.mubr.bf16.mxu0 %v2989_v1  ;;  %411 = vmatprep.mubr.bf16.mxu1 %v2989_v1 }
  0x37   :  { %664 = vmatpush1.bf16.msra.mxu0 %v2383_v58  ;;  %705 = vmatpush1.bf16.msra.mxu1 %v2388_v59 }
  0x38   :  { %665 = vmatprep.subr.bf16.mxu0 %v2395_v60  ;;  %706 = vmatprep.subr.bf16.mxu1 %v2400_v61 }
  0x3a   :  { %339 = vmatmul.mubr.bf16.gmra.mrb[12].mxu0 %v1919_v62  ;;  %412 = vmatmul.mubr.bf16.gmra.mrb[12].mxu1 %v1919_v62 }
  0x3b   :  { %666 = vmatpush1.bf16.msra.mxu0 %v2412_v63  ;;  %707 = vmatpush1.bf16.msra.mxu1 %v2417_v0 }
  0x3c   :  { %667 = vmatprep.subr.bf16.mxu0 %v2424_v2  ;;  %708 = vmatprep.subr.bf16.mxu1 %v2429_v3 }
  0x3d   :  { %685 = vmatprep.mubr.bf16.mxu0 %v2989_v1  ;;  %726 = vmatprep.mubr.bf16.mxu1 %v2989_v1 }
  0x3f   :  { %668 = vmatpush1.bf16.msra.mxu0 %v2436_v4  ;;  %709 = vmatpush1.bf16.msra.mxu1 %v2441_v5 }
  0x40   :  { %769 = vmatprep.subr.bf16.mxu0 %v2240_v33  ;;  %810 = vmatprep.subr.bf16.mxu1 %v2245_v34 }
  0x42   :  { %686 = vmatmul.mubr.bf16.vlgmr.msra.gmra.mrb[16].mxu0 %v2101_v6  ;;  %727 = vmatmul.mubr.bf16.vlgmr.msra.gmra.mrb[16].mxu1 %v2101_v6 }
  0x43   :  { %770 = vmatpush1.bf16.msra.mxu0 %v2253_v36  ;;  %811 = vmatpush1.bf16.msra.mxu1 %v2258_v37 }
  0x44   :  { %771 = vmatprep.subr.bf16.mxu0 %v2265_v38  ;;  %812 = vmatprep.subr.bf16.mxu1 %v2270_v39 }
  0x45   :  { %801 = vmatprep.mubr.bf16.mxu0 %v2989_v1  ;;  %842 = vmatprep.mubr.bf16.mxu1 %v2989_v1 }
  0x47   :  { %772 = vmatpush1.bf16.msra.mxu0 %v2275_v40  ;;  %813 = vmatpush1.bf16.msra.mxu1 %v2282_v41 }
  0x48   :  { %773 = vmatprep.subr.bf16.mxu0 %v2289_v42  ;;  %814 = vmatprep.subr.bf16.mxu1 %v2294_v43 }
  0x4b   :  { %774 = vmatpush1.bf16.msra.mxu0 %v2304_v45  ;;  %815 = vmatpush1.bf16.msra.mxu1 %v2309_v46 }
  0x4c   :  { %775 = vmatprep.subr.bf16.mxu0 %v2316_v47  ;;  %816 = vmatprep.subr.bf16.mxu1 %v2323_v48 }
  0x4f   :  { %776 = vmatpush1.bf16.msra.mxu0 %v2328_v49  ;;  %817 = vmatpush1.bf16.msra.mxu1 %v2333_v50 }
  0x50   :  { %777 = vmatprep.subr.bf16.mxu0 %v2340_v51  ;;  %818 = vmatprep.subr.bf16.mxu1 %v2347_v52 }
  0x53   :  { %778 = vmatpush1.bf16.msra.mxu0 %v2359_v54  ;;  %819 = vmatpush1.bf16.msra.mxu1 %v2364_v55 }
  0x54   :  { %779 = vmatprep.subr.bf16.mxu0 %v2371_v56  ;;  %820 = vmatprep.subr.bf16.mxu1 %v2376_v57 }
  0x57   :  { %780 = vmatpush1.bf16.msra.mxu0 %v2383_v58  ;;  %821 = vmatpush1.bf16.msra.mxu1 %v2388_v59 }
  0x58   :  { %781 = vmatprep.subr.bf16.mxu0 %v2395_v60  ;;  %822 = vmatprep.subr.bf16.mxu1 %v2400_v61 }
  0x5b   :  { %782 = vmatpush1.bf16.msra.mxu0 %v2412_v63  ;;  %823 = vmatpush1.bf16.msra.mxu1 %v2417_v0 }
  0x5c   :  { %783 = vmatprep.subr.bf16.mxu0 %v2424_v2  ;;  %824 = vmatprep.subr.bf16.mxu1 %v2429_v3 }
  0x5f   :  { %784 = vmatpush1.bf16.msra.mxu0 %v2436_v4  ;;  %825 = vmatpush1.bf16.msra.mxu1 %v2441_v5 }
  0x60   :  { %885 = vmatprep.subr.bf16.mxu0 %v2240_v33  ;;  %926 = vmatprep.subr.bf16.mxu1 %v2245_v34 }
  0xf5   :  { %v2490_v15 = vpop.f32.mrb[0].mxu0  ;;  %v2492_v16 = vpop.f32.mrb[0].mxu1 }
  0xf6   :  { %v312_v19 = vpop.f32.mrb[1].mxu0  ;;  %v385_v20 = vpop.f32.mrb[1].mxu1 }
  0xf7   :  { %v314_v22 = vpop.f32.mrb[2].mxu0  ;;  %v387_v23 = vpop.f32.mrb[2].mxu1 }
  0xf8   :  { %v2496_v24 = vadd.f32 %v314_v22, %v75_v18  ;;  %v316_v25 = vpop.f32.mrb[3].mxu0  ;;  %v2499_v26 = vadd.f32 %v387_v23, %v2488_v14  ;;  %v389_v27 = vpop.f32.mrb[3].mxu1 }
  0xf9   :  { %v2501_v28 = vadd.f32 %v316_v25, %v79_v21  ;;  %v2504_v29 = vadd.f32 %v389_v27, %v2494_v17 }
  0xfd   :  { %v320_v30 = vpop.f32.mrb[4].mxu0  ;;  %v393_v31 = vpop.f32.mrb[4].mxu1 }
  0xfe   :  { %v2506_v32 = vadd.f32 %v320_v30, %v75_v18  ;;  %v322_v35 = vpop.f32.mrb[5].mxu0  ;;  %v2509_v44 = vadd.f32 %v393_v31, %v2488_v14  ;;  %v395_v53 = vpop.f32.mrb[5].mxu1 }
  0xff   :  { %v2511_v62 = vadd.f32 %v322_v35, %v79_v21  ;;  %v324_v6 = vpop.f32.mrb[6].mxu0  ;;  %v2514_v7 = vadd.f32 %v395_v53, %v2494_v17  ;;  %v397_v8 = vpop.f32.mrb[6].mxu1 }
 0x100   :  { %v2516_v9 = vadd.f32 %v324_v6, %v75_v18  ;;  %v326_v10 = vpop.f32.mrb[7].mxu0  ;;  %v2519_v11 = vadd.f32 %v397_v8, %v2488_v14  ;;  %v399_v12 = vpop.f32.mrb[7].mxu1 }
 0x101   :  { %2991 = vst [vmem:[#allocation5_spill] sm:$0xff] %v2514_v7  ;;  %v2521_v13 = vadd.f32 %v326_v10, %v79_v21  ;;  %v2524_v22 = vadd.f32 %v399_v12, %v2494_v17 }
 0x102   :  { %2992 = vst [vmem:[#allocation6_spill] sm:$0xff] %v2516_v9  ;;  %2993 = vst [vmem:[#allocation7_spill] sm:$0xff] %v2519_v11 }
 0x103   :  { %2994 = vst [vmem:[#allocation8_spill] sm:$0xff] %v2521_v13  ;;  %2995 = vst [vmem:[#allocation9_spill] sm:$0xff] %v2524_v22 }
 0x105   :  { %v330_v23 = vpop.f32.mrb[8].mxu0  ;;  %v403_v25 = vpop.f32.mrb[8].mxu1 }
 0x106   :  { %v2526_v27 = vadd.f32 %v330_v23, %v75_v18  ;;  %v332_v30 = vpop.f32.mrb[9].mxu0  ;;  %v2529_v31 = vadd.f32 %v403_v25, %v2488_v14  ;;  %v405_v35 = vpop.f32.mrb[9].mxu1 }
 0x107   :  { %v2531_v53 = vadd.f32 %v332_v30, %v79_v21  ;;  %v334_v6 = vpop.f32.mrb[10].mxu0  ;;  %v2534_v8 = vadd.f32 %v405_v35, %v2494_v17  ;;  %v407_v10 = vpop.f32.mrb[10].mxu1 }
 0x108   :  { %2996 = vst [vmem:[#allocation10_spill] sm:$0xff] %v2526_v27  ;;  %2997 = vst [vmem:[#allocation11_spill] sm:$0xff] %v2529_v31  ;;  %v2536_v1 = vadd.f32 %v334_v6, %v75_v18  ;;  %v336_v12 = vpop.f32.mrb[11].mxu0  ;;  %v2539_v22 = vadd.f32 %v407_v10, %v2488_v14  ;;  %v409_v23 = vpop.f32.mrb[11].mxu1 }
 0x109   :  { %2998 = vst [vmem:[#allocation12_spill] sm:$0xff] %v2531_v53  ;;  %2999 = vst [vmem:[#allocation13_spill] sm:$0xff] %v2534_v8  ;;  %v2541_v27 = vadd.f32 %v336_v12, %v79_v21  ;;  %v2544_v25 = vadd.f32 %v409_v23, %v2494_v17 }
 0x10a   :  { %3000 = vst [vmem:[#allocation14_spill] sm:$0xff] %v2536_v1  ;;  %3001 = vst [vmem:[#allocation15_spill] sm:$0xff] %v2539_v22 }
 0x10b   :  { %3002 = vst [vmem:[#allocation16_spill] sm:$0xff] %v2541_v27  ;;  %3003 = vst [vmem:[#allocation17_spill] sm:$0xff] %v2544_v25 }
 0x10d   :  { %v340_v31 = vpop.f32.mrb[12].mxu0  ;;  %v413_v30 = vpop.f32.mrb[12].mxu1 }
 0x10e   :  { %v2546_v53 = vadd.f32 %v340_v31, %v75_v18  ;;  %v342_v13 = vpop.f32.mrb[13].mxu0  ;;  %v2549_v35 = vadd.f32 %v413_v30, %v2488_v14  ;;  %v415_v6 = vpop.f32.mrb[13].mxu1 }
 0x10f   :  { %v2551_v1 = vadd.f32 %v342_v13, %v79_v21  ;;  %v344_v8 = vpop.f32.mrb[14].mxu0  ;;  %v2554_v10 = vadd.f32 %v415_v6, %v2494_v17  ;;  %v417_v12 = vpop.f32.mrb[14].mxu1  ;;  %v311_v13 = vadd.f32 %v2490_v15, %v75_v18  ;;  %v313_v6 = vadd.f32 %v312_v19, %v79_v21 }
 0x110   :  { %3004 = vst [vmem:[#allocation18_spill] sm:$0xff] %v2546_v53  ;;  %3005 = vst [vmem:[#allocation19_spill] sm:$0xff] %v2549_v35  ;;  %v2556_v27 = vadd.f32 %v344_v8, %v75_v18  ;;  %v346_v23 = vpop.f32.mrb[15].mxu0  ;;  %v2559_v25 = vadd.f32 %v417_v12, %v2488_v14  ;;  %v419_v31 = vpop.f32.mrb[15].mxu1 }
 0x111   :  { %3006 = vst [vmem:[#allocation20_spill] sm:$0xff] %v2551_v1  ;;  %3007 = vst [vmem:[#allocation21_spill] sm:$0xff] %v2554_v10  ;;  %v2561_v53 = vadd.f32 %v346_v23, %v79_v21  ;;  %v2564_v30 = vadd.f32 %v419_v31, %v2494_v17  ;;  %v384_v1 = vadd.f32 %v2492_v16, %v2488_v14 }
 0x112   :  { %3008 = vst [vmem:[#allocation22_spill] sm:$0xff] %v2556_v27  ;;  %3009 = vst [vmem:[#allocation23_spill] sm:$0xff] %v2559_v25  ;;  %v386_v10 = vadd.f32 %v385_v20, %v2494_v17 }
 0x113   :  { %3010 = vst [vmem:[#allocation24_spill] sm:$0xff] %v2561_v53  ;;  %3011 = vst [vmem:[#allocation25_spill] sm:$0xff] %v2564_v30 }
 0x115   :  { %v687_v8 = vpop.f32.mrb[16].mxu0  ;;  %v728_v27 = vpop.f32.mrb[16].mxu1 }
 0x116   :  { %v735_v35 = vadd.f32 %v687_v8, %v311_v13  ;;  %v737_v22 = vadd.f32 %v728_v27, %v384_v1  ;;  %v689_v12 = vpop.f32.mrb[17].mxu0  ;;  %v730_v25 = vpop.f32.mrb[17].mxu1 }
 0x117   :  { %v736_v11 = vadd.f32 %v689_v12, %v313_v6  ;;  %v738_v23 = vadd.f32 %v730_v25, %v386_v10  ;;  %v691_v53 = vpop.f32.mrb[18].mxu0  ;;  %v732_v9 = vpop.f32.mrb[18].mxu1 }
 0x118   :  { %v1766_v31 = vmul.f32 -1.442695, %v735_v35  ;;  %v692_v30 = vpop.f32.mrb[19].mxu0  ;;  %v733_v7 = vpop.f32.mrb[19].mxu1 }
 0x119   :  { %v1767_v15 = vmul.f32 -1.442695, %v736_v11  ;;  %v1768_v14 = vmul.f32 -1.442695, %v738_v23 }
 0x11a   :  { %1940 = vpow2.f32 %v1766_v31 }
 0x11b   :  { %1942 = vpow2.f32 %v1767_v15 }
 0x11c   :  { %1944 = vpow2.f32 %v1768_v14 }
 0x11d   :  { %1946 = vtanh.f32 %v737_v22  ;;  %v3012_v22 = vmov 0  }
 0x124   :  { %v1941_v16 = vpop.eup %1940 }
 0x125   :  { %v1943_v18 = vpop.eup %1942  ;;  %v742_v17 = vadd.f32 1.0, %v1941_v16 }
 0x126   :  { %v748_v19 = vadd.f32 1.0, %v1943_v18  ;;  %v1945_v1 = vpop.eup %1944 }
 0x127   :  { %1948 = vrcp.f32 %v742_v17  ;;  %v1947_v20 = vpop.eup %1946  ;;  %v755_v53 = vadd.f32 1.0, %v1945_v1 }
 0x128   :  { %1950 = vrcp.f32 %v748_v19 }
 0x129   :  { %1952 = vrcp.f32 %v755_v53 }
 0x131   :  { %v1949_v21 = vpop.eup %1948 }
 0x132   :  { %v1951_v27 = vpop.eup %1950  ;;  %v759_v9 = vmul.f32 %v1949_v21, %v1947_v20 }
 0x133   :  { %v758_v25 = vmul.f32 0.0, %v1951_v27  ;;  %v1953_v11 = vpop.eup %1952 }
 0x135   :  { %v2570_v7 = vadd.f32 %v759_v9, %v758_v25 }
 0x137   :  { %1954 = vtanh.f32 %v2570_v7 }
 0x141   :  { %v1955_v35 = vpop.eup %1954 }
 0x142   :  { %v762_v10 = vmul.f32 %v1955_v35, %v1953_v11 }
 0x144   :  { %v768_v30 = vpack.c.bf16 %v762_v10, %v762_v10 }
 0x146   :  { %802 = vmatmul.mubr.bf16.vlgmr.msra.gmra.mrb[20].mxu0 %v768_v30  ;;  %843 = vmatmul.mubr.bf16.vlgmr.msra.gmra.mrb[20].mxu1 %v768_v30 }
 0x147   :  { %886 = vmatpush1.bf16.msra.mxu0 %v2253_v36  ;;  %927 = vmatpush1.bf16.msra.mxu1 %v2258_v37 }
 0x148   :  { %887 = vmatprep.subr.bf16.mxu0 %v2265_v38  ;;  %928 = vmatprep.subr.bf16.mxu1 %v2270_v39 }
 0x149   :  { %917 = vmatprep.mubr.bf16.mxu0 %v3012_v22  ;;  %958 = vmatprep.mubr.bf16.mxu1 %v3012_v22 }
 0x14b   :  { %888 = vmatpush1.bf16.msra.mxu0 %v2275_v40  ;;  %929 = vmatpush1.bf16.msra.mxu1 %v2282_v41 }
 0x14c   :  { %889 = vmatprep.subr.bf16.mxu0 %v2289_v42  ;;  %930 = vmatprep.subr.bf16.mxu1 %v2294_v43 }
 0x14f   :  { %890 = vmatpush1.bf16.msra.mxu0 %v2304_v45  ;;  %931 = vmatpush1.bf16.msra.mxu1 %v2309_v46 }
 0x150   :  { %891 = vmatprep.subr.bf16.mxu0 %v2316_v47  ;;  %932 = vmatprep.subr.bf16.mxu1 %v2323_v48 }
 0x153   :  { %892 = vmatpush1.bf16.msra.mxu0 %v2328_v49  ;;  %933 = vmatpush1.bf16.msra.mxu1 %v2333_v50 }
 0x154   :  { %893 = vmatprep.subr.bf16.mxu0 %v2340_v51  ;;  %934 = vmatprep.subr.bf16.mxu1 %v2347_v52 }
 0x157   :  { %894 = vmatpush1.bf16.msra.mxu0 %v2359_v54  ;;  %935 = vmatpush1.bf16.msra.mxu1 %v2364_v55 }
 0x158   :  { %895 = vmatprep.subr.bf16.mxu0 %v2371_v56  ;;  %936 = vmatprep.subr.bf16.mxu1 %v2376_v57 }
 0x15b   :  { %896 = vmatpush1.bf16.msra.mxu0 %v2383_v58  ;;  %937 = vmatpush1.bf16.msra.mxu1 %v2388_v59 }
 0x15c   :  { %897 = vmatprep.subr.bf16.mxu0 %v2395_v60  ;;  %938 = vmatprep.subr.bf16.mxu1 %v2400_v61 }
 0x15f   :  { %898 = vmatpush1.bf16.msra.mxu0 %v2412_v63  ;;  %939 = vmatpush1.bf16.msra.mxu1 %v2417_v0 }
 0x160   :  { %899 = vmatprep.subr.bf16.mxu0 %v2424_v2  ;;  %940 = vmatprep.subr.bf16.mxu1 %v2429_v3 }
 0x163   :  { %900 = vmatpush1.bf16.msra.mxu0 %v2436_v4  ;;  %941 = vmatpush1.bf16.msra.mxu1 %v2441_v5 }
 0x164   :  { %1001 = vmatprep.subr.bf16.mxu0 %v2240_v33  ;;  %1042 = vmatprep.subr.bf16.mxu1 %v2245_v34 }
 0x219   :  { %v803_v13 = vpop.f32.mrb[20].mxu0  ;;  %v844_v6 = vpop.f32.mrb[20].mxu1 }
 0x21a   :  { %v851_v8 = vadd.f32 %v803_v13, %v2496_v24  ;;  %v853_v12 = vadd.f32 %v844_v6, %v2499_v26  ;;  %v805_v23 = vpop.f32.mrb[21].mxu0  ;;  %v846_v31 = vpop.f32.mrb[21].mxu1 }
 0x21b   :  { %v852_v15 = vadd.f32 %v805_v23, %v2501_v28  ;;  %v854_v14 = vadd.f32 %v846_v31, %v2504_v29  ;;  %v807_v16 = vpop.f32.mrb[22].mxu0  ;;  %v848_v18 = vpop.f32.mrb[22].mxu1 }
 0x21c   :  { %v1769_v17 = vmul.f32 -1.442695, %v851_v8  ;;  %v808_v19 = vpop.f32.mrb[23].mxu0  ;;  %v849_v1 = vpop.f32.mrb[23].mxu1 }
 0x21d   :  { %v1770_v20 = vmul.f32 -1.442695, %v852_v15  ;;  %v1771_v21 = vmul.f32 -1.442695, %v854_v14 }
 0x21e   :  { %1956 = vpow2.f32 %v1769_v17  ;;  %v3013_v17 = vld [vmem:[#allocation5_spill] sm:$0xff] }
 0x21f   :  { %1958 = vpow2.f32 %v1770_v20 }
 0x220   :  { %1960 = vpow2.f32 %v1771_v21 }
 0x221   :  { %1962 = vtanh.f32 %v853_v12 }
 0x228   :  { %v1957_v27 = vpop.eup %1956 }
 0x229   :  { %v1959_v9 = vpop.eup %1958  ;;  %v858_v24 = vadd.f32 1.0, %v1957_v27 }
 0x22a   :  { %v864_v26 = vadd.f32 1.0, %v1959_v9  ;;  %v1961_v28 = vpop.eup %1960 }
 0x22b   :  { %1964 = vrcp.f32 %v858_v24  ;;  %v1963_v53 = vpop.eup %1962  ;;  %v871_v35 = vadd.f32 1.0, %v1961_v28 }
 0x22c   :  { %1966 = vrcp.f32 %v864_v26 }
 0x22d   :  { %1968 = vrcp.f32 %v871_v35 }
 0x235   :  { %v1965_v29 = vpop.eup %1964 }
 0x236   :  { %v1967_v25 = vpop.eup %1966  ;;  %v875_v11 = vmul.f32 %v1965_v29, %v1963_v53 }
 0x237   :  { %v874_v10 = vmul.f32 %v1967_v25, %v2570_v7  ;;  %v1969_v13 = vpop.eup %1968 }
 0x239   :  { %v2612_v30 = vadd.f32 %v875_v11, %v874_v10 }
 0x23b   :  { %1970 = vtanh.f32 %v2612_v30 }
 0x245   :  { %v1971_v6 = vpop.eup %1970 }
 0x246   :  { %v878_v8 = vmul.f32 %v1971_v6, %v1969_v13 }
 0x248   :  { %v884_v12 = vpack.c.bf16 %v878_v8, %v878_v8 }
 0x24a   :  { %918 = vmatmul.mubr.bf16.vlgmr.msra.gmra.mrb[24].mxu0 %v884_v12  ;;  %959 = vmatmul.mubr.bf16.vlgmr.msra.gmra.mrb[24].mxu1 %v884_v12 }
 0x24b   :  { %1002 = vmatpush1.bf16.msra.mxu0 %v2253_v36  ;;  %1043 = vmatpush1.bf16.msra.mxu1 %v2258_v37 }
 0x24c   :  { %1003 = vmatprep.subr.bf16.mxu0 %v2265_v38  ;;  %1044 = vmatprep.subr.bf16.mxu1 %v2270_v39 }
 0x24d   :  { %1033 = vmatprep.mubr.bf16.mxu0 %v3012_v22  ;;  %1074 = vmatprep.mubr.bf16.mxu1 %v3012_v22 }
 0x24f   :  { %1004 = vmatpush1.bf16.msra.mxu0 %v2275_v40  ;;  %1045 = vmatpush1.bf16.msra.mxu1 %v2282_v41 }
 0x250   :  { %1005 = vmatprep.subr.bf16.mxu0 %v2289_v42  ;;  %1046 = vmatprep.subr.bf16.mxu1 %v2294_v43 }
 0x253   :  { %1006 = vmatpush1.bf16.msra.mxu0 %v2304_v45  ;;  %1047 = vmatpush1.bf16.msra.mxu1 %v2309_v46 }
 0x254   :  { %1007 = vmatprep.subr.bf16.mxu0 %v2316_v47  ;;  %1048 = vmatprep.subr.bf16.mxu1 %v2323_v48 }
 0x257   :  { %1008 = vmatpush1.bf16.msra.mxu0 %v2328_v49  ;;  %1049 = vmatpush1.bf16.msra.mxu1 %v2333_v50 }
 0x258   :  { %1009 = vmatprep.subr.bf16.mxu0 %v2340_v51  ;;  %1050 = vmatprep.subr.bf16.mxu1 %v2347_v52 }
 0x25b   :  { %1010 = vmatpush1.bf16.msra.mxu0 %v2359_v54  ;;  %1051 = vmatpush1.bf16.msra.mxu1 %v2364_v55 }
 0x25c   :  { %1011 = vmatprep.subr.bf16.mxu0 %v2371_v56  ;;  %1052 = vmatprep.subr.bf16.mxu1 %v2376_v57 }
 0x25f   :  { %1012 = vmatpush1.bf16.msra.mxu0 %v2383_v58  ;;  %1053 = vmatpush1.bf16.msra.mxu1 %v2388_v59 }
 0x260   :  { %1013 = vmatprep.subr.bf16.mxu0 %v2395_v60  ;;  %1054 = vmatprep.subr.bf16.mxu1 %v2400_v61 }
 0x263   :  { %1014 = vmatpush1.bf16.msra.mxu0 %v2412_v63  ;;  %1055 = vmatpush1.bf16.msra.mxu1 %v2417_v0 }
 0x264   :  { %1015 = vmatprep.subr.bf16.mxu0 %v2424_v2  ;;  %1056 = vmatprep.subr.bf16.mxu1 %v2429_v3 }
 0x267   :  { %1016 = vmatpush1.bf16.msra.mxu0 %v2436_v4  ;;  %1057 = vmatpush1.bf16.msra.mxu1 %v2441_v5 }
 0x268   :  { %1117 = vmatprep.subr.bf16.mxu0 %v2240_v33  ;;  %1158 = vmatprep.subr.bf16.mxu1 %v2245_v34 }
 0x31d   :  { %v919_v7 = vpop.f32.mrb[24].mxu0  ;;  %v960_v23 = vpop.f32.mrb[24].mxu1 }
 0x31e   :  { %v967_v31 = vadd.f32 %v919_v7, %v2506_v32  ;;  %v969_v15 = vadd.f32 %v960_v23, %v2509_v44  ;;  %v921_v14 = vpop.f32.mrb[25].mxu0  ;;  %v962_v16 = vpop.f32.mrb[25].mxu1 }
 0x31f   :  { %v968_v18 = vadd.f32 %v921_v14, %v2511_v62  ;;  %v970_v19 = vadd.f32 %v962_v16, %v3013_v17  ;;  %v923_v1 = vpop.f32.mrb[26].mxu0  ;;  %v964_v20 = vpop.f32.mrb[26].mxu1  ;;  %v3015_v16 = vld [vmem:[#allocation7_spill] sm:$0xff] }
 0x320   :  { %v1772_v21 = vmul.f32 -1.442695, %v967_v31  ;;  %v924_v27 = vpop.f32.mrb[27].mxu0  ;;  %v965_v9 = vpop.f32.mrb[27].mxu1  ;;  %v3016_v1 = vld [vmem:[#allocation8_spill] sm:$0xff] }
 0x321   :  { %v1773_v24 = vmul.f32 -1.442695, %v968_v18  ;;  %v1774_v26 = vmul.f32 -1.442695, %v970_v19 }
 0x322   :  { %1972 = vpow2.f32 %v1772_v21  ;;  %v3017_v21 = vld [vmem:[#allocation9_spill] sm:$0xff] }
 0x323   :  { %1974 = vpow2.f32 %v1773_v24 }
 0x324   :  { %1976 = vpow2.f32 %v1774_v26 }
 0x325   :  { %1978 = vtanh.f32 %v969_v15  ;;  %v3014_v15 = vld [vmem:[#allocation6_spill] sm:$0xff] }
 0x32c   :  { %v1973_v28 = vpop.eup %1972 }
 0x32d   :  { %v1975_v53 = vpop.eup %1974  ;;  %v974_v32 = vadd.f32 1.0, %v1973_v28 }
 0x32e   :  { %v980_v44 = vadd.f32 1.0, %v1975_v53  ;;  %v1977_v62 = vpop.eup %1976 }
 0x32f   :  { %1980 = vrcp.f32 %v974_v32  ;;  %v1979_v29 = vpop.eup %1978  ;;  %v987_v10 = vadd.f32 1.0, %v1977_v62 }
 0x330   :  { %1982 = vrcp.f32 %v980_v44 }
 0x331   :  { %1984 = vrcp.f32 %v987_v10 }
 0x339   :  { %v1981_v25 = vpop.eup %1980 }
 0x33a   :  { %v1983_v11 = vpop.eup %1982  ;;  %v991_v35 = vmul.f32 %v1981_v25, %v1979_v29 }
 0x33b   :  { %v990_v13 = vmul.f32 %v1983_v11, %v2612_v30  ;;  %v1985_v8 = vpop.eup %1984 }
 0x33d   :  { %v2654_v6 = vadd.f32 %v991_v35, %v990_v13 }
 0x33f   :  { %1986 = vtanh.f32 %v2654_v6 }
 0x349   :  { %v1987_v12 = vpop.eup %1986 }
 0x34a   :  { %v994_v7 = vmul.f32 %v1987_v12, %v1985_v8 }
 0x34c   :  { %v1000_v23 = vpack.c.bf16 %v994_v7, %v994_v7 }
 0x34e   :  { %1034 = vmatmul.mubr.bf16.vlgmr.msra.gmra.mrb[28].mxu0 %v1000_v23  ;;  %1075 = vmatmul.mubr.bf16.vlgmr.msra.gmra.mrb[28].mxu1 %v1000_v23 }
 0x34f   :  { %1118 = vmatpush1.bf16.msra.mxu0 %v2253_v36  ;;  %1159 = vmatpush1.bf16.msra.mxu1 %v2258_v37 }
 0x350   :  { %1119 = vmatprep.subr.bf16.mxu0 %v2265_v38  ;;  %1160 = vmatprep.subr.bf16.mxu1 %v2270_v39 }
 0x351   :  { %1149 = vmatprep.mubr.bf16.mxu0 %v3012_v22  ;;  %1190 = vmatprep.mubr.bf16.mxu1 %v3012_v22 }
 0x353   :  { %1120 = vmatpush1.bf16.msra.mxu0 %v2275_v40  ;;  %1161 = vmatpush1.bf16.msra.mxu1 %v2282_v41 }
 0x354   :  { %1121 = vmatprep.subr.bf16.mxu0 %v2289_v42  ;;  %1162 = vmatprep.subr.bf16.mxu1 %v2294_v43 }
 0x357   :  { %1122 = vmatpush1.bf16.msra.mxu0 %v2304_v45  ;;  %1163 = vmatpush1.bf16.msra.mxu1 %v2309_v46 }
 0x358   :  { %1123 = vmatprep.subr.bf16.mxu0 %v2316_v47  ;;  %1164 = vmatprep.subr.bf16.mxu1 %v2323_v48 }
 0x35b   :  { %1124 = vmatpush1.bf16.msra.mxu0 %v2328_v49  ;;  %1165 = vmatpush1.bf16.msra.mxu1 %v2333_v50 }
 0x35c   :  { %1125 = vmatprep.subr.bf16.mxu0 %v2340_v51  ;;  %1166 = vmatprep.subr.bf16.mxu1 %v2347_v52 }
 0x35f   :  { %1126 = vmatpush1.bf16.msra.mxu0 %v2359_v54  ;;  %1167 = vmatpush1.bf16.msra.mxu1 %v2364_v55 }
 0x360   :  { %1127 = vmatprep.subr.bf16.mxu0 %v2371_v56  ;;  %1168 = vmatprep.subr.bf16.mxu1 %v2376_v57 }
 0x363   :  { %1128 = vmatpush1.bf16.msra.mxu0 %v2383_v58  ;;  %1169 = vmatpush1.bf16.msra.mxu1 %v2388_v59 }
 0x364   :  { %1129 = vmatprep.subr.bf16.mxu0 %v2395_v60  ;;  %1170 = vmatprep.subr.bf16.mxu1 %v2400_v61 }
 0x367   :  { %1130 = vmatpush1.bf16.msra.mxu0 %v2412_v63  ;;  %1171 = vmatpush1.bf16.msra.mxu1 %v2417_v0 }
 0x368   :  { %1131 = vmatprep.subr.bf16.mxu0 %v2424_v2  ;;  %1172 = vmatprep.subr.bf16.mxu1 %v2429_v3 }
 0x36b   :  { %1132 = vmatpush1.bf16.msra.mxu0 %v2436_v4  ;;  %1173 = vmatpush1.bf16.msra.mxu1 %v2441_v5 }
 0x36c   :  { %1233 = vmatprep.subr.bf16.mxu0 %v2240_v33  ;;  %1274 = vmatprep.subr.bf16.mxu1 %v2245_v34 }
 0x421   :  { %v1035_v30 = vpop.f32.mrb[28].mxu0  ;;  %v1076_v31 = vpop.f32.mrb[28].mxu1 }
 0x422   :  { %v1083_v14 = vadd.f32 %v1035_v30, %v3014_v15  ;;  %v1085_v18 = vadd.f32 %v1076_v31, %v3015_v16  ;;  %v1037_v17 = vpop.f32.mrb[29].mxu0  ;;  %v1078_v19 = vpop.f32.mrb[29].mxu1 }
 0x423   :  { %v1084_v20 = vadd.f32 %v1037_v17, %v3016_v1  ;;  %v1086_v27 = vadd.f32 %v1078_v19, %v3017_v21  ;;  %v1039_v9 = vpop.f32.mrb[30].mxu0  ;;  %v1080_v24 = vpop.f32.mrb[30].mxu1 }
 0x424   :  { %v1775_v26 = vmul.f32 -1.442695, %v1083_v14  ;;  %v1040_v28 = vpop.f32.mrb[31].mxu0  ;;  %v1081_v53 = vpop.f32.mrb[31].mxu1 }
 0x425   :  { %v1776_v33 = vmul.f32 -1.442695, %v1084_v20  ;;  %v1777_v34 = vmul.f32 -1.442695, %v1086_v27 }
 0x426   :  { %1988 = vpow2.f32 %v1775_v26 }
 0x427   :  { %1990 = vpow2.f32 %v1776_v33 }
 0x428   :  { %1992 = vpow2.f32 %v1777_v34 }
 0x429   :  { %1994 = vtanh.f32 %v1085_v18 }
 0x430   :  { %v1989_v32 = vpop.eup %1988 }
 0x431   :  { %v1991_v44 = vpop.eup %1990  ;;  %v1090_v62 = vadd.f32 1.0, %v1989_v32 }
 0x432   :  { %v1096_v29 = vadd.f32 1.0, %v1991_v44  ;;  %v1993_v25 = vpop.eup %1992 }
 0x433   :  { %1996 = vrcp.f32 %v1090_v62  ;;  %v1995_v11 = vpop.eup %1994  ;;  %v1103_v8 = vadd.f32 1.0, %v1993_v25  ;;  %v2754_v62 = vld [vmem:[%s2984_s2] ss:$16 sps:$4 sm:$0xff]   ;;  %v2766_v25 = vld [vmem:[%s2984_s2 + $0x24] ss:$16 sps:$4 sm:$0xff]  }
 0x434   :  { %1998 = vrcp.f32 %v1096_v29  ;;  %v2760_v29 = vld [vmem:[%s2984_s2 + $0x8] ss:$16 sps:$4 sm:$0xff]  }
 0x435   :  { %2000 = vrcp.f32 %v1103_v8  ;;  %v2798_v8 = vld [vmem:[%s2984_s2 + $0x4c] ss:$16 sps:$4 sm:$0xff]  }
 0x43d   :  { %v1997_v35 = vpop.eup %1996 }
 0x43e   :  { %v1999_v10 = vpop.eup %1998  ;;  %v1107_v13 = vmul.f32 %v1997_v35, %v1995_v11  ;;  %v2772_v11 = vld [vmem:[%s2984_s2 + $0x2c] ss:$16 sps:$4 sm:$0xff]   ;;  %v2780_v35 = vld [vmem:[%s2984_s2 + $0x20] ss:$16 sps:$4 sm:$0xff]  }
 0x43f   :  { %v1106_v12 = vmul.f32 %v1999_v10, %v2654_v6  ;;  %v2001_v23 = vpop.eup %2000  ;;  %v2786_v10 = vld [vmem:[%s2984_s2 + $0x28] ss:$16 sps:$4 sm:$0xff]  }
 0x441   :  { %v2696_v7 = vadd.f32 %v1107_v13, %v1106_v12  ;;  %v2792_v13 = vld [vmem:[%s2984_s2 + $0x44] ss:$16 sps:$4 sm:$0xff]   ;;  %v2804_v12 = vld [vmem:[%s2984_s2 + $0x40] ss:$16 sps:$4 sm:$0xff]  }
 0x443   :  { %2002 = vtanh.f32 %v2696_v7 }
 0x44d   :  { %v2003_v30 = vpop.eup %2002 }
 0x44e   :  { %v1110_v31 = vmul.f32 %v2003_v30, %v2001_v23  ;;  %v2816_v23 = vld [vmem:[%s2984_s2 + $0x64] ss:$16 sps:$4 sm:$0xff]   ;;  %v2822_v30 = vld [vmem:[%s2984_s2 + $0x6c] ss:$16 sps:$4 sm:$0xff]  }
 0x450   :  { %v1116_v15 = vpack.c.bf16 %v1110_v31, %v1110_v31  ;;  %v2828_v31 = vld [vmem:[%s2984_s2 + $0x60] ss:$16 sps:$4 sm:$0xff]  }
 0x452   :  { %1150 = vmatmul.mubr.bf16.vlgmr.msra.gmra.mrb[32].mxu0 %v1116_v15  ;;  %1191 = vmatmul.mubr.bf16.vlgmr.msra.gmra.mrb[32].mxu1 %v1116_v15  ;;  %v2834_v15 = vld [vmem:[%s2984_s2 + $0x68] ss:$16 sps:$4 sm:$0xff]  }
 0x453   :  { %1234 = vmatpush1.bf16.msra.mxu0 %v2253_v36  ;;  %1275 = vmatpush1.bf16.msra.mxu1 %v2258_v37  ;;  %v2734_v36 = vld [vmem:[%s2984_s2 + $0x4] ss:$16 sps:$4 sm:$0xff]   ;;  %v2740_v37 = vld [vmem:[%s2984_s2 + $0xc] ss:$16 sps:$4 sm:$0xff]  }
 0x454   :  { %1235 = vmatprep.subr.bf16.mxu0 %v2265_v38  ;;  %1276 = vmatprep.subr.bf16.mxu1 %v2270_v39 }
 0x455   :  { %1265 = vmatprep.mubr.bf16.mxu0 %v3012_v22  ;;  %1306 = vmatprep.mubr.bf16.mxu1 %v3012_v22 }
 0x457   :  { %1236 = vmatpush1.bf16.msra.mxu0 %v2275_v40  ;;  %1277 = vmatpush1.bf16.msra.mxu1 %v2282_v41  ;;  %v3018_v40 = vld [vmem:[#allocation10_spill] sm:$0xff] }
 0x458   :  { %1237 = vmatprep.subr.bf16.mxu0 %v2289_v42  ;;  %1278 = vmatprep.subr.bf16.mxu1 %v2294_v43  ;;  %v3019_v42 = vld [vmem:[#allocation11_spill] sm:$0xff] }
 0x45b   :  { %1238 = vmatpush1.bf16.msra.mxu0 %v2304_v45  ;;  %1279 = vmatpush1.bf16.msra.mxu1 %v2309_v46 }
 0x45c   :  { %1239 = vmatprep.subr.bf16.mxu0 %v2316_v47  ;;  %1280 = vmatprep.subr.bf16.mxu1 %v2323_v48  ;;  %v3020_v47 = vld [vmem:[#allocation12_spill] sm:$0xff] }
 0x45f   :  { %1240 = vmatpush1.bf16.msra.mxu0 %v2328_v49  ;;  %1281 = vmatpush1.bf16.msra.mxu1 %v2333_v50  ;;  %v3021_v49 = vld [vmem:[#allocation13_spill] sm:$0xff] }
 0x460   :  { %1241 = vmatprep.subr.bf16.mxu0 %v2340_v51  ;;  %1282 = vmatprep.subr.bf16.mxu1 %v2347_v52 }
 0x463   :  { %1242 = vmatpush1.bf16.msra.mxu0 %v2359_v54  ;;  %1283 = vmatpush1.bf16.msra.mxu1 %v2364_v55 }
 0x464   :  { %1243 = vmatprep.subr.bf16.mxu0 %v2371_v56  ;;  %1284 = vmatprep.subr.bf16.mxu1 %v2376_v57 }
 0x467   :  { %1244 = vmatpush1.bf16.msra.mxu0 %v2383_v58  ;;  %1285 = vmatpush1.bf16.msra.mxu1 %v2388_v59 }
 0x468   :  { %1245 = vmatprep.subr.bf16.mxu0 %v2395_v60  ;;  %1286 = vmatprep.subr.bf16.mxu1 %v2400_v61 }
 0x46b   :  { %1246 = vmatpush1.bf16.msra.mxu0 %v2412_v63  ;;  %1287 = vmatpush1.bf16.msra.mxu1 %v2417_v0 }
 0x46c   :  { %1247 = vmatprep.subr.bf16.mxu0 %v2424_v2  ;;  %1288 = vmatprep.subr.bf16.mxu1 %v2429_v3 }
 0x46f   :  { %1248 = vmatpush1.bf16.msra.mxu0 %v2436_v4  ;;  %1289 = vmatpush1.bf16.msra.mxu1 %v2441_v5 }
 0x470   :  { %1349 = vmatprep.subr.bf16.mxu0 %v2734_v36  ;;  %1390 = vmatprep.subr.bf16.mxu1 %v2740_v37 }
 0x525   :  { %v1151_v38 = vpop.f32.mrb[32].mxu0  ;;  %v1192_v39 = vpop.f32.mrb[32].mxu1 }
 0x526   :  { %v1199_v41 = vadd.f32 %v1151_v38, %v3018_v40  ;;  %v1201_v43 = vadd.f32 %v1192_v39, %v3019_v42  ;;  %v1153_v45 = vpop.f32.mrb[33].mxu0  ;;  %v1194_v46 = vpop.f32.mrb[33].mxu1  ;;  %v2840_v38 = vld [vmem:[%s2984_s2 + $0x84] ss:$16 sps:$4 sm:$0xff]   ;;  %v2846_v39 = vld [vmem:[%s2984_s2 + $0x8c] ss:$16 sps:$4 sm:$0xff]  }
 0x527   :  { %v1200_v48 = vadd.f32 %v1153_v45, %v3020_v47  ;;  %v1202_v50 = vadd.f32 %v1194_v46, %v3021_v49  ;;  %v1155_v51 = vpop.f32.mrb[34].mxu0  ;;  %v1196_v52 = vpop.f32.mrb[34].mxu1  ;;  %v2852_v40 = vld [vmem:[%s2984_s2 + $0x80] ss:$16 sps:$4 sm:$0xff]   ;;  %v3024_v42 = vld [vmem:[#allocation16_spill] sm:$0xff] }
 0x528   :  { %v1778_v54 = vmul.f32 -1.442695, %v1199_v41  ;;  %v1156_v55 = vpop.f32.mrb[35].mxu0  ;;  %v1197_v6 = vpop.f32.mrb[35].mxu1  ;;  %v2858_v41 = vld [vmem:[%s2984_s2 + $0x88] ss:$16 sps:$4 sm:$0xff]  }
 0x529   :  { %v1779_v14 = vmul.f32 -1.442695, %v1200_v48  ;;  %v1780_v16 = vmul.f32 -1.442695, %v1202_v50 }
 0x52a   :  { %2004 = vpow2.f32 %v1778_v54 }
 0x52b   :  { %2006 = vpow2.f32 %v1779_v14 }
 0x52c   :  { %2008 = vpow2.f32 %v1780_v16 }
 0x52d   :  { %2010 = vtanh.f32 %v1201_v43  ;;  %v3025_v43 = vld [vmem:[#allocation17_spill] sm:$0xff] }
 0x534   :  { %v2005_v18 = vpop.eup %2004 }
 0x535   :  { %v2007_v17 = vpop.eup %2006  ;;  %v1206_v19 = vadd.f32 1.0, %v2005_v18 }
 0x536   :  { %v1212_v1 = vadd.f32 1.0, %v2007_v17  ;;  %v2009_v20 = vpop.eup %2008 }
 0x537   :  { %2012 = vrcp.f32 %v1206_v19  ;;  %v2011_v21 = vpop.eup %2010  ;;  %v1219_v26 = vadd.f32 1.0, %v2009_v20 }
 0x538   :  { %2014 = vrcp.f32 %v1212_v1 }
 0x539   :  { %2016 = vrcp.f32 %v1219_v26  ;;  %v2092_v26 = vld [vmem:[%s2984_s2 + $0xc4] ss:$16 sps:$4 sm:$0xff]  }
 0x541   :  { %v2013_v27 = vpop.eup %2012 }
 0x542   :  { %v2015_v9 = vpop.eup %2014  ;;  %v1223_v24 = vmul.f32 %v2013_v27, %v2011_v21  ;;  %v2089_v27 = vld [vmem:[%s2984_s2 + $0xac] ss:$16 sps:$4 sm:$0xff]  }
 0x543   :  { %v1222_v28 = vmul.f32 %v2015_v9, %v2696_v7  ;;  %v2017_v33 = vpop.eup %2016  ;;  %v2810_v7 = vld [vmem:[%s2984_s2 + $0x48] ss:$16 sps:$4 sm:$0xff]   ;;  %v2090_v9 = vld [vmem:[%s2984_s2 + $0xa0] ss:$16 sps:$4 sm:$0xff]  }
 0x545   :  { %v2748_v53 = vadd.f32 %v1223_v24, %v1222_v28  ;;  %v2091_v24 = vld [vmem:[%s2984_s2 + $0xa8] ss:$16 sps:$4 sm:$0xff]   ;;  %v2093_v28 = vld [vmem:[%s2984_s2 + $0xcc] ss:$16 sps:$4 sm:$0xff]  }
 0x547   :  { %2018 = vtanh.f32 %v2748_v53 }
 0x551   :  { %v2019_v34 = vpop.eup %2018 }
 0x552   :  { %v1226_v32 = vmul.f32 %v2019_v34, %v2017_v33  ;;  %v2095_v33 = vld [vmem:[%s2984_s2 + $0xc8] ss:$16 sps:$4 sm:$0xff]   ;;  %v2096_v34 = vld [vmem:[%s2984_s2 + $0xe4] ss:$16 sps:$4 sm:$0xff]  }
 0x554   :  { %v1232_v44 = vpack.c.bf16 %v1226_v32, %v1226_v32  ;;  %v2097_v32 = vld [vmem:[%s2984_s2 + $0xec] ss:$16 sps:$4 sm:$0xff]  }
 0x556   :  { %1266 = vmatmul.mubr.bf16.vlgmr.msra.gmra.mrb[36].mxu0 %v1232_v44  ;;  %1307 = vmatmul.mubr.bf16.vlgmr.msra.gmra.mrb[36].mxu1 %v1232_v44  ;;  %v2098_v44 = vld [vmem:[%s2984_s2 + $0xe0] ss:$16 sps:$4 sm:$0xff]  }
 0x557   :  { %1350 = vmatpush1.bf16.msra.mxu0 %v2754_v62  ;;  %1391 = vmatpush1.bf16.msra.mxu1 %v2760_v29 }
 0x558   :  { %1351 = vmatprep.subr.bf16.mxu0 %v2766_v25  ;;  %1392 = vmatprep.subr.bf16.mxu1 %v2772_v11 }
 0x559   :  { %1381 = vmatprep.mubr.bf16.mxu0 %v3012_v22  ;;  %1422 = vmatprep.mubr.bf16.mxu1 %v3012_v22 }
 0x55b   :  { %1352 = vmatpush1.bf16.msra.mxu0 %v2780_v35  ;;  %1393 = vmatpush1.bf16.msra.mxu1 %v2786_v10 }
 0x55c   :  { %1353 = vmatprep.subr.bf16.mxu0 %v2792_v13  ;;  %1394 = vmatprep.subr.bf16.mxu1 %v2798_v8 }
 0x55f   :  { %1354 = vmatpush1.bf16.msra.mxu0 %v2804_v12  ;;  %1395 = vmatpush1.bf16.msra.mxu1 %v2810_v7 }
 0x560   :  { %1355 = vmatprep.subr.bf16.mxu0 %v2816_v23  ;;  %1396 = vmatprep.subr.bf16.mxu1 %v2822_v30 }
 0x563   :  { %1356 = vmatpush1.bf16.msra.mxu0 %v2828_v31  ;;  %1397 = vmatpush1.bf16.msra.mxu1 %v2834_v15 }
 0x564   :  { %1357 = vmatprep.subr.bf16.mxu0 %v2840_v38  ;;  %1398 = vmatprep.subr.bf16.mxu1 %v2846_v39 }
 0x567   :  { %1358 = vmatpush1.bf16.msra.mxu0 %v2852_v40  ;;  %1399 = vmatpush1.bf16.msra.mxu1 %v2858_v41 }
 0x568   :  { %1359 = vmatprep.subr.bf16.mxu0 %v2371_v56  ;;  %1400 = vmatprep.subr.bf16.mxu1 %v2376_v57 }
 0x56b   :  { %1360 = vmatpush1.bf16.msra.mxu0 %v2383_v58  ;;  %1401 = vmatpush1.bf16.msra.mxu1 %v2388_v59  ;;  %v3022_v58 = vld [vmem:[#allocation14_spill] sm:$0xff] }
 0x56c   :  { %1361 = vmatprep.subr.bf16.mxu0 %v2395_v60  ;;  %1402 = vmatprep.subr.bf16.mxu1 %v2400_v61  ;;  %v3023_v60 = vld [vmem:[#allocation15_spill] sm:$0xff] }
 0x56f   :  { %1362 = vmatpush1.bf16.msra.mxu0 %v2412_v63  ;;  %1403 = vmatpush1.bf16.msra.mxu1 %v2417_v0 }
 0x570   :  { %1363 = vmatprep.subr.bf16.mxu0 %v2424_v2  ;;  %1404 = vmatprep.subr.bf16.mxu1 %v2429_v3 }
 0x573   :  { %1364 = vmatpush1.bf16.msra.mxu0 %v2436_v4  ;;  %1405 = vmatpush1.bf16.msra.mxu1 %v2441_v5 }
 0x574   :  { %1465 = vmatprep.subr.bf16.mxu0 %v2734_v36  ;;  %1506 = vmatprep.subr.bf16.mxu1 %v2740_v37 }
 0x629   :  { %v1267_v56 = vpop.f32.mrb[36].mxu0  ;;  %v1308_v57 = vpop.f32.mrb[36].mxu1 }
 0x62a   :  { %v1315_v59 = vadd.f32 %v1267_v56, %v3022_v58  ;;  %v1317_v61 = vadd.f32 %v1308_v57, %v3023_v60  ;;  %v1269_v63 = vpop.f32.mrb[37].mxu0  ;;  %v1310_v0 = vpop.f32.mrb[37].mxu1 }
 0x62b   :  { %v1316_v2 = vadd.f32 %v1269_v63, %v3024_v42  ;;  %v1318_v3 = vadd.f32 %v1310_v0, %v3025_v43  ;;  %v1271_v45 = vpop.f32.mrb[38].mxu0  ;;  %v1312_v4 = vpop.f32.mrb[38].mxu1 }
 0x62c   :  { %v1781_v46 = vmul.f32 -1.442695, %v1315_v59  ;;  %v1272_v5 = vpop.f32.mrb[39].mxu0  ;;  %v1313_v47 = vpop.f32.mrb[39].mxu1 }
 0x62d   :  { %v1782_v36 = vmul.f32 -1.442695, %v1316_v2  ;;  %v1783_v37 = vmul.f32 -1.442695, %v1318_v3 }
 0x62e   :  { %2020 = vpow2.f32 %v1781_v46 }
 0x62f   :  { %2022 = vpow2.f32 %v1782_v36 }
 0x630   :  { %2024 = vpow2.f32 %v1783_v37  ;;  %v1932_v37 = vld [vmem:[%s2986_s4] sm:$0xff]  }
 0x631   :  { %2026 = vtanh.f32 %v1317_v61 }
 0x638   :  { %v2021_v48 = vpop.eup %2020 }
 0x639   :  { %v2023_v49 = vpop.eup %2022  ;;  %v1322_v50 = vadd.f32 1.0, %v2021_v48  ;;  %v2102_v48 = vmov 0.0  }
 0x63a   :  { %v1328_v51 = vadd.f32 1.0, %v2023_v49  ;;  %v2025_v52 = vpop.eup %2024  ;;  %v1933_v49 = vld [vmem:[%s2986_s4 + $0x8] sm:$0xff]  }
 0x63b   :  { %2028 = vrcp.f32 %v1322_v50  ;;  %v2027_v54 = vpop.eup %2026  ;;  %v1335_v16 = vadd.f32 1.0, %v2025_v52  ;;  %v1934_v50 = vld [vmem:[%s2986_s4 + $0x10] sm:$0xff]   ;;  %v1936_v52 = vld [vmem:[%s2986_s4 + $0x20] sm:$0xff]  }
 0x63c   :  { %2030 = vrcp.f32 %v1328_v51  ;;  %v1935_v51 = vld [vmem:[%s2986_s4 + $0x18] sm:$0xff]  }
 0x63d   :  { %2032 = vrcp.f32 %v1335_v16 }
 0x645   :  { %v2029_v55 = vpop.eup %2028 }
 0x646   :  { %v2031_v6 = vpop.eup %2030  ;;  %v1339_v14 = vmul.f32 %v2029_v55, %v2027_v54  ;;  %v1937_v54 = vld [vmem:[%s2986_s4 + $0x28] sm:$0xff]   ;;  %v1938_v55 = vld [vmem:[%s2986_s4 + $0x30] sm:$0xff]  }
 0x647   :  { %v1338_v18 = vmul.f32 %v2031_v6, %v2748_v53  ;;  %v2033_v19 = vpop.eup %2032  ;;  %v2094_v53 = vld [vmem:[%s2984_s2 + $0xc0] ss:$16 sps:$4 sm:$0xff]   ;;  %v1939_v6 = vld [vmem:[%s2986_s4 + $0x38] sm:$0xff]  }
 0x649   :  { %v2880_v17 = vadd.f32 %v1339_v14, %v1338_v18  ;;  %v3030_v18 = vld [vmem:[#allocation22_spill] sm:$0xff] }
 0x64b   :  { %2034 = vtanh.f32 %v2880_v17 }
 0x655   :  { %v2035_v1 = vpop.eup %2034 }
 0x656   :  { %v1342_v20 = vmul.f32 %v2035_v1, %v2033_v19  ;;  %v3031_v19 = vld [vmem:[#allocation23_spill] sm:$0xff] }
 0x658   :  { %v1348_v21 = vpack.c.bf16 %v1342_v20, %v1342_v20 }
 0x65a   :  { %1382 = vmatmul.mubr.bf16.vlgmr.msra.gmra.mrb[40].mxu0 %v1348_v21  ;;  %1423 = vmatmul.mubr.bf16.vlgmr.msra.gmra.mrb[40].mxu1 %v1348_v21 }
 0x65b   :  { %1466 = vmatpush1.bf16.msra.mxu0 %v2754_v62  ;;  %1507 = vmatpush1.bf16.msra.mxu1 %v2760_v29  ;;  %v2099_v62 = vld [vmem:[%s2984_s2 + $0xe8] ss:$16 sps:$4 sm:$0xff]  }
 0x65c   :  { %1467 = vmatprep.subr.bf16.mxu0 %v2766_v25  ;;  %1508 = vmatprep.subr.bf16.mxu1 %v2772_v11  ;;  %v3026_v11 = vld [vmem:[#allocation18_spill] sm:$0xff] }
 0x65d   :  { %1497 = vmatprep.mubr.bf16.mxu0 %v3012_v22  ;;  %1538 = vmatprep.mubr.bf16.mxu1 %v3012_v22  ;;  %v2088_v22 = vld [vmem:[%s2984_s2 + $0xa4] ss:$16 sps:$4 sm:$0xff]  }
 0x65f   :  { %1468 = vmatpush1.bf16.msra.mxu0 %v2780_v35  ;;  %1509 = vmatpush1.bf16.msra.mxu1 %v2786_v10  ;;  %v3027_v10 = vld [vmem:[#allocation19_spill] sm:$0xff] }
 0x660   :  { %1469 = vmatprep.subr.bf16.mxu0 %v2792_v13  ;;  %1510 = vmatprep.subr.bf16.mxu1 %v2798_v8 }
 0x663   :  { %1470 = vmatpush1.bf16.msra.mxu0 %v2804_v12  ;;  %1511 = vmatpush1.bf16.msra.mxu1 %v2810_v7  ;;  %v3028_v7 = vld [vmem:[#allocation20_spill] sm:$0xff] }
 0x664   :  { %1471 = vmatprep.subr.bf16.mxu0 %v2816_v23  ;;  %1512 = vmatprep.subr.bf16.mxu1 %v2822_v30  ;;  %v3029_v30 = vld [vmem:[#allocation21_spill] sm:$0xff] }
 0x667   :  { %1472 = vmatpush1.bf16.msra.mxu0 %v2828_v31  ;;  %1513 = vmatpush1.bf16.msra.mxu1 %v2834_v15 }
 0x668   :  { %1473 = vmatprep.subr.bf16.mxu0 %v2840_v38  ;;  %1514 = vmatprep.subr.bf16.mxu1 %v2846_v39 }
 0x66b   :  { %1474 = vmatpush1.bf16.msra.mxu0 %v2852_v40  ;;  %1515 = vmatpush1.bf16.msra.mxu1 %v2858_v41 }
 0x66c   :  { %1475 = vmatprep.subr.bf16.mxu0 %v2088_v22  ;;  %1516 = vmatprep.subr.bf16.mxu1 %v2089_v27  ;;  %v3032_v22 = vld [vmem:[#allocation24_spill] sm:$0xff] }
 0x66f   :  { %1476 = vmatpush1.bf16.msra.mxu0 %v2090_v9  ;;  %1517 = vmatpush1.bf16.msra.mxu1 %v2091_v24  ;;  %v3033_v9 = vld [vmem:[#allocation25_spill] sm:$0xff] }
 0x670   :  { %1477 = vmatprep.subr.bf16.mxu0 %v2092_v26  ;;  %1518 = vmatprep.subr.bf16.mxu1 %v2093_v28 }
 0x673   :  { %1478 = vmatpush1.bf16.msra.mxu0 %v2094_v53  ;;  %1519 = vmatpush1.bf16.msra.mxu1 %v2095_v33 }
 0x674   :  { %1479 = vmatprep.subr.bf16.mxu0 %v2096_v34  ;;  %1520 = vmatprep.subr.bf16.mxu1 %v2097_v32 }
 0x677   :  { %1480 = vmatpush1.bf16.msra.mxu0 %v2098_v44  ;;  %1521 = vmatpush1.bf16.msra.mxu1 %v2099_v62 }
 0x678   :  { %1808 = vmatprep.subr.bf16.mxu0 %v2102_v48 }
 0x72d   :  { %v1383_v29 = vpop.f32.mrb[40].mxu0  ;;  %v1424_v25 = vpop.f32.mrb[40].mxu1 }
 0x72e   :  { %v1431_v35 = vadd.f32 %v1383_v29, %v3026_v11  ;;  %v1433_v13 = vadd.f32 %v1424_v25, %v3027_v10  ;;  %v1385_v8 = vpop.f32.mrb[41].mxu0  ;;  %v1426_v12 = vpop.f32.mrb[41].mxu1 }
 0x72f   :  { %v1432_v23 = vadd.f32 %v1385_v8, %v3028_v7  ;;  %v1434_v31 = vadd.f32 %v1426_v12, %v3029_v30  ;;  %v1387_v15 = vpop.f32.mrb[42].mxu0  ;;  %v1428_v38 = vpop.f32.mrb[42].mxu1 }
 0x730   :  { %v1784_v39 = vmul.f32 -1.442695, %v1431_v35  ;;  %v1388_v40 = vpop.f32.mrb[43].mxu0  ;;  %v1429_v41 = vpop.f32.mrb[43].mxu1 }
 0x731   :  { %v1785_v56 = vmul.f32 -1.442695, %v1432_v23  ;;  %v1786_v57 = vmul.f32 -1.442695, %v1434_v31  ;;  %v1790_v40 = vld [vmem:[%s2987_s5] ss:$0 sm:$0xff] }
 0x732   :  { %2036 = vpow2.f32 %v1784_v39 }
 0x733   :  { %2038 = vpow2.f32 %v1785_v56 }
 0x734   :  { %2040 = vpow2.f32 %v1786_v57 }
 0x735   :  { %2042 = vtanh.f32 %v1433_v13 }
 0x73c   :  { %v2037_v58 = vpop.eup %2036 }
 0x73d   :  { %v2039_v59 = vpop.eup %2038  ;;  %v1438_v60 = vadd.f32 1.0, %v2037_v58 }
 0x73e   :  { %v1444_v61 = vadd.f32 1.0, %v2039_v59  ;;  %v2041_v63 = vpop.eup %2040 }
 0x73f   :  { %2044 = vrcp.f32 %v1438_v60  ;;  %v2043_v0 = vpop.eup %2042  ;;  %v1451_v3 = vadd.f32 1.0, %v2041_v63 }
 0x740   :  { %2046 = vrcp.f32 %v1444_v61 }
 0x741   :  { %2048 = vrcp.f32 %v1451_v3 }
 0x749   :  { %v2045_v42 = vpop.eup %2044 }
 0x74a   :  { %v2047_v2 = vpop.eup %2046  ;;  %v1455_v43 = vmul.f32 %v2045_v42, %v2043_v0 }
 0x74b   :  { %v1454_v45 = vmul.f32 %v2047_v2, %v2880_v17  ;;  %v2049_v46 = vpop.eup %2048 }
 0x74d   :  { %v2944_v4 = vadd.f32 %v1455_v43, %v1454_v45 }
 0x74f   :  { %2050 = vtanh.f32 %v2944_v4 }
 0x759   :  { %v2051_v5 = vpop.eup %2050 }
 0x75a   :  { %v1458_v47 = vmul.f32 %v2051_v5, %v2049_v46 }
 0x75c   :  { %v1464_v36 = vpack.c.bf16 %v1458_v47, %v1458_v47 }
 0x75e   :  { %1498 = vmatmul.mubr.bf16.vlgmr.msra.gmra.mrb[44].mxu0 %v1464_v36  ;;  %1539 = vmatmul.mubr.bf16.vlgmr.msra.gmra.mrb[44].mxu1 %v1464_v36 }
 0x75f   :  { %1809 = vmatpush3.bf16.msra.mxu0 %v1932_v37  ;;  %1824 = vmatprep.mubr.msk.bf16.mxu0 %vm2103_vm0, %v2102_v48 }
 0x760   :  { %1810 = vmatprep.subr.bf16.mxu0 %v2102_v48 }
 0x763   :  { %1811 = vmatpush3.bf16.msra.mxu0 %v1933_v49 }
 0x764   :  { %1812 = vmatprep.subr.bf16.mxu0 %v2102_v48 }
 0x767   :  { %1813 = vmatpush3.bf16.msra.mxu0 %v1934_v50 }
 0x768   :  { %1814 = vmatprep.subr.bf16.mxu0 %v2102_v48 }
 0x76b   :  { %1815 = vmatpush3.bf16.msra.mxu0 %v1935_v51 }
 0x76c   :  { %1816 = vmatprep.subr.bf16.mxu0 %v2102_v48 }
 0x76f   :  { %1817 = vmatpush3.bf16.msra.mxu0 %v1936_v52 }
 0x770   :  { %1818 = vmatprep.subr.bf16.mxu0 %v2102_v48 }
 0x773   :  { %1819 = vmatpush3.bf16.msra.mxu0 %v1937_v54 }
 0x774   :  { %1820 = vmatprep.subr.bf16.mxu0 %v2102_v48 }
 0x777   :  { %1821 = vmatpush3.bf16.msra.mxu0 %v1938_v55 }
 0x778   :  { %1822 = vmatprep.subr.bf16.mxu0 %v2102_v48 }
 0x77b   :  { %1823 = vmatpush3.bf16.msra.mxu0 %v1939_v6 }
 0x831   :  { %v1499_v14 = vpop.f32.mrb[44].mxu0  ;;  %v1540_v16 = vpop.f32.mrb[44].mxu1 }
 0x832   :  { %v1547_v17 = vadd.f32 %v1499_v14, %v3030_v18  ;;  %v1549_v1 = vadd.f32 %v1540_v16, %v3031_v19  ;;  %v1501_v20 = vpop.f32.mrb[45].mxu0  ;;  %v1542_v21 = vpop.f32.mrb[45].mxu1 }
 0x833   :  { %v1548_v27 = vadd.f32 %v1501_v20, %v3032_v22  ;;  %v1550_v24 = vadd.f32 %v1542_v21, %v3033_v9  ;;  %v1503_v26 = vpop.f32.mrb[46].mxu0  ;;  %v1544_v28 = vpop.f32.mrb[46].mxu1 }
 0x834   :  { %v1787_v53 = vmul.f32 -1.442695, %v1547_v17  ;;  %v1504_v33 = vpop.f32.mrb[47].mxu0  ;;  %v1545_v34 = vpop.f32.mrb[47].mxu1 }
 0x835   :  { %v1788_v32 = vmul.f32 -1.442695, %v1548_v27  ;;  %v1789_v44 = vmul.f32 -1.442695, %v1550_v24 }
 0x836   :  { %2052 = vpow2.f32 %v1787_v53 }
 0x837   :  { %2054 = vpow2.f32 %v1788_v32 }
 0x838   :  { %2056 = vpow2.f32 %v1789_v44 }
 0x839   :  { %2058 = vtanh.f32 %v1549_v1 }
 0x840   :  { %v2053_v62 = vpop.eup %2052 }
 0x841   :  { %v2055_v29 = vpop.eup %2054  ;;  %v1554_v25 = vadd.f32 1.0, %v2053_v62 }
 0x842   :  { %v1560_v11 = vadd.f32 1.0, %v2055_v29  ;;  %v2057_v35 = vpop.eup %2056 }
 0x843   :  { %2060 = vrcp.f32 %v1554_v25  ;;  %v2059_v10 = vpop.eup %2058  ;;  %v1567_v7 = vadd.f32 1.0, %v2057_v35 }
 0x844   :  { %2062 = vrcp.f32 %v1560_v11 }
 0x845   :  { %2064 = vrcp.f32 %v1567_v7 }
 0x84d   :  { %v2061_v13 = vpop.eup %2060 }
 0x84e   :  { %v2063_v8 = vpop.eup %2062  ;;  %v1571_v12 = vmul.f32 %v2061_v13, %v2059_v10 }
 0x84f   :  { %v1570_v23 = vmul.f32 %v2063_v8, %v2944_v4  ;;  %v2065_v31 = vpop.eup %2064 }
 0x851   :  { %v1572_v30 = vadd.f32 %v1571_v12, %v1570_v23 }
 0x853   :  { %2066 = vtanh.f32 %v1572_v30 }
 0x85d   :  { %v2067_v15 = vpop.eup %2066 }
 0x85e   :  { %v1574_v38 = vmul.f32 %v2067_v15, %v2065_v31 }
 0x860   :  { %v1580_v39 = vpack.c.bf16 %v1574_v38, %v1574_v38 }
 0x862   :  { %1825 = vmatmul.mubr.bf16.vlgmr.msra.gmra.mrb[48].mxu0 %v1580_v39 }
 0x935   :  { %v1686_v41 = vpop.f32.mrb[48].mxu0 }
 0x936   :  { %v1687_v56 = vadd.f32 %v1790_v40, %v1686_v41  ;;  %v1826_v57 = vpop.f32.mrb[49].mxu0 }
 0x937   :  { %v1689_v58 = vpop.f32.mrb[50].mxu0 }
 0x938   :  { %1693 = vst.msk [vmem:[%s2988_s6] sm:$0xff] %vm1692_vm1, %v1687_v56  ;;  %v1827_v59 = vpop.f32.mrb[51].mxu0 }

</bundles_post_ra>
